<compile_context>
chip_gen: v7x
topology: tpu7x:2x2x1
jax: 0.10.0
libtpu: 0.0.40
codegen_flags: <defaults>
</compile_context>

<pallas_src>
import math
import functools

import numpy as np
import jax
import jax.numpy as jnp
from jax.experimental import pallas as pl
from jax.experimental.pallas import tpu as pltpu


# ----------------------------------------------------------------- attention kernel
# Runs once per batch element on the pooled (Td, F) input.  Produces the
# layer-scaled attention output (B, Td, F) in f32 (tiny, read once per time tile).

def _ega_attn_kernel(xd_ref, pos_ref, wqkv_ref, bqkv_ref, wo_ref, bo_ref, ls_ref,
                     scaled_ref, *, num_heads: int, d_head: int):
    f32, bf16 = jnp.float32, jnp.bfloat16
    H, D = num_heads, d_head
    F = H * D
    Td = xd_ref.shape[1]

    xd = xd_ref[0].astype(f32)                                   # (Td, F)

    # fused QKV projection: one (Td, F) @ (F, 3F) matmul, bf16 in / f32 acc
    qkv_f = jnp.dot(xd.astype(bf16), wqkv_ref[...],
                    preferred_element_type=f32) + bqkv_ref[...]  # (Td, 3F) f32
    q3f = qkv_f[:, 0 * F:1 * F].reshape(Td, H, D)                # f32 (for pos bias)
    qkv = qkv_f.astype(bf16)
    q3 = qkv[:, 0 * F:1 * F].reshape(Td, H, D)                   # (Td, H, D) bf16
    k3 = qkv[:, 1 * F:2 * F].reshape(Td, H, D)
    v3 = qkv[:, 2 * F:3 * F].reshape(Td, H, D)
    qh = pltpu.einshape("ihd->hid", q3)                          # (H, Td, D)
    kh = pltpu.einshape("ihd->hid", k3)
    vh = pltpu.einshape("ihd->hid", v3)

    # content scores: head-batched matmul on the MXU (M=Td, N=Td, K=D per head)
    content = jnp.einsum("hid,hjd->hij", qh, kh,
                         preferred_element_type=f32)             # (H, Td, Td)

    # relative-position bias posb[h,i,j] = sum_d q[i,h,d] * pos[i,j,d]
    # VPU multiply-and-reduce per head (H is small & static): avoids Td tiny
    # M=H matmuls and lands directly in (H, Td, Td) -- no lane-moving transpose.
    pos_f = pos_ref[...].astype(f32)                             # (Td, Td, D)
    posb_heads = []
    for h in range(H):
        qh_f = q3f[:, h, :]                                      # (Td, D) f32
        posb_heads.append(jnp.sum(pos_f * qh_f[:, None, :], axis=-1))  # (Td, Td)
    posb = jnp.stack(posb_heads, axis=0)                         # (H, Td, Td)

    s = (content + posb) * (1.0 / math.sqrt(D))
    s = s - jnp.max(s, axis=-1, keepdims=True)
    e = jnp.exp(s)
    # approx reciprocal (EUP) -> ~1e-3 rel error in the softmax denom; covered by
    # the test tolerance and fine for this module.
    attn = e * pl.reciprocal(jnp.sum(e, axis=-1, keepdims=True), approx=True)
    # TODO(synk): attention-weight dropout omitted (eval-mode identity).

    ctx_h = jnp.einsum("hij,hjd->hid", attn.astype(bf16), vh,
                       preferred_element_type=f32)               # (H, Td, D)
    ctx = pltpu.einshape("hid->ihd", ctx_h).reshape(Td, F)       # (Td, F)

    # single output projection (K = F) + LayerScale
    mh = jnp.dot(ctx.astype(bf16), wo_ref[...],
                 preferred_element_type=f32) + bo_ref[...]
    scaled_ref[0] = mh * ls_ref[...]                             # (Td, F) f32


# ----------------------------------------------------------------- streaming kernel
# Full-resolution branch: LayerNorm + gate Linear + Sigmoid, nearest upsample of the
# layer-scaled attention, final multiply.  Tiled over T; both grid axes parallel.

def _ega_gate_kernel(x_ref, scaled_ref, lng_ref, lnb_ref, wg_ref, bg_ref,
                     o_ref, gate_ref, *, stride: int, time_tile: int):
    f32, bf16 = jnp.float32, jnp.bfloat16
    tT = time_tile
    t = pl.program_id(1)

    xt = x_ref[0].astype(f32)                                    # (tT, F)

    # LayerNorm with one-pass statistics: var = E[x^2] - mu^2
    mu = jnp.mean(xt, axis=-1, keepdims=True)
    ex2 = jnp.mean(xt * xt, axis=-1, keepdims=True)
    var = ex2 - mu * mu
    xn = (xt - mu) * jax.lax.rsqrt(var + 1e-5)
    xn = xn * lng_ref[...] + lnb_ref[...]

    # gate matmul keeps a large M (= time_tile) shape; sigmoid stays in f32 (v5e VPU)
    gate_ref[...] = jax.nn.sigmoid(
        jnp.dot(xn.astype(bf16), wg_ref[...],
                preferred_element_type=f32) + bg_ref[...])       # (tT, F) f32

    if stride == 1:
        # Td == T: nearest upsample is the identity
        o_ref[0] = (gate_ref[...] *
                    scaled_ref[0, pl.ds(t * tT, tT), :]).astype(o_ref.dtype)
    else:
        td_tile = tT // stride                                   # downsampled rows/tile
        row_base = t * td_tile

        # nearest-neighbor upsample: one downsampled row -> `stride` output rows;
        # avoids the (td, stride, F)->(tT, F) reshape relayout each grid step.
        @pl.loop(0, td_tile)
        def _(j):
            out0 = j * stride
            if stride % 8 == 0:
                out0 = pl.multiple_of(out0, 8)
            row = scaled_ref[0, pl.ds(row_base + j, 1), :]       # (1, F) f32
            o_ref[0, pl.ds(out0, stride), :] = (
                gate_ref[pl.ds(out0, stride), :] * row).astype(o_ref.dtype)


# ----------------------------------------------------------------- wrapper

def prepare_ega_params(params):
    """One-time parameter prep: fuse Wq/Wk/Wv and cast matmul weights to bf16."""
    bf16, f32 = jnp.bfloat16, jnp.float32
    return {
        "wqkv": jnp.concatenate([params["wq"], params["wk"], params["wv"]],
                                axis=1).astype(bf16),            # (F, 3F)
        "bqkv": jnp.concatenate([params["bq"], params["bk"], params["bv"]],
                                axis=1).astype(f32),             # (1, 3F)
        "wo": params["wo"].astype(bf16),
        "bo": params["bo"].astype(f32),
        "ls": params["ls"].astype(f32),
        "ln_g": params["ln_g"].astype(f32),
        "ln_b": params["ln_b"].astype(f32),
        "wg": params["wg"].astype(bf16),
        "bg": params["bg"].astype(f32),
    }


def _default_time_tile(T, stride):
    # ~512-row tiles reach >=85% of HBM roofline; must divide T, be a multiple of
    # stride, and keep the block (8,128)-legal.
    if T <= 512:
        return T
    for cand in range(512, 7, -1):
        if T % cand == 0 and cand % stride == 0 and cand % 8 == 0:
            return cand
    return T


def ega_pallas(x, pos_emb, prepared, *, time_tile=None):
    """EGA forward.  Pass x in bf16 to avoid an extra cast pass (recommended)."""
    B, T, F = x.shape
    Td, _, D = pos_emb.shape
    H = F // D
    assert F == H * D
    # Reshape-mean pooling matches torch adaptive_avg_pool1d only when T % Td == 0.
    # TODO(synk): for T % Td != 0, fall back to a segment-sum pooling path.
    assert T % Td == 0
    stride = T // Td

    if time_tile is None:
        time_tile = _default_time_tile(T, stride)
    assert T % time_tile == 0 and time_tile % stride == 0
    assert time_tile % 8 == 0 or time_tile == T
    n_t = T // time_tile

    f32, bf16 = jnp.float32, jnp.bfloat16
    x_bf = x if x.dtype == bf16 else x.astype(bf16)
    # adaptive average pool over time == reshape + mean (exact, T % Td == 0)
    xd = x.astype(f32).reshape(B, Td, stride, F).mean(axis=2)    # (B, Td, F) f32
    pos = pos_emb.astype(bf16)

    # ---- low-resolution attention branch: tiny, once per batch element ----------
    attn_kernel = functools.partial(_ega_attn_kernel, num_heads=H, d_head=D)
    scaled = pl.pallas_call(
        attn_kernel,
        out_shape=jax.ShapeDtypeStruct((B, Td, F), f32),
        grid=(B,),
        in_specs=[
            pl.BlockSpec((1, Td, F), lambda b: (b, 0, 0)),       # pooled x
            pl.BlockSpec((Td, Td, D), lambda b: (0, 0, 0)),      # pos_emb (bf16)
            pl.BlockSpec((F, 3 * F), lambda b: (0, 0)),          # fused Wqkv
            pl.BlockSpec((1, 3 * F), lambda b: (0, 0)),          # fused bqkv
            pl.BlockSpec((F, F), lambda b: (0, 0)),              # Wo
            pl.BlockSpec((1, F), lambda b: (0, 0)),              # bo
            pl.BlockSpec((1, F), lambda b: (0, 0)),              # LayerScale gamma
        ],
        out_specs=pl.BlockSpec((1, Td, F), lambda b: (b, 0, 0)),
        compiler_params=pltpu.CompilerParams(dimension_semantics=("parallel",)),
    )(xd, pos, prepared["wqkv"], prepared["bqkv"], prepared["wo"],
      prepared["bo"], prepared["ls"])

    # ---- full-resolution streaming branch: bf16 in / bf16 out, tiled over T ------
    gate_kernel = functools.partial(_ega_gate_kernel, stride=stride,
                                    time_tile=time_tile)
    out = pl.pallas_call(
        gate_kernel,
        out_shape=jax.ShapeDtypeStruct((B, T, F), bf16),
        grid=(B, n_t),
        in_specs=[
            pl.BlockSpec((1, time_tile, F), lambda b, t: (b, t, 0)),  # x tile (bf16)
            pl.BlockSpec((1, Td, F), lambda b, t: (b, 0, 0)),         # scaled attn
            pl.BlockSpec((1, F), lambda b, t: (0, 0)),                # LN gamma
            pl.BlockSpec((1, F), lambda b, t: (0, 0)),                # LN beta
            pl.BlockSpec((F, F), lambda b, t: (0, 0)),                # gate W
            pl.BlockSpec((1, F), lambda b, t: (0, 0)),                # gate b
        ],
        out_specs=pl.BlockSpec((1, time_tile, F), lambda b, t: (b, t, 0)),
        scratch_shapes=[pltpu.VMEM((time_tile, F), f32)],             # gate buffer
        compiler_params=pltpu.CompilerParams(
            # no cross-tile state -> both axes parallel (both v7x TCs used even B=1)
            dimension_semantics=("parallel", "parallel"),
        ),
    )(x_bf, scaled, prepared["ln_g"], prepared["ln_b"], prepared["wg"],
      prepared["bg"])
    return out


# ----------------------------------------------------------------- plain-JAX reference

def ega_reference(x, pos_emb, params):
    B, T, F = x.shape
    Td, _, D = pos_emb.shape
    H = F // D
    stride = T // Td

    xd = x.reshape(B, Td, stride, F).mean(axis=2)
    q = xd @ params["wq"] + params["bq"]
    k = xd @ params["wk"] + params["bk"]
    v = xd @ params["wv"] + params["bv"]
    qh = q.reshape(B, Td, H, D)
    kh = k.reshape(B, Td, H, D)
    vh = v.reshape(B, Td, H, D)
    content = jnp.einsum("bihd,bjhd->bhij", qh, kh)
    pos_bias = jnp.einsum("bihd,ijd->bhij", qh, pos_emb)
    attn = jax.nn.softmax((content + pos_bias) / math.sqrt(D), axis=-1)
    ctx = jnp.einsum("bhij,bjhd->bihd", attn, vh).reshape(B, Td, F)
    mh = ctx @ params["wo"] + params["bo"]
    scaled = mh * params["ls"]
    up = jnp.repeat(scaled, stride, axis=1)

    mu = x.mean(-1, keepdims=True)
    var = ((x - mu) ** 2).mean(-1, keepdims=True)
    xn = (x - mu) / jnp.sqrt(var + 1e-5)
    xn = xn * params["ln_g"] + params["ln_b"]
    gate = jax.nn.sigmoid(xn @ params["wg"] + params["bg"])
    return gate * up


# ----------------------------------------------------------------- main

if __name__ == "__main__":
    B, T, F, H = 2, 64, 128, 4          # batch, time, in_channels(d_model), heads
    D = F // H                          # head dim = 32
    Td = 16                             # T / 2^R with R = 2 -> stride 4
    scale_init = 1e-5                   # LayerScale default from the module

    key = jax.random.PRNGKey(0)
    ks = jax.random.split(key, 12)
    s = 1.0 / math.sqrt(F)

    x = jax.random.normal(ks[0], (B, T, F), jnp.float32)
    pos_emb = jax.random.normal(ks[1], (Td, Td, D), jnp.float32) * 0.1

    params = {
        "wq": jax.random.normal(ks[2], (F, F), jnp.float32) * s,
        "bq": jax.random.normal(ks[3], (1, F), jnp.float32) * 0.01,
        "wk": jax.random.normal(ks[4], (F, F), jnp.float32) * s,
        "bk": jax.random.normal(ks[5], (1, F), jnp.float32) * 0.01,
        "wv": jax.random.normal(ks[6], (F, F), jnp.float32) * s,
        "bv": jax.random.normal(ks[7], (1, F), jnp.float32) * 0.01,
        "wo": jax.random.normal(ks[8], (F, F), jnp.float32) * s,
        "bo": jax.random.normal(ks[9], (1, F), jnp.float32) * 0.01,
        "ls": jnp.full((1, F), scale_init, jnp.float32),       # LayerScale gamma
        "ln_g": jnp.ones((1, F), jnp.float32),                 # LayerNorm weight
        "ln_b": jnp.zeros((1, F), jnp.float32),                # LayerNorm bias
        "wg": jax.random.normal(ks[10], (F, F), jnp.float32) * s,
        "bg": jax.random.normal(ks[11], (1, F), jnp.float32) * 0.01,
    }
    prepared = prepare_ega_params(params)   # one-time weight fusion + bf16 casts

    # time_tile=32 -> 2 time tiles per batch; x streamed in bf16, output bf16.
    out = jax.block_until_ready(
        ega_pallas(x.astype(jnp.bfloat16), pos_emb, prepared, time_tile=32))
    ref = ega_reference(x, pos_emb, params)
    # bf16 activations / matmul operands (f32 accumulation) + approx reciprocal in
    # the softmax denominator -> looser tolerance vs the f32 reference.
    np.testing.assert_allclose(np.asarray(out, dtype=np.float32), np.asarray(ref),
                               rtol=5e-2, atol=2e-6)
    print("KERNEL_OK")
</pallas_src>

<mosaic_0001>
module attributes {stable_mosaic.version = 11 : i64} {
  func.func @_ega_attn_kernel(%arg0: i32, %arg1: memref<1x16x128xf32, #tpu.memory_space<vmem>>, %arg2: memref<16x16x32xbf16, #tpu.memory_space<vmem>>, %arg3: memref<128x384xbf16, #tpu.memory_space<vmem>>, %arg4: memref<1x384xf32, #tpu.memory_space<vmem>>, %arg5: memref<128x128xbf16, #tpu.memory_space<vmem>>, %arg6: memref<1x128xf32, #tpu.memory_space<vmem>>, %arg7: memref<1x128xf32, #tpu.memory_space<vmem>>, %arg8: memref<1x16x128xf32, #tpu.memory_space<vmem>>) attributes {dimension_semantics = [#tpu.dimension_semantics<parallel>], iteration_bounds = array<i64: 2>, scalar_prefetch = 0 : i64, scratch_operands = 0 : i64, tpu.core_type = #tpu.core_type<tc>, window_params = [{transform_indices = @transform_0, window_bounds = array<i64: 1, 16, 128>}, {pipeline_mode = #tpu.pipeline_mode<synchronous>, transform_indices = @transform_1, window_bounds = array<i64: 16, 16, 32>}, {pipeline_mode = #tpu.pipeline_mode<synchronous>, transform_indices = @transform_2, window_bounds = array<i64: 128, 384>}, {pipeline_mode = #tpu.pipeline_mode<synchronous>, transform_indices = @transform_3, window_bounds = array<i64: 1, 384>}, {pipeline_mode = #tpu.pipeline_mode<synchronous>, transform_indices = @transform_4, window_bounds = array<i64: 128, 128>}, {pipeline_mode = #tpu.pipeline_mode<synchronous>, transform_indices = @transform_5, window_bounds = array<i64: 1, 128>}, {pipeline_mode = #tpu.pipeline_mode<synchronous>, transform_indices = @transform_6, window_bounds = array<i64: 1, 128>}, {transform_indices = @transform_7, window_bounds = array<i64: 1, 16, 128>}]} {
    %c0 = arith.constant 0 : index
    %c0_0 = arith.constant 0 : index
    %c0_1 = arith.constant 0 : index
    %0 = vector.load %arg1[%c0, %c0_0, %c0_1] : memref<1x16x128xf32, #tpu.memory_space<vmem>>, vector<1x16x128xf32>
    %1 = vector.shape_cast %0 : vector<1x16x128xf32> to vector<16x128xf32>
    %2 = arith.truncf %1 : vector<16x128xf32> to vector<16x128xbf16>
    %c0_2 = arith.constant 0 : index
    %c0_3 = arith.constant 0 : index
    %3 = vector.load %arg3[%c0_2, %c0_3] : memref<128x384xbf16, #tpu.memory_space<vmem>>, vector<128x384xbf16>
    %cst = arith.constant dense<0.000000e+00> : vector<16x384xf32>
    %4 = tpu.matmul %2, %3, %cst {dimension_numbers = #tpu.dot_dimension_numbers<[1], [0], [0], [1], [0, 0, 1, 1], [], []>} : vector<16x128xbf16>, vector<128x384xbf16>, vector<16x384xf32> -> vector<16x384xf32>
    %c0_4 = arith.constant 0 : index
    %c0_5 = arith.constant 0 : index
    %5 = vector.load %arg4[%c0_4, %c0_5] : memref<1x384xf32, #tpu.memory_space<vmem>>, vector<1x384xf32>
    %6 = vector.broadcast %5 : vector<1x384xf32> to vector<16x384xf32>
    %7 = arith.addf %4, %6 : vector<16x384xf32>
    %8 = vector.extract_strided_slice %7 {offsets = [0, 0], sizes = [16, 128], strides = [1, 1]} : vector<16x384xf32> to vector<16x128xf32>
    %9 = vector.shape_cast %8 : vector<16x128xf32> to vector<16x4x32xf32>
    %10 = arith.truncf %7 : vector<16x384xf32> to vector<16x384xbf16>
    %11 = vector.extract_strided_slice %10 {offsets = [0, 0], sizes = [16, 128], strides = [1, 1]} : vector<16x384xbf16> to vector<16x128xbf16>
    %12 = vector.shape_cast %11 : vector<16x128xbf16> to vector<16x4x32xbf16>
    %13 = vector.extract_strided_slice %10 {offsets = [0, 128], sizes = [16, 128], strides = [1, 1]} : vector<16x384xbf16> to vector<16x128xbf16>
    %14 = vector.shape_cast %13 : vector<16x128xbf16> to vector<16x4x32xbf16>
    %15 = vector.extract_strided_slice %10 {offsets = [0, 256], sizes = [16, 128], strides = [1, 1]} : vector<16x384xbf16> to vector<16x128xbf16>
    %16 = vector.shape_cast %15 : vector<16x128xbf16> to vector<16x4x32xbf16>
    %17 = tpu.transpose %12, [1, 0, 2] : vector<16x4x32xbf16> -> vector<4x16x32xbf16>
    %18 = tpu.transpose %14, [1, 0, 2] : vector<16x4x32xbf16> -> vector<4x16x32xbf16>
    %19 = tpu.transpose %16, [1, 0, 2] : vector<16x4x32xbf16> -> vector<4x16x32xbf16>
    "tpu.trace_start"() <{level = 10 : i32, message = "hid,hjd->hij"}> : () -> ()
    %cst_6 = arith.constant dense<0.000000e+00> : vector<4x16x16xf32>
    %20 = tpu.matmul %17, %18, %cst_6 {dimension_numbers = #tpu.dot_dimension_numbers<[2], [2], [1], [1], [0, 0, 0, 1, 1, 1], [0], [0]>} : vector<4x16x32xbf16>, vector<4x16x32xbf16>, vector<4x16x16xf32> -> vector<4x16x16xf32>
    "tpu.trace_stop"() : () -> ()
    %c0_7 = arith.constant 0 : index
    %c0_8 = arith.constant 0 : index
    %c0_9 = arith.constant 0 : index
    %21 = vector.load %arg2[%c0_7, %c0_8, %c0_9] : memref<16x16x32xbf16, #tpu.memory_space<vmem>>, vector<16x16x32xbf16>
    %22 = arith.extf %21 : vector<16x16x32xbf16> to vector<16x16x32xf32>
    %23 = vector.extract_strided_slice %9 {offsets = [0, 0, 0], sizes = [16, 1, 32], strides = [1, 1, 1]} : vector<16x4x32xf32> to vector<16x1x32xf32>
    %24 = vector.shape_cast %23 : vector<16x1x32xf32> to vector<16x32xf32>
    %25 = vector.shape_cast %24 : vector<16x32xf32> to vector<16x1x32xf32>
    %26 = vector.broadcast %25 : vector<16x1x32xf32> to vector<16x16x32xf32>
    %27 = arith.mulf %22, %26 : vector<16x16x32xf32>
    %cst_10 = arith.constant dense<0.000000e+00> : vector<16x16xf32>
    %28 = vector.multi_reduction <add>, %27, %cst_10 [2] : vector<16x16x32xf32> to vector<16x16xf32>
    %29 = vector.extract_strided_slice %9 {offsets = [0, 1, 0], sizes = [16, 1, 32], strides = [1, 1, 1]} : vector<16x4x32xf32> to vector<16x1x32xf32>
    %30 = vector.shape_cast %29 : vector<16x1x32xf32> to vector<16x32xf32>
    %31 = vector.shape_cast %30 : vector<16x32xf32> to vector<16x1x32xf32>
    %32 = vector.broadcast %31 : vector<16x1x32xf32> to vector<16x16x32xf32>
    %33 = arith.mulf %22, %32 : vector<16x16x32xf32>
    %cst_11 = arith.constant dense<0.000000e+00> : vector<16x16xf32>
    %34 = vector.multi_reduction <add>, %33, %cst_11 [2] : vector<16x16x32xf32> to vector<16x16xf32>
    %35 = vector.extract_strided_slice %9 {offsets = [0, 2, 0], sizes = [16, 1, 32], strides = [1, 1, 1]} : vector<16x4x32xf32> to vector<16x1x32xf32>
    %36 = vector.shape_cast %35 : vector<16x1x32xf32> to vector<16x32xf32>
    %37 = vector.shape_cast %36 : vector<16x32xf32> to vector<16x1x32xf32>
    %38 = vector.broadcast %37 : vector<16x1x32xf32> to vector<16x16x32xf32>
    %39 = arith.mulf %22, %38 : vector<16x16x32xf32>
    %cst_12 = arith.constant dense<0.000000e+00> : vector<16x16xf32>
    %40 = vector.multi_reduction <add>, %39, %cst_12 [2] : vector<16x16x32xf32> to vector<16x16xf32>
    %41 = vector.extract_strided_slice %9 {offsets = [0, 3, 0], sizes = [16, 1, 32], strides = [1, 1, 1]} : vector<16x4x32xf32> to vector<16x1x32xf32>
    %42 = vector.shape_cast %41 : vector<16x1x32xf32> to vector<16x32xf32>
    %43 = vector.shape_cast %42 : vector<16x32xf32> to vector<16x1x32xf32>
    %44 = vector.broadcast %43 : vector<16x1x32xf32> to vector<16x16x32xf32>
    %45 = arith.mulf %22, %44 : vector<16x16x32xf32>
    %cst_13 = arith.constant dense<0.000000e+00> : vector<16x16xf32>
    %46 = vector.multi_reduction <add>, %45, %cst_13 [2] : vector<16x16x32xf32> to vector<16x16xf32>
    %47 = vector.shape_cast %28 : vector<16x16xf32> to vector<1x16x16xf32>
    %48 = vector.shape_cast %34 : vector<16x16xf32> to vector<1x16x16xf32>
    %49 = vector.shape_cast %40 : vector<16x16xf32> to vector<1x16x16xf32>
    %50 = vector.shape_cast %46 : vector<16x16xf32> to vector<1x16x16xf32>
    %51 = tpu.concatenate %47, %48, %49, %50 in 0 : vector<1x16x16xf32>, vector<1x16x16xf32>, vector<1x16x16xf32>, vector<1x16x16xf32> -> vector<4x16x16xf32>
    %52 = arith.addf %20, %51 : vector<4x16x16xf32>
    %cst_14 = arith.constant 0.176776692 : f32
    %53 = vector.broadcast %cst_14 : f32 to vector<4x16x16xf32>
    %54 = arith.mulf %52, %53 : vector<4x16x16xf32>
    %cst_15 = arith.constant dense<0xFF800000> : vector<4x16xf32>
    %55 = vector.multi_reduction <maximumf>, %54, %cst_15 [2] : vector<4x16x16xf32> to vector<4x16xf32>
    %56 = vector.shape_cast %55 : vector<4x16xf32> to vector<4x16x1xf32>
    %57 = vector.broadcast %56 : vector<4x16x1xf32> to vector<4x16x16xf32>
    %58 = arith.subf %54, %57 : vector<4x16x16xf32>
    %59 = math.exp %58 : vector<4x16x16xf32>
    %cst_16 = arith.constant dense<0.000000e+00> : vector<4x16xf32>
    %60 = vector.multi_reduction <add>, %59, %cst_16 [2] : vector<4x16x16xf32> to vector<4x16xf32>
    %61 = vector.shape_cast %60 : vector<4x16xf32> to vector<4x16x1xf32>
    %62 = tpu.reciprocal %61 {approx = true} : vector<4x16x1xf32> -> vector<4x16x1xf32>
    %63 = vector.broadcast %62 : vector<4x16x1xf32> to vector<4x16x16xf32>
    %64 = arith.mulf %59, %63 : vector<4x16x16xf32>
    %65 = arith.truncf %64 : vector<4x16x16xf32> to vector<4x16x16xbf16>
    "tpu.trace_start"() <{level = 10 : i32, message = "hij,hjd->hid"}> : () -> ()
    %cst_17 = arith.constant dense<0.000000e+00> : vector<4x16x32xf32>
    %66 = tpu.matmul %65, %19, %cst_17 {dimension_numbers = #tpu.dot_dimension_numbers<[2], [1], [1], [2], [0, 0, 0, 1, 1, 2], [0], [0]>} : vector<4x16x16xbf16>, vector<4x16x32xbf16>, vector<4x16x32xf32> -> vector<4x16x32xf32>
    "tpu.trace_stop"() : () -> ()
    %67 = tpu.transpose %66, [1, 0, 2] : vector<4x16x32xf32> -> vector<16x4x32xf32>
    %68 = vector.shape_cast %67 : vector<16x4x32xf32> to vector<16x128xf32>
    %69 = arith.truncf %68 : vector<16x128xf32> to vector<16x128xbf16>
    %c0_18 = arith.constant 0 : index
    %c0_19 = arith.constant 0 : index
    %70 = vector.load %arg5[%c0_18, %c0_19] : memref<128x128xbf16, #tpu.memory_space<vmem>>, vector<128x128xbf16>
    %cst_20 = arith.constant dense<0.000000e+00> : vector<16x128xf32>
    %71 = tpu.matmul %69, %70, %cst_20 {dimension_numbers = #tpu.dot_dimension_numbers<[1], [0], [0], [1], [0, 0, 1, 1], [], []>} : vector<16x128xbf16>, vector<128x128xbf16>, vector<16x128xf32> -> vector<16x128xf32>
    %c0_21 = arith.constant 0 : index
    %c0_22 = arith.constant 0 : index
    %72 = vector.load %arg6[%c0_21, %c0_22] : memref<1x128xf32, #tpu.memory_space<vmem>>, vector<1x128xf32>
    %73 = vector.broadcast %72 : vector<1x128xf32> to vector<16x128xf32>
    %74 = arith.addf %71, %73 : vector<16x128xf32>
    %c0_23 = arith.constant 0 : index
    %c0_24 = arith.constant 0 : index
    %75 = vector.load %arg7[%c0_23, %c0_24] : memref<1x128xf32, #tpu.memory_space<vmem>>, vector<1x128xf32>
    %76 = vector.broadcast %75 : vector<1x128xf32> to vector<16x128xf32>
    %77 = arith.mulf %74, %76 : vector<16x128xf32>
    %c0_25 = arith.constant 0 : index
    %c0_26 = arith.constant 0 : index
    %c0_27 = arith.constant 0 : index
    %78 = vector.load %arg8[%c0_25, %c0_26, %c0_27] : memref<1x16x128xf32, #tpu.memory_space<vmem>>, vector<1x16x128xf32>
    %79 = vector.shape_cast %78 : vector<1x16x128xf32> to vector<16x128xf32>
    %80 = vector.shape_cast %77 : vector<16x128xf32> to vector<1x16x128xf32>
    tpu.vector_store %arg8[%c0_25, %c0_26, %c0_27], %80 {strides = array<i32>} : memref<1x16x128xf32, #tpu.memory_space<vmem>>, vector<1x16x128xf32>,
    return
  }
  func.func @transform_0(%arg0: i32) -> (i32, i32, i32) {
    %c0_i32 = arith.constant 0 : i32
    %c0_i32_0 = arith.constant 0 : i32
    %c0_i32_1 = arith.constant 0 : i32
    return %arg0, %c0_i32, %c0_i32_0 : i32, i32, i32
  }
  func.func @transform_1(%arg0: i32) -> (i32, i32, i32) {
    %c0_i32 = arith.constant 0 : i32
    %c0_i32_0 = arith.constant 0 : i32
    %c0_i32_1 = arith.constant 0 : i32
    %c0_i32_2 = arith.constant 0 : i32
    return %c0_i32, %c0_i32_0, %c0_i32_1 : i32, i32, i32
  }
  func.func @transform_2(%arg0: i32) -> (i32, i32) {
    %c0_i32 = arith.constant 0 : i32
    %c0_i32_0 = arith.constant 0 : i32
    %c0_i32_1 = arith.constant 0 : i32
    return %c0_i32, %c0_i32_0 : i32, i32
  }
  func.func @transform_3(%arg0: i32) -> (i32, i32) {
    %c0_i32 = arith.constant 0 : i32
    %c0_i32_0 = arith.constant 0 : i32
    %c0_i32_1 = arith.constant 0 : i32
    return %c0_i32, %c0_i32_0 : i32, i32
  }
  func.func @transform_4(%arg0: i32) -> (i32, i32) {
    %c0_i32 = arith.constant 0 : i32
    %c0_i32_0 = arith.constant 0 : i32
    %c0_i32_1 = arith.constant 0 : i32
    return %c0_i32, %c0_i32_0 : i32, i32
  }
  func.func @transform_5(%arg0: i32) -> (i32, i32) {
    %c0_i32 = arith.constant 0 : i32
    %c0_i32_0 = arith.constant 0 : i32
    %c0_i32_1 = arith.constant 0 : i32
    return %c0_i32, %c0_i32_0 : i32, i32
  }
  func.func @transform_6(%arg0: i32) -> (i32, i32) {
    %c0_i32 = arith.constant 0 : i32
    %c0_i32_0 = arith.constant 0 : i32
    %c0_i32_1 = arith.constant 0 : i32
    return %c0_i32, %c0_i32_0 : i32, i32
  }
  func.func @transform_7(%arg0: i32) -> (i32, i32, i32) {
    %c0_i32 = arith.constant 0 : i32
    %c0_i32_0 = arith.constant 0 : i32
    %c0_i32_1 = arith.constant 0 : i32
    return %arg0, %c0_i32, %c0_i32_0 : i32, i32, i32
  }
}

</mosaic_0001>

<bundles_post_ra>
// kernel: tpu_custom_call.1
= control target key start
LH: loop header
LB: loop body
LE: loop exit
PB: predicated region body
PF: predicated region fallthrough
CT: control target
= control target key end

     0   :  { %s7566_s0 = inlined_call_operand.hbm [shape: f32[2,16,128], index: 0, kind: input, shape index: {}]   ;;  %s7567_s1 = inlined_call_operand.hbm [shape: bf16[16,16,32], index: 1, kind: input, shape index: {}]   ;;  %s7568_s2 = inlined_call_operand.hbm [shape: bf16[128,384], index: 2, kind: input, shape index: {}]   ;;  %s7569_s3 = inlined_call_operand.vmem [shape: f32[1,384], index: 3, kind: input, shape index: {}]   ;;  %s7570_s4 = inlined_call_operand.hbm [shape: bf16[128,128], index: 4, kind: input, shape index: {}]   ;;  %s7571_s5 = inlined_call_operand.vmem [shape: f32[1,128], index: 5, kind: input, shape index: {}]   ;;  %s7572_s6 = inlined_call_operand.vmem [shape: f32[1,128], index: 6, kind: input, shape index: {}]   ;;  %s7573_s7 = inlined_call_operand.hbm [shape: f32[2,16,128], index: 7, kind: output, shape index: {}]  }
   0x1   :  { %7596 = sst [smem:[#allocation43_spill]] %s7567_s1 }
   0x2   :  { %12 = vsyncpa [#allocation3], 0 }
   0x3   :  { %14 = vsyncpa [#allocation3 + $0x1], 0 }
   0x4   :  { %15 = vsyncpa [#allocation6], 0 }
   0x5   :  { %16 = vsyncpa [#allocation9], 0 }
   0x6   :  { %17 = vsyncpa [#allocation4], 0 }
   0x7   :  { %19 = vsyncpa [#allocation4 + $0x1], 0  ;;  %s5295_s24 = smov 0   ;;  %s5297_s25 = smov 0  }
   0x8   :  { %s5299_s26 = smov 0   ;;  %s5301_s27 = smov 0  }
   0x9 LB: > { %s5316_s28 = sadd.s32 4294967295, %s5232_s27   ;;  %s4581_s29 = sadd.s32 4294967294, %s5232_s27   ;;  %s5232_s27 = sphi %s5301_s27, %s7707_s27   ;;  %s5228_s26 = sphi %s5299_s26, %s7706_s26   ;;  %s5224_s25 = sphi %s5297_s25, %s7705_s25   ;;  %s5220_s24 = sphi %s5295_s24, %s7704_s24  }
   0xa   : > { %p45_p0 = scmp.ne.s32.totalorder %s5224_s25, %s5220_s24  ;;  %p7574_p1 = scmp.eq.s32.totalorder %s5316_s28, 0 }
   0xb   : > { %p201_p3 = scmp.eq.s32.totalorder %s4581_s29, 1  ;;  %p4582_p5 = scmp.ge.s32.totalorder %s5232_s27, 1 }
   0xc   : > { %p5325_p4 = por %p7574_p1, %p45_p0  ;;  %p208_p7 = scmp.lt.s32.totalorder %s5232_s27, 3 }
   0xd   : > { %p5330_p6 = por %p201_p3, %p45_p0  ;;  %s5234_s10 = smov [#allocation5]  }
   0xe   : > { %s7597_s30 = scalar_select %p5325_p4, 1, 0 }
   0xf   : > { %s7598_s8 = scalar_select %p5330_p6, 1, 0 }
  0x10   : > { %p5335_p8 = pnand %p4582_p5, %p208_p7  ;;  %s220_s11 = sshll.u32 %s5234_s10, 4  ;;  %s5339_s11 = int_to_ptr.vmem [resolvable:$true] %s220_s11 }
  0x11   : > { %7599 = sst [smem:[#allocation15_spill]] %s7598_s8  ;;  %s5235_s13 = smov [#allocation7]  }
  0x12   : > { %s7600_s9 = scalar_select %p5335_p8, 1, 0 }
  0x13   : > { %p4878_p9 = pneg %p5335_p8  ;;  %s233_s14 = sshll.u32 %s5235_s13, 4  ;;  %s5350_s14 = int_to_ptr.vmem [resolvable:$true] %s233_s14 }
  0x14   : > { %s7602_s1 = sld [smem:[#allocation43_spill]] }
  0x15   : > { %p5346_p11 = pnand %p4878_p9, %p7574_p1 }
  0x17   : > { %p5360_p13 = pneg %p5346_p11 }
  0x1a   : > { %s5044_s17 = scalar_lea.hbm %s7602_s1, 2048 }
  0x1b   : > { %p5045_p12 = scmp.ne.s32.totalorder %s7602_s1, %s5044_s17  ;;  %p5051_p5 = scmp.lt.u32.totalorder %s5044_s17, %s7602_s1 }
  0x1d   : > { %p5047_p0 = pnand %p5360_p13, %p5045_p12 }
  0x1f   : > { %p5048_p3 = pneg %p5047_p0 }
  0x21   : > { %p5053_p7 = pnand %p5051_p5, %p5048_p3 }
  0x23   : > { %5056 = shalt.err (!%p5053_p7)
}
  0x24   : > { %s5057_s23 = scalar_lea.vmem %s5339_s11, 2048  ;;  %p5065_p2 = scmp.lt.s32.totalorder %s5339_s11, %s5339_s11 }
  0x25   : > { %p5058_p9 = scmp.ne.s32.totalorder %s5339_s11, %s5057_s23  ;;  %p5066_p6 = scmp.lt.s32.totalorder %s5057_s23, %s5057_s23 }
  0x27   : > { %p5060_p10 = pnand %p5058_p9, %p5360_p13  ;;  %p5067_p12 = por %p5066_p6, %p5065_p2 }
  0x29   : > { %p5061_p1 = pneg %p5060_p10 }
  0x2b   : > { %p5068_p0 = pnand %p5067_p12, %p5061_p1 }
  0x2d   : > { %5071 = shalt.err (!%p5068_p0)
}
  0x2e   : > { %s7575_s29 = smov 64   ;;  %s7576_s10 = smov 4  }
  0x2f   : > { %4881 = dma.hbm_to_vmem [thread:$0]  (!%p5346_p11), %s7602_s1, 2048, %s5339_s11, [#allocation6], %s7575_s29, %s7575_s29, %s7576_s10  }
  0x30   : > { %s5072_s18 = scalar_lea.hbm %s7568_s2, 3072 }
  0x31   : > { %p5073_p1 = scmp.ne.s32.totalorder %s7568_s2, %s5072_s18  ;;  %p5079_p10 = scmp.lt.u32.totalorder %s5072_s18, %s7568_s2 }
  0x33   : > { %p5075_p2 = pnand %p5073_p1, %p5360_p13 }
  0x35   : > { %p5076_p6 = pneg %p5075_p2 }
  0x37   : > { %p5081_p3 = pnand %p5079_p10, %p5076_p6 }
  0x39   : > { %5084 = shalt.err (!%p5081_p3)
}
  0x3a   : > { %s5085_s11 = scalar_lea.vmem %s5350_s14, 3072  ;;  %p5093_p12 = scmp.lt.s32.totalorder %s5350_s14, %s5350_s14 }
  0x3b   : > { %p5086_p5 = scmp.ne.s32.totalorder %s5350_s14, %s5085_s11  ;;  %p5094_p0 = scmp.lt.s32.totalorder %s5085_s11, %s5085_s11 }
  0x3d   : > { %p5088_p7 = pnand %p5086_p5, %p5360_p13  ;;  %p5095_p1 = por %p5094_p0, %p5093_p12 }
  0x3f   : > { %p5089_p9 = pneg %p5088_p7 }
  0x41   : > { %p5096_p2 = pnand %p5095_p1, %p5089_p9 }
  0x43   : > { %5099 = shalt.err (!%p5096_p2)
}
  0x44   : > { %s5238_s13 = smov 192   ;;  %s5239_s15 = smov 12  }
  0x45   : > { %4884 = dma.hbm_to_vmem [thread:$0]  (!%p5346_p11), %s7568_s2, 3072, %s5350_s14, [#allocation6], %s5238_s13, %s5238_s13, %s5239_s15  }
  0x46   : > { %s5240_s18 = smov [#allocation8]   ;;  %s5408_s21 = sadd.s32 1, %s5232_s27  }
  0x47   : > { %s249_s19 = sshll.u32 %s5240_s18, 4  ;;  %s5100_s11 = scalar_lea.hbm %s7570_s4, 1024  ;;  %s250_s19 = int_to_ptr.vmem [resolvable:$true] %s249_s19 }
  0x48   : > { %p5101_p6 = scmp.ne.s32.totalorder %s7570_s4, %s5100_s11  ;;  %p5107_p5 = scmp.lt.u32.totalorder %s5100_s11, %s7570_s4 }
  0x4a   : > { %p5103_p10 = pnand %p5101_p6, %p5360_p13 }
  0x4c   : > { %p5104_p3 = pneg %p5103_p10 }
  0x4e   : > { %p5109_p7 = pnand %p5107_p5, %p5104_p3 }
  0x50   : > { %5112 = shalt.err (!%p5109_p7)
}
  0x51   : > { %s5113_s14 = scalar_lea.vmem %s250_s19, 1024  ;;  %p5121_p1 = scmp.lt.s32.totalorder %s250_s19, %s250_s19 }
  0x52   : > { %p5114_p9 = scmp.ne.s32.totalorder %s250_s19, %s5113_s14  ;;  %p5122_p2 = scmp.lt.s32.totalorder %s5113_s14, %s5113_s14 }
  0x54   : > { %p5116_p12 = pnand %p5114_p9, %p5360_p13  ;;  %p5123_p4 = por %p5122_p2, %p5121_p1 }
  0x56   : > { %p5117_p0 = pneg %p5116_p12 }
  0x58   : > { %p5124_p8 = pnand %p5123_p4, %p5117_p0 }
  0x5a   : > { %5127 = shalt.err (!%p5124_p8)
}
  0x5b   : > { %s7604_s29 = smov 4   ;;  %s7605_s10 = smov 64  }
  0x5c   : > { %4887 = dma.hbm_to_vmem [thread:$0]  (!%p5346_p11), %s7570_s4, 1024, %s250_s19, [#allocation9], %s7605_s10, %s7605_s10, %s7604_s29  }
  0x5d   : > { %s29_s20 = ssub.s32 %s5232_s27, %s5408_s21  ;;  %s32_s12 = sadd.s32 1, %s5228_s26 }
  0x5e   : > { %p30_p4 = scmp.eq.s32.totalorder %s29_s20, 0  ;;  %p39_p8 = scmp.ne.s32.totalorder %s5228_s26, %s5224_s25 }
  0x5f   : > { %p40_p13 = scmp.eq.s32.totalorder %s5232_s27, 0  ;;  %p4899_p6 = scmp.lt.s32.totalorder %s5232_s27, 2 }
  0x60   : > { %s5439_s13 = scalar_select %p30_p4, %s5228_s26, %s32_s12  }
  0x61   : > { %p41_p10 = por %p40_p13, %p39_p8  ;;  %p7606_p3 = scmp.eq.s32.totalorder %s5316_s28, 1 }
  0x62   : > { %s269_s16 = sand.u32 1, %s5228_s26   ;;  %s4659_s17 = sshll.u32 %s5232_s27, 8 }
  0x63   : > { %p5443_p5 = por %p7606_p3, %p39_p8  ;;  %s4587_s18 = sshll.u32 %s269_s16, 4 }
  0x64   : > { %s5452_s19 = scalar_lea.hbm %s7566_s0, %s4659_s17  ;;  %s273_s11 = scalar_lea.vmem [#allocation2], %s4587_s18 }
  0x65   : > { %s280_s14 = sshll.u32 %s273_s11, 4  ;;  %p5454_p11 = pnand %p4899_p6, %p41_p10  ;;  %s5458_s14 = int_to_ptr.vmem [resolvable:$true] %s280_s14 }
  0x66   : > { %s5460_s10 = scalar_lea.sflag [#allocation3], %s269_s16  ;;  %s5128_s1 = scalar_lea.hbm %s5452_s19, 256 }
  0x67   : > { %p5129_p7 = scmp.ne.s32.totalorder %s5452_s19, %s5128_s1  ;;  %p5130_p9 = pneg %p5454_p11 }
  0x68   : > { %s5133_s12 = scalar_lea.hbm %s7566_s0, 512  ;;  %p5134_p1 = scmp.lt.u32.totalorder %s5452_s19, %s7566_s0 }
  0x69   : > { %p5131_p12 = pnand %p5130_p9, %p5129_p7  ;;  %p5135_p2 = scmp.lt.u32.totalorder %s5133_s12, %s5128_s1 }
  0x6a   : > { %p5137_p8 = scmp.lt.u32.totalorder %s5128_s1, %s5452_s19 }
  0x6b   : > { %p5132_p0 = pneg %p5131_p12  ;;  %p5136_p4 = por %p5135_p2, %p5134_p1 }
  0x6d   : > { %p5138_p13 = por %p5137_p8, %p5136_p4 }
  0x6f   : > { %p5139_p6 = pnand %p5138_p13, %p5132_p0 }
  0x71   : > { %5142 = shalt.err (!%p5139_p6)
}
  0x72   : > { %s5143_s16 = scalar_lea.vmem %s5458_s14, 256  ;;  %s5241_s22 = smov [#allocation2]  }
  0x73   : > { %p5144_p10 = scmp.ne.s32.totalorder %s5458_s14, %s5143_s16  ;;  %s5148_s23 = sshll.u32 %s5241_s22, 4  ;;  %s5149_s23 = int_to_ptr.vmem [resolvable:$false] %s5148_s23 }
  0x74   : > { %s5150_s11 = scalar_lea.vmem %s5149_s23, 512  ;;  %p5151_p12 = scmp.lt.s32.totalorder %s5458_s14, %s5149_s23 }
  0x75   : > { %p5146_p3 = pnand %p5144_p10, %p5130_p9  ;;  %p5152_p1 = scmp.lt.s32.totalorder %s5150_s11, %s5143_s16 }
  0x77   : > { %p5147_p7 = pneg %p5146_p3  ;;  %p5153_p2 = por %p5152_p1, %p5151_p12 }
  0x79   : > { %p5154_p4 = pnand %p5153_p2, %p5147_p7 }
  0x7b   : > { %5157 = shalt.err (!%p5154_p4)
}
  0x7c   : > { %s5242_s1 = smov 128   ;;  %s5243_s8 = smov 8  }
  0x7d   : > { %4891 = dma.hbm_to_vmem [thread:$0]  (!%p5454_p11), %s5452_s19, 256, %s5458_s14, %s5460_s10, %s5242_s1, %s5242_s1, %s5243_s8  }
  0x7e   : > { %p7609_p9 = scmp.ne.s32.totalorder %s7600_s9, 0 }
  0x80   : > { %292 = sbr.rel (%p7609_p9) target bundleno = 2128 (0x850), region = 48 }
  0x87   : > { %s5491_s20 = sand.u32 1, %s5224_s25   ;;  %p7610_p0 = scmp.ne.s32.totalorder %s7597_s30, 0 }
  0x88   : > { %s4591_s12 = sshll.u32 %s5491_s20, 4  ;;  %s295_s17 = scalar_lea.sflag [#allocation3], %s5491_s20 }
  0x89   : > { %s5497_s18 = scalar_lea.vmem [#allocation2], %s4591_s12 }
  0x8a   : > { %5203 = dma.done.wait (%p7610_p0), %s295_s17, 256  }
  0x8b   : > { %5205 = vsyncadd (%p7610_p0), %s295_s17, 4294967040  ;;  %p7611_p11 = scmp.eq.s32.totalorder %s5316_s28, 0 }
  0x8d   : > { %5207 = dma.done.wait (%p7611_p11), [#allocation6], 5120   ;;  %p7612_p8 = pmov %p7611_p11 }
  0x8f   : > { %5209 = vsyncadd (%p7612_p8), [#allocation6], 4294962176  ;;  %p7613_p13 = pmov %p7612_p8 }
  0x90   : > { %p7614_p6 = pmov %p7612_p8 }
  0x91   : > { %5211 = dma.done.wait (%p7613_p13), [#allocation9], 1024  }
  0x92   : > { %5213 = vsyncadd (%p7614_p6), [#allocation9], 4294966272  ;;  %v7581_v0 = vmov 0.0   ;;  %v5245_v1 = vmov 0   ;;  %vm5246_vm0 = vmmov 0   ;;  %v342_v25 = vld [vmem:[%s5497_s18] sm:$0xff]  ;;  %v7580_v29 = vlaneseq }
  0x93   : > { %4774 = vmatprep.subr.bf16.mxu1 %v7581_v0  ;;  %554 = vmatprep.mubr.bf16.mxu0 %v5245_v1  ;;  %v4972_v2 = vld [vmem:[#allocation7 + $0x4] ss:$12 sps:$4 sm:$0xff]   ;;  %v4974_v3 = vld [vmem:[#allocation7] ss:$12 sps:$4 sm:$0xff]   ;;  %v4975_v4 = vld [vmem:[#allocation7 + $0x1c] ss:$12 sps:$4 sm:$0xff]  }
  0x94   : > { %4790 = vmatprep.mubr.msk.bf16.mxu1 %vm5246_vm0, %v7581_v0  ;;  %4956 = vset.pattern.permute.xlu1 %v5245_v1  ;;  %v4977_v5 = vld [vmem:[#allocation7 + $0x18] ss:$12 sps:$4 sm:$0xff]   ;;  %v4978_v6 = vld [vmem:[#allocation7 + $0x34] ss:$12 sps:$4 sm:$0xff]   ;;  %v4980_v8 = vld [vmem:[#allocation7 + $0x30] ss:$12 sps:$4 sm:$0xff]  }
  0x95   : > { %4955 = vset.pattern.permute.xlu0 %v5245_v1  ;;  %522 = vmatprep.subr.bf16.mxu0 %v4972_v2  ;;  %v4981_v7 = vld [vmem:[#allocation7 + $0x8] ss:$12 sps:$4 sm:$0xff]   ;;  %v4985_v9 = vld [vmem:[#allocation7 + $0x20] ss:$12 sps:$4 sm:$0xff]   ;;  %v4989_v11 = vld [vmem:[#allocation7 + $0x38] ss:$12 sps:$4 sm:$0xff]  }
  0x96   : > { %523 = vmatpush1.bf16.msra.mxu0 %v4974_v3  ;;  %4775 = vmatpush3.bf16.msra.mxu1 %v4981_v7  ;;  %v4982_v10 = vld [vmem:[#allocation7 + $0x4c] ss:$12 sps:$4 sm:$0xff]   ;;  %v4984_v12 = vld [vmem:[#allocation7 + $0x48] ss:$12 sps:$4 sm:$0xff]   ;;  %v4986_v13 = vld [vmem:[#allocation7 + $0x64] ss:$12 sps:$4 sm:$0xff]  }
  0x97   : > { %524 = vmatprep.subr.bf16.mxu0 %v4975_v4  ;;  %4776 = vmatprep.subr.bf16.mxu1 %v7581_v0  ;;  %v4993_v14 = vld [vmem:[#allocation7 + $0x50] ss:$12 sps:$4 sm:$0xff]   ;;  %v4988_v15 = vld [vmem:[#allocation7 + $0x60] ss:$12 sps:$4 sm:$0xff]   ;;  %v4997_v17 = vld [vmem:[#allocation7 + $0x68] ss:$12 sps:$4 sm:$0xff]  }
  0x98   : > { %v4990_v16 = vld [vmem:[#allocation7 + $0x7c] ss:$12 sps:$4 sm:$0xff]   ;;  %v4992_v18 = vld [vmem:[#allocation7 + $0x78] ss:$12 sps:$4 sm:$0xff]   ;;  %v4994_v19 = vld [vmem:[#allocation7 + $0x94] ss:$12 sps:$4 sm:$0xff]  }
  0x99   : > { %v5001_v20 = vld [vmem:[#allocation7 + $0x80] ss:$12 sps:$4 sm:$0xff]   ;;  %v4996_v21 = vld [vmem:[#allocation7 + $0x90] ss:$12 sps:$4 sm:$0xff]   ;;  %v5002_v23 = vld [vmem:[#allocation7 + $0x98] ss:$12 sps:$4 sm:$0xff]  }
  0x9a   : > { %525 = vmatpush1.bf16.msra.mxu0 %v4977_v5  ;;  %4777 = vmatpush3.bf16.msra.mxu1 %v4985_v9  ;;  %v4998_v22 = vld [vmem:[#allocation7 + $0xac] ss:$12 sps:$4 sm:$0xff]   ;;  %v5000_v24 = vld [vmem:[#allocation7 + $0xa8] ss:$12 sps:$4 sm:$0xff]   ;;  %v5003_v28 = vld [vmem:[#allocation7 + $0xb0] ss:$12 sps:$4 sm:$0xff]  }
  0x9b   : > { %526 = vmatprep.subr.bf16.mxu0 %v4978_v6  ;;  %4778 = vmatprep.subr.bf16.mxu1 %v7581_v0  ;;  %v343_v26 = vld [vmem:[%s5497_s18 + $0x8] sm:$0xff]  ;;  %v5533_v30 = vshrl.u32 %v7580_v29, 7  ;;  %v377_v32 = vld [vmem:[%s7569_s3] sm:$0x7]  ;;  %s5247_s19 = smov 96   ;;  %s5248_s14 = smov 64  }
  0x9c   : > { %v344_v27 = vpack.c.bf16 %v343_v26, %v342_v25  ;;  %s5249_s29 = smov 32   ;;  %v5250_v56 = vmov 1983009808   ;;  %v5251_v62 = vmov 1934713408   ;;  %v4730_v25 = vld [vmem:[#allocation5 + $0x30] sm:$0xff]  }
  0x9d   : > { %7615 = vst [vmem:[#allocation16_spill] sm:$0xff] %v5533_v30  ;;  %v5536_v31 = vsub.s32 0, %v5533_v30  ;;  %v5542_v33 = vsub.s32 1, %v5533_v30  ;;  %v5545_v34 = vsub.s32 2, %v5533_v30  ;;  %v629_v57 = vunpack.c.l.s4 %v5250_v56  ;;  %s340_s11 = scalar_lea.vmem [#allocation10], %s4591_s12  ;;  %s4660_s8 = sshll.u32 %s5316_s28, 8 }
  0x9e   : > { %527 = vmatpush1.bf16.msra.mxu0 %v4980_v8  ;;  %4779 = vmatpush3.bf16.msra.mxu1 %v4989_v11  ;;  %v661_v63 = vunpack.c.l.s4 %v5251_v62  ;;  %v5608_v11 = vpack.i.b16 %v5245_v1, %v5245_v1  ;;  %vm1736_vm1 = vcmask 261120   ;;  %vm2548_vm2 = vcmask 130112   ;;  %s4479_s1 = sshll.u32 %s340_s11, 4  ;;  %s7522_s30 = scalar_lea.hbm %s7573_s7, %s4660_s8  ;;  %s7517_s1 = int_to_ptr.vmem [resolvable:$true] %s4479_s1 }
  0x9f   : > { %528 = vmatprep.subr.bf16.mxu0 %v4982_v10  ;;  %4780 = vmatprep.subr.bf16.mxu1 %v7581_v0  ;;  %v382_v35 = vrot.slane %v377_v32, %v5536_v31  ;;  %v386_v37 = vrot.slane %v377_v32, %v5542_v33  ;;  %v390_v38 = vrot.slane %v377_v32, %v5545_v34  ;;  %v630_v60 = vunpack.c.0.s8 %v629_v57  ;;  %s4466_s12 = scalar_lea.sflag [#allocation4], %s5491_s20  ;;  %s5158_s9 = scalar_lea.vmem %s7517_s1, 256 }
  0xa0   : > { %v662_v7 = vunpack.c.0.s8 %v661_v63  ;;  %vm2685_vm3 = vcmask 1041409   ;;  %vm2687_vm4 = vcmask 1042434   ;;  %vm2689_vm5 = vcmask 1043459   ;;  %p5159_p10 = scmp.ne.s32.totalorder %s7517_s1, %s5158_s9  ;;  %s5252_s28 = smov [#allocation10]  }
  0xa1   : > { %v5597_v3 = vsub.s32 %v630_v60, %v5533_v30  ;;  %vm2691_vm6 = vcmask 1044484   ;;  %vm2693_vm7 = vcmask 1045509   ;;  %vm2695_vm8 = vcmask 1046534  }
  0xa2   : > { %529 = vmatpush1.bf16.msra.mxu0 %v4984_v12  ;;  %4781 = vmatpush3.bf16.msra.mxu1 %v4993_v14  ;;  %vm2697_vm9 = vcmask 1047559   ;;  %vm3768_vm10 = vcmask 130048   ;;  %vm4335_vm11 = vcmask 523264   ;;  %vm4338_vm12 = vcmask 785408   ;;  %p5160_p3 = pnand %p5159_p10, %p5443_p5 }
  0xa3   : > { %530 = vmatprep.subr.bf16.mxu0 %v4986_v13  ;;  %4782 = vmatprep.subr.bf16.mxu1 %v7581_v0  ;;  %7616 = vst [vmem:[#allocation17_spill] sm:$0xff] %v5597_v3 }
  0xa4   : > { %p5161_p7 = pneg %p5160_p3 }
  0xa6   : > { %531 = vmatpush1.bf16.msra.mxu0 %v4988_v15  ;;  %4783 = vmatpush3.bf16.msra.mxu1 %v4997_v17  ;;  %v4662_v15 = vld [vmem:[#allocation5] sm:$0xff]   ;;  %v5612_v17 = vsub.s32 %v662_v7, %v5533_v30 }
  0xa7   : > { %532 = vmatprep.subr.bf16.mxu0 %v4990_v16  ;;  %4784 = vmatprep.subr.bf16.mxu1 %v7581_v0  ;;  %v4726_v16 = vld [vmem:[#allocation5 + $0x10] sm:$0xff]   ;;  %v5619_v26 = vunpack.c.h.bf16 %v4662_v15 }
  0xa8   : > { %7617 = vst [vmem:[#allocation18_spill] sm:$0xff] %v5612_v17  ;;  %v5625_v32 = vunpack.c.h.bf16 %v4726_v16 }
  0xaa   : > { %533 = vmatpush1.bf16.msra.mxu0 %v4992_v18  ;;  %4785 = vmatpush3.bf16.msra.mxu1 %v5001_v20  ;;  %v4728_v20 = vld [vmem:[#allocation5 + $0x20] sm:$0xff]  }
  0xab   : > { %534 = vmatprep.subr.bf16.mxu0 %v4994_v19  ;;  %4786 = vmatprep.subr.bf16.mxu1 %v7581_v0 }
  0xae   : > { %535 = vmatpush1.bf16.msra.mxu0 %v4996_v21  ;;  %4787 = vmatpush3.bf16.msra.mxu1 %v5002_v23 }
  0xaf   : > { %536 = vmatprep.subr.bf16.mxu0 %v4998_v22  ;;  %4788 = vmatprep.subr.bf16.mxu1 %v7581_v0 }
  0xb2   : > { %537 = vmatpush1.bf16.msra.mxu0 %v5000_v24  ;;  %4789 = vmatpush3.bf16.msra.mxu1 %v5003_v28  ;;  %v5623_v28 = vunpack.c.l.bf16 %v4726_v16 }
  0xb3   : > { %4818 = vmatprep.subr.bf16.mxu0 %v7581_v0  ;;  %4794 = vmatprep.subr.bf16.mxu1 %v7581_v0 }
  0xb5   : > { %555 = vmatmul.mubr.bf16.vlgmr.msra.gmra.mrb[0].mxu0 %v344_v27  ;;  %4791 = vmatmul.mubr.bf16.vlgmr.msra.gmra.mrb[0].mxu1 %v344_v27  ;;  %v5621_v27 = vunpack.c.l.bf16 %v4662_v15 }
  0xb6   : > { %4820 = vmatprep.mubr.msk.bf16.mxu0 %vm5246_vm0, %v7581_v0  ;;  %4796 = vmatprep.mubr.msk.bf16.mxu1 %vm5246_vm0, %v7581_v0 }
 0x188   : > { %v556_v36 = vpop.f32.mrb[0].mxu0  ;;  %v599_v44 = vpop.f32.mrb[0].mxu1 }
 0x189   : > { %v5550_v39 = vadd.f32 %v556_v36, %v382_v35  ;;  %v558_v40 = vpop.f32.mrb[1].mxu0  ;;  %v600_v47 = vadd.f32 %v599_v44, %v390_v38  ;;  %v4792_v48 = vpop.f32.mrb[1].mxu1  ;;  %v5636_v44 = vunpack.c.l.bf16 %v4730_v25 }
 0x18a   : > { %v560_v41 = vpop.f32.mrb[2].mxu0  ;;  %v559_v45 = vadd.f32 %v558_v40, %v386_v37  ;;  %v602_v49 = vpop.f32.mrb[2].mxu1 }
 0x18b   : > { %v5552_v42 = vadd.f32 %v560_v41, %v382_v35  ;;  %v562_v43 = vpop.f32.mrb[3].mxu0  ;;  %608 = vrot.lane.b32.xlu0 %v5550_v39, %s5247_s19  ;;  %v603_v51 = vadd.f32 %v602_v49, %v390_v38  ;;  %v4793_v52 = vpop.f32.mrb[3].mxu1 }
 0x18c   : > { %v563_v46 = vadd.f32 %v562_v43, %v386_v37  ;;  %v5634_v43 = vunpack.c.h.bf16 %v4728_v20 }
 0x18d   : > { %610 = vrot.lane.b32.xlu1 %v5552_v42, %s5247_s19  ;;  %v5562_v53 = vpack.c.bf16 %v603_v51, %v600_v47  ;;  %v5578_v54 = vpack.c.bf16 %v5552_v42, %v5550_v39 }
 0x18e   : > { %v5558_v50 = vpack.c.bf16 %v563_v46, %v559_v45 }
 0x18f   : > { %614 = vrot.lane.b32.xlu0 %v5550_v39, %s5248_s14  ;;  %v776_v19 = vshrl.u32 %v5578_v54, 16  ;;  %v1092_v22 = vshrl.u32 %v5562_v53, 16 }
 0x190   : > { %v937_v24 = vshrl.u32 %v5558_v50, 16 }
 0x191   : > { %616 = vrot.lane.b32.xlu1 %v5552_v42, %s5248_s14 }
 0x193   : > { %620 = vrot.lane.b32.xlu0 %v5550_v39, %s5249_s29 }
 0x195   : > { %622 = vrot.lane.b32.xlu1 %v5552_v42, %s5249_s29 }
 0x197   : > { %1082 = vrot.lane.b32.xlu0 %v5562_v53, %s5247_s19 }
 0x199   : > { %1084 = vrot.lane.b32.xlu1 %v5562_v53, %s5248_s14 }
 0x19b   : > { %1086 = vrot.lane.b32.xlu0 %v5562_v53, %s5249_s29 }
 0x19d   : > { %766 = vrot.lane.b32.xlu1 %v5578_v54, %s5247_s19 }
 0x19f   : > { %768 = vrot.lane.b32.xlu0 %v5578_v54, %s5248_s14 }
 0x1a1   : > { %770 = vrot.lane.b32.xlu1 %v5578_v54, %s5249_s29 }
 0x1a3   : > { %927 = vrot.lane.b32.xlu0 %v5558_v50, %s5247_s19 }
 0x1a5   : > { %931 = vrot.lane.b32.xlu1 %v5558_v50, %s5249_s29 }
 0x1a7   : > { %929 = vrot.lane.b32.xlu0 %v5558_v50, %s5248_s14 }
 0x1fd   : > { %v609_v55 = vpop.permute.xlu0 %608 }
 0x1ff   : > { %v5592_v58 = vpop.permute.xlu1 %610 }
 0x201   : > { %v615_v59 = vpop.permute.xlu0 %614 }
 0x202   : > { %v626_v4 = vcombine.low %v5550_v39, %v615_v59  ;;  %v627_v21 = vcombine.high %v5550_v39, %v615_v59  ;;  %v5629_v39 = vunpack.c.l.bf16 %v4728_v20 }
 0x203   : > { %v5594_v61 = vpop.permute.xlu1 %616 }
 0x204   : > { %v634_v10 = vrot.slane %v626_v4, %v5597_v3  ;;  %v641_v45 = vrot.slane %v627_v21, %v5597_v3 }
 0x205   : > { %v621_v2 = vpop.permute.xlu0 %620 }
 0x206   : > { %v642_v5 = vcombine.low %v609_v55, %v621_v2  ;;  %v643_v12 = vcombine.high %v609_v55, %v621_v2 }
 0x207   : > { %v5600_v6 = vpop.permute.xlu1 %622 }
 0x208   : > { %v5603_v8 = vrot.slane %v642_v5, %v5597_v3  ;;  %v657_v35 = vrot.slane %v643_v12, %v5597_v3  ;;  %v5656_v12 = vsub.s32 3, %v5533_v30 }
 0x209   : > { %v1083_v9 = vpop.permute.xlu0 %1082 }
 0x20a   : > { %v1090_v13 = vpack.i.b16 %v1083_v9, %v5562_v53  ;;  %v658_v18 = vcombine.low %v634_v10, %v5603_v8  ;;  %v1093_v1 = vshrl.u32 %v1083_v9, 16  ;;  %v659_v46 = vcombine.high %v634_v10, %v5603_v8  ;;  %7618 = vst [vmem:[#allocation19_spill] sm:$0xff] %v5656_v12 }
 0x20b   : > { %v1085_v14 = vpop.permute.xlu1 %1084  ;;  %v674_v55 = vcombine.low %v641_v45, %v657_v35  ;;  %v675_v56 = vcombine.high %v641_v45, %v657_v35  ;;  %v5653_v10 = vunpack.c.h.bf16 %v4730_v25 }
 0x20c   : > { %v1104_v36 = vcombine.high %v1090_v13, %v5608_v11  ;;  %v1100_v37 = vshrl.u32 %v1085_v14, 16  ;;  %v5632_v40 = vrot.slane %v658_v18, %v5612_v17  ;;  %v1094_v47 = vpack.i.b16 %v1093_v1, %v1092_v22 }
 0x20d   : > { %v1087_v23 = vpop.permute.xlu0 %1086  ;;  %v1111_v49 = vrot.slane %v1090_v13, %v5597_v3  ;;  %v5661_v20 = vrot.slane %v659_v46, %v5612_v17  ;;  %v5664_v21 = vrot.slane %v674_v55, %v5612_v17 }
 0x20e   : > { %v1098_v41 = vpack.i.b16 %v1087_v23, %v1085_v14  ;;  %v1101_v48 = vshrl.u32 %v1087_v23, 16  ;;  %v1118_v57 = vrot.slane %v1104_v36, %v5597_v3  ;;  %v1643_v2 = vrot.slane %v5632_v40, %v5536_v31 }
 0x20f   : > { %v767_v38 = vpop.permute.xlu1 %766  ;;  %v1170_v4 = vcombine.high %v1094_v47, %v5608_v11  ;;  %v5669_v23 = vrot.slane %v675_v56, %v5612_v17 }
 0x210   : > { %v1119_v51 = vcombine.high %v1098_v41, %v5608_v11  ;;  %v1126_v52 = vrot.slane %v1098_v41, %v5597_v3  ;;  %v774_v53 = vpack.i.b16 %v767_v38, %v5578_v54  ;;  %v1102_v59 = vpack.i.b16 %v1101_v48, %v1100_v37 }
 0x211   : > { %v777_v8 = vshrl.u32 %v767_v38, 16  ;;  %v1177_v54 = vrot.slane %v1094_v47, %v5597_v3  ;;  %v769_v18 = vpop.permute.xlu0 %768  ;;  %v1705_v1 = vmul.f32 %v5619_v26, %v1643_v2  ;;  %v1184_v25 = vrot.slane %v1170_v4, %v5597_v3 }
 0x212   : > { %v1133_v60 = vrot.slane %v1119_v51, %v5597_v3  ;;  %v1134_v62 = vcombine.low %v1111_v49, %v1126_v52  ;;  %v1135_v63 = vcombine.high %v1111_v49, %v1126_v52  ;;  %v1185_v5 = vcombine.high %v1102_v59, %v5608_v11 }
 0x213   : > { %v1192_v7 = vrot.slane %v1102_v59, %v5597_v3  ;;  %v794_v9 = vcombine.high %v774_v53, %v5608_v11  ;;  %v778_v36 = vpack.i.b16 %v777_v8, %v776_v19  ;;  %v771_v37 = vpop.permute.xlu1 %770  ;;  %v801_v41 = vrot.slane %v774_v53, %v5597_v3 }
 0x214   : > { %v1142_v13 = vrot.slane %v1134_v62, %v5612_v17  ;;  %v1149_v14 = vrot.slane %v1135_v63, %v5612_v17  ;;  %v1150_v15 = vcombine.low %v1118_v57, %v1133_v60  ;;  %v1151_v16 = vcombine.high %v1118_v57, %v1133_v60 }
 0x215   : > { %v1199_v22 = vrot.slane %v1185_v5, %v5597_v3  ;;  %v1200_v35 = vcombine.low %v1177_v54, %v1192_v7  ;;  %v1201_v38 = vcombine.high %v1177_v54, %v1192_v7  ;;  %v808_v45 = vrot.slane %v794_v9, %v5597_v3  ;;  %v928_v62 = vpop.permute.xlu0 %927 }
 0x216   : > { %v784_v46 = vshrl.u32 %v769_v18, 16  ;;  %v5675_v47 = vrot.slane %v1150_v15, %v5612_v17  ;;  %v5678_v48 = vrot.slane %v1151_v16, %v5612_v17  ;;  %v1460_v49 = vcombine.low %v1142_v13, %v1149_v14 }
 0x217   : > { %v4628_v51 = vcombine.high %v1142_v13, %v1149_v14  ;;  %v1216_v52 = vcombine.low %v1184_v25, %v1199_v22  ;;  %v1740_v55 = vsel %vm1736_vm1, %v1705_v1, 0.0  ;;  %v1704_v19 = vmul.f32 %v5621_v27, %v1643_v2 }
 0x218   : > { %v782_v56 = vpack.i.b16 %v771_v37, %v769_v18  ;;  %v5683_v57 = vrot.slane %v1200_v35, %v5612_v17  ;;  %v860_v53 = vcombine.high %v778_v36, %v5608_v11  ;;  %v867_v59 = vrot.slane %v778_v36, %v5597_v3  ;;  %1741 = vadd.xlane.f32.xlu0 %v1740_v55 }
 0x219   : > { %v785_v60 = vshrl.u32 %v771_v37, 16  ;;  %v5688_v63 = vrot.slane %v1201_v38, %v5612_v17  ;;  %v1737_v4 = vsel %vm1736_vm1, %v1704_v19, 0.0  ;;  %v1217_v7 = vcombine.high %v1184_v25, %v1199_v22 }
 0x21a   : > { %v809_v5 = vcombine.high %v782_v56, %v5608_v11  ;;  %v816_v2 = vrot.slane %v782_v56, %v5597_v3  ;;  %v5694_v8 = vrot.slane %v1460_v49, %v5597_v3  ;;  %v5697_v54 = vrot.slane %v4628_v51, %v5597_v3  ;;  %1738 = vadd.xlane.f32.xlu1 %v1737_v4 }
 0x21b   : > { %v786_v9 = vpack.i.b16 %v785_v60, %v784_v46  ;;  %v5700_v13 = vrot.slane %v1216_v52, %v5612_v17  ;;  %v1476_v14 = vcombine.low %v5675_v47, %v5678_v48  ;;  %v935_v16 = vpack.i.b16 %v928_v62, %v5558_v50 }
 0x21c   : > { %v823_v15 = vrot.slane %v809_v5, %v5597_v3  ;;  %v938_v1 = vshrl.u32 %v928_v62, 16  ;;  %v1836_v25 = vrot.slane %v5632_v40, %v5542_v33  ;;  %v824_v35 = vcombine.low %v801_v41, %v816_v2 }
 0x21d   : > { %v875_v18 = vcombine.high %v786_v9, %v5608_v11  ;;  %v882_v22 = vrot.slane %v786_v9, %v5597_v3  ;;  %v825_v36 = vcombine.high %v801_v41, %v816_v2  ;;  %v874_v46 = vrot.slane %v860_v53, %v5597_v3 }
 0x21e   : > { %v840_v37 = vcombine.low %v808_v45, %v823_v15  ;;  %v841_v38 = vcombine.high %v808_v45, %v823_v15  ;;  %v5713_v55 = vrot.slane %v1217_v7, %v5612_v17  ;;  %v949_v60 = vcombine.high %v935_v16, %v5608_v11 }
 0x21f   : > { %v889_v49 = vrot.slane %v875_v18, %v5597_v3  ;;  %v890_v51 = vcombine.low %v867_v59, %v882_v22  ;;  %v891_v52 = vcombine.high %v867_v59, %v882_v22  ;;  %v5722_v53 = vpack.i.b16 %v938_v1, %v937_v24 }
 0x220   : > { %v848_v19 = vrot.slane %v840_v37, %v5612_v17  ;;  %v855_v56 = vrot.slane %v841_v38, %v5612_v17  ;;  %v5727_v4 = vrot.slane %v824_v35, %v5612_v17  ;;  %v5730_v5 = vrot.slane %v825_v36, %v5612_v17  ;;  %v932_v35 = vpop.permute.xlu1 %931 }
 0x221   : > { %v906_v62 = vcombine.low %v874_v46, %v889_v49  ;;  %v907_v45 = vcombine.high %v874_v46, %v889_v49  ;;  %v1897_v2 = vmul.f32 %v5621_v27, %v1836_v25  ;;  %v5736_v9 = vrot.slane %v890_v51, %v5612_v17  ;;  %v930_v49 = vpop.permute.xlu0 %929 }
 0x222   : > { %v5739_v50 = vrot.slane %v891_v52, %v5612_v17  ;;  %v1252_v24 = vcombine.low %v848_v19, %v855_v56  ;;  %v956_v22 = vrot.slane %v935_v16, %v5597_v3  ;;  %v963_v1 = vrot.slane %v949_v60, %v5597_v3 }
 0x223   : > { %v5748_v36 = vrot.slane %v906_v62, %v5612_v17  ;;  %v5751_v37 = vrot.slane %v907_v45, %v5612_v17  ;;  %v4621_v38 = vcombine.high %v848_v19, %v855_v56  ;;  %v1015_v46 = vcombine.high %v5722_v53, %v5608_v11 }
 0x224   : > { %v1929_v52 = vsel %vm1736_vm1, %v1897_v2, 0.0  ;;  %v1898_v60 = vmul.f32 %v5619_v26, %v1836_v25  ;;  %v5762_v62 = vrot.slane %v1252_v24, %v5597_v3  ;;  %v946_v45 = vshrl.u32 %v932_v35, 16 }
 0x225   : > { %1930 = vadd.xlane.f32.xlu0 %v1929_v52  ;;  %v943_v51 = vpack.i.b16 %v932_v35, %v930_v49  ;;  %v945_v0 = vshrl.u32 %v930_v49, 16  ;;  %v1651_v2 = vrot.slane %v5661_v20, %v5536_v31  ;;  %v5772_v25 = vrot.slane %v4621_v38, %v5597_v3 }
 0x226   : > { %v1932_v29 = vsel %vm1736_vm1, %v1898_v60, 0.0  ;;  %v1022_v16 = vrot.slane %v5722_v53, %v5597_v3  ;;  %v1844_v52 = vrot.slane %v5661_v20, %v5542_v33 }
 0x227   : > { %1933 = vadd.xlane.f32.xlu1 %v1932_v29  ;;  %v947_v56 = vpack.i.b16 %v946_v45, %v945_v0  ;;  %v964_v35 = vcombine.high %v943_v51, %v5608_v11  ;;  %v971_v49 = vrot.slane %v943_v51, %v5597_v3  ;;  %v1708_v60 = vmul.f32 %v5623_v28, %v1651_v2 }
 0x228   : > { %v1709_v19 = vmul.f32 %v5625_v32, %v1651_v2  ;;  %v1901_v24 = vmul.f32 %v5623_v28, %v1844_v52  ;;  %v1659_v29 = vrot.slane %v5664_v21, %v5536_v31  ;;  %v1902_v38 = vmul.f32 %v5625_v32, %v1844_v52 }
 0x229   : > { %v978_v53 = vrot.slane %v964_v35, %v5597_v3  ;;  %v979_v18 = vcombine.low %v956_v22, %v971_v49  ;;  %v980_v0 = vcombine.high %v956_v22, %v971_v49  ;;  %v1030_v45 = vcombine.high %v947_v56, %v5608_v11 }
 0x22a   : > { %v1037_v51 = vrot.slane %v947_v56, %v5597_v3  ;;  %v1749_v15 = vsel %vm1736_vm1, %v1708_v60, 0.0  ;;  %v1752_v7 = vsel %vm1736_vm1, %v1709_v19, 0.0  ;;  %v1483_v19 = vrot.slane %v1476_v14, %v5597_v3 }
 0x22b   : > { %v5796_v2 = vrot.slane %v979_v18, %v5612_v17  ;;  %v5799_v59 = vrot.slane %v980_v0, %v5612_v17  ;;  %v995_v41 = vcombine.low %v963_v1, %v978_v53  ;;  %v996_v35 = vcombine.high %v963_v1, %v978_v53  ;;  %1750 = vadd.xlane.f32.xlu0 %v1749_v15 }
 0x22c   : > { %v1044_v22 = vrot.slane %v1030_v45, %v5597_v3  ;;  %v1045_v11 = vcombine.low %v1022_v16, %v1037_v51  ;;  %v1046_v49 = vcombine.high %v1022_v16, %v1037_v51  ;;  %1753 = vadd.xlane.f32.xlu1 %v1752_v7  ;;  %v1712_v52 = vmul.f32 %v5629_v39, %v1659_v29 }
 0x22d   : > { %v1003_v56 = vrot.slane %v995_v41, %v5612_v17  ;;  %v1010_v18 = vrot.slane %v996_v35, %v5612_v17  ;;  %v7619_v15 = vcombine.high %v5675_v47, %v5678_v48  ;;  %v1029_v60 = vrot.slane %v1015_v46, %v5597_v3 }
 0x22e   : > { %v1348_v7 = vcombine.low %v5796_v2, %v5799_v59  ;;  %v1941_v16 = vsel %vm1736_vm1, %v1901_v24, 0.0  ;;  %v1944_v14 = vsel %vm1736_vm1, %v1902_v38, 0.0  ;;  %v1053_v41 = vrot.slane %v1045_v11, %v5612_v17 }
 0x22f   : > { %v1491_v1 = vrot.slane %v7619_v15, %v5597_v3  ;;  %v1060_v53 = vrot.slane %v1046_v49, %v5612_v17  ;;  %v4624_v0 = vcombine.high %v5796_v2, %v5799_v59  ;;  %1942 = vadd.xlane.f32.xlu0 %v1941_v16  ;;  %v1713_v47 = vmul.f32 %v5634_v43, %v1659_v29 }
 0x230   : > { %v1061_v48 = vcombine.low %v1029_v60, %v1044_v22  ;;  %v1062_v45 = vcombine.high %v1029_v60, %v1044_v22  ;;  %v1364_v46 = vcombine.low %v1003_v56, %v1010_v18  ;;  %v4625_v51 = vcombine.high %v1003_v56, %v1010_v18  ;;  %1945 = vadd.xlane.f32.xlu1 %v1944_v14 }
 0x231   : > { %v1761_v35 = vsel %vm1736_vm1, %v1712_v52, 0.0  ;;  %v1492_v24 = vcombine.low %v5694_v8, %v5697_v54  ;;  %v1500_v38 = vcombine.low %v1483_v19, %v1491_v1  ;;  %v7620_v11 = vcombine.low %v5683_v57, %v5688_v63 }
 0x232   : > { %v7621_v59 = vcombine.high %v5683_v57, %v5688_v63  ;;  %v7622_v2 = vcombine.low %v5700_v13, %v5713_v55  ;;  %v7623_v8 = vcombine.high %v5700_v13, %v5713_v55  ;;  %v1852_v19 = vrot.slane %v5664_v21, %v5542_v33 }
 0x233   : > { %v1517_v49 = vrot.slane %v7620_v11, %v5597_v3  ;;  %1762 = vadd.xlane.f32.xlu0 %v1761_v35  ;;  %v1764_v56 = vsel %vm1736_vm1, %v1713_v47, 0.0  ;;  %v5846_v18 = vrot.slane %v1500_v38, %v5612_v17  ;;  %v1667_v57 = vrot.slane %v5669_v23, %v5536_v31 }
 0x234   : > { %v1525_v29 = vrot.slane %v7621_v59, %v5597_v3  ;;  %v1533_v22 = vrot.slane %v7622_v2, %v5597_v3  ;;  %v1541_v54 = vrot.slane %v7623_v8, %v5597_v3  ;;  %v1860_v63 = vrot.slane %v5669_v23, %v5542_v33  ;;  %1765 = vadd.xlane.f32.xlu1 %v1764_v56 }
 0x235   : > { %7624 = vst [vmem:[#allocation20_spill] sm:$0xff] %v5846_v18  ;;  %v1905_v13 = vmul.f32 %v5629_v39, %v1852_v19  ;;  %v1906_v55 = vmul.f32 %v5634_v43, %v1852_v19  ;;  %v1069_v1 = vrot.slane %v1061_v48, %v5612_v17  ;;  %v1398_v60 = vcombine.low %v1053_v41, %v1060_v53 }
 0x236   : > { %v1542_v52 = vcombine.low %v1517_v49, %v1525_v29  ;;  %v1550_v15 = vcombine.low %v1533_v22, %v1541_v54  ;;  %v5856_v16 = vrot.slane %v1492_v24, %v5612_v17  ;;  %v1716_v14 = vmul.f32 %v5636_v44, %v1667_v57 }
 0x237   : > { %v1953_v38 = vsel %vm1736_vm1, %v1905_v13, 0.0  ;;  %v1717_v11 = vmul.f32 %v5653_v10, %v1667_v57  ;;  %v1076_v49 = vrot.slane %v1062_v45, %v5612_v17  ;;  %v4626_v59 = vcombine.high %v1053_v41, %v1060_v53 }
 0x238   : > { %7625 = vst [vmem:[#allocation21_spill] sm:$0xff] %v5856_v16  ;;  %v5860_v47 = vrot.slane %v1542_v52, %v5612_v17  ;;  %v5863_v35 = vrot.slane %v1550_v15, %v5612_v17  ;;  %v5870_v48 = vcombine.low %v5856_v16, %v5846_v18  ;;  %1954 = vadd.xlane.f32.xlu0 %v1953_v38  ;;  %v1956_v24 = vsel %vm1736_vm1, %v1906_v55, 0.0 }
 0x239   : > { %1957 = vadd.xlane.f32.xlu1 %v1956_v24  ;;  %v1773_v2 = vsel %vm1736_vm1, %v1716_v14, 0.0  ;;  %v1909_v22 = vmul.f32 %v5636_v44, %v1860_v63  ;;  %v1355_v8 = vrot.slane %v1348_v7, %v5597_v3  ;;  %v1363_v41 = vrot.slane %v4624_v0, %v5597_v3 }
 0x23a   : > { %7626 = vst [vmem:[#allocation22_spill] sm:$0xff] %v5860_v47  ;;  %7627 = vst [vmem:[#allocation23_spill] sm:$0xff] %v5863_v35  ;;  %v5875_v29 = vcombine.low %v5860_v47, %v5863_v35  ;;  %v1371_v53 = vrot.slane %v1364_v46, %v5597_v3  ;;  %v1379_v45 = vrot.slane %v4625_v51, %v5597_v3  ;;  %v1776_v56 = vsel %vm1736_vm1, %v1717_v11, 0.0 }
 0x23b   : > { %v1405_v54 = vrot.slane %v1398_v60, %v5597_v3  ;;  %v1910_v57 = vmul.f32 %v5653_v10, %v1860_v63  ;;  %v2028_v52 = vrot.slane %v5632_v40, %v5545_v34  ;;  %v1413_v0 = vrot.slane %v4626_v59, %v5597_v3 }
 0x23c   : > { %v1562_v19 = vpack.i.b16 %v5875_v29, %v5870_v48  ;;  %1774 = vadd.xlane.f32.xlu0 %v1773_v2  ;;  %v1388_v7 = vcombine.low %v1371_v53, %v1379_v45  ;;  %v1414_v15 = vcombine.low %v1069_v1, %v1076_v49  ;;  %v4627_v46 = vcombine.high %v1069_v1, %v1076_v49 }
 0x23d   : > { %v7628_v51 = vcombine.low %v5736_v9, %v5739_v50  ;;  %v7629_v55 = vcombine.low %v5748_v36, %v5751_v37  ;;  %v7630_v63 = vcombine.high %v5748_v36, %v5751_v37  ;;  %1777 = vadd.xlane.f32.xlu1 %v1776_v56  ;;  %v1380_v38 = vcombine.low %v1355_v8, %v1363_v41 }
 0x23e   : > { %4819 = vmatpush3.bf16.msra.mxu0 %v1562_v19  ;;  %v1421_v1 = vrot.slane %v1414_v15, %v5597_v3  ;;  %v1429_v11 = vrot.slane %v4627_v46, %v5597_v3  ;;  %v1430_v49 = vcombine.low %v1405_v54, %v1413_v0  ;;  %v7631_v59 = vmov 0.0  }
 0x23f   : > { %v1293_v13 = vrot.slane %v7628_v51, %v5597_v3  ;;  %v1309_v60 = vrot.slane %v7629_v55, %v5597_v3  ;;  %v1317_v14 = vrot.slane %v7630_v63, %v5597_v3  ;;  %4830 = vmatprep.subr.bf16.mxu0 %v7631_v59  ;;  %v7632_v24 = vcombine.high %v5736_v9, %v5739_v50 }
 0x240   : > { %v1965_v53 = vsel %vm1736_vm1, %v1909_v22, 0.0  ;;  %v2089_v36 = vmul.f32 %v5621_v27, %v2028_v52  ;;  %v2220_v37 = vrot.slane %v5632_v40, %v5656_v12  ;;  %v1968_v8 = vsel %vm1736_vm1, %v1910_v57, 0.0 }
 0x241   : > { %v1301_v2 = vrot.slane %v7632_v24, %v5597_v3  ;;  %1966 = vadd.xlane.f32.xlu0 %v1965_v53  ;;  %v2090_v41 = vmul.f32 %v5619_v26, %v2028_v52  ;;  %v5917_v45 = vrot.slane %v1388_v7, %v5612_v17  ;;  %v1438_v54 = vcombine.low %v1421_v1, %v1429_v11 }
 0x242   : > { %v7633_v9 = vcombine.low %v5727_v4, %v5730_v5  ;;  %v7634_v22 = vcombine.high %v5727_v4, %v5730_v5  ;;  %v1276_v56 = vcombine.low %v5762_v62, %v5772_v25  ;;  %1969 = vadd.xlane.f32.xlu1 %v1968_v8  ;;  %v1387_v57 = vrot.slane %v1380_v38, %v5612_v17 }
 0x243   : > { %v1437_v52 = vrot.slane %v1430_v49, %v5612_v17  ;;  %v1445_v7 = vrot.slane %v1438_v54, %v5612_v17  ;;  %v1326_v0 = vcombine.low %v1309_v60, %v1317_v14  ;;  %v1318_v15 = vcombine.low %v1293_v13, %v1301_v2 }
 0x244   : > { %v1243_v50 = vrot.slane %v7633_v9, %v5597_v3  ;;  %v1251_v19 = vrot.slane %v7634_v22, %v5597_v3  ;;  %v2121_v46 = vsel %vm1736_vm1, %v2089_v36, 0.0  ;;  %v2281_v51 = vmul.f32 %v5621_v27, %v2220_v37 }
 0x245   : > { %v2036_v4 = vrot.slane %v5661_v20, %v5545_v34  ;;  %2122 = vadd.xlane.f32.xlu0 %v2121_v46  ;;  %v2124_v5 = vsel %vm1736_vm1, %v2090_v41, 0.0  ;;  %v1396_v62 = vcombine.low %v1387_v57, %v5917_v45  ;;  %v1446_v25 = vcombine.low %v1437_v52, %v1445_v7 }
 0x246   : > { %v2282_v55 = vmul.f32 %v5619_v26, %v2220_v37  ;;  %2125 = vadd.xlane.f32.xlu1 %v2124_v5  ;;  %v1268_v63 = vcombine.low %v1243_v50, %v1251_v19  ;;  %v5940_v13 = vrot.slane %v1276_v56, %v5612_v17  ;;  %v5943_v60 = vrot.slane %v1326_v0, %v5612_v17 }
 0x247   : > { %v1450_v38 = vpack.i.b16 %v1446_v25, %v1396_v62  ;;  %v2313_v27 = vsel %vm1736_vm1, %v2281_v51, 0.0  ;;  %v5947_v14 = vrot.slane %v1318_v15, %v5612_v17  ;;  %v2093_v1 = vmul.f32 %v5623_v28, %v2036_v4 }
 0x248   : > { %v2228_v11 = vrot.slane %v5661_v20, %v5656_v12  ;;  %v2316_v49 = vsel %vm1736_vm1, %v2282_v55, 0.0  ;;  %v2094_v24 = vmul.f32 %v5625_v32, %v2036_v4  ;;  %v1452_v2 = vshrl.u32 %v1446_v25, 16 }
 0x249   : > { %v2712_v26 = vsel %vm1736_vm1, %v1450_v38, 0  ;;  %2314 = vadd.xlane.f32.xlu0 %v2313_v27  ;;  %v5956_v53 = vrot.slane %v1268_v63, %v5612_v17  ;;  %v1334_v36 = vcombine.low %v5947_v14, %v5943_v60  ;;  %v1451_v37 = vshrl.u32 %v1396_v62, 16 }
 0x24a   : > { %4795 = vmatpush3.bf16.xpose.msra.mxu1 %v2712_v26  ;;  %2317 = vadd.xlane.f32.xlu1 %v2316_v49  ;;  %v2133_v8 = vsel %vm1736_vm1, %v2093_v1, 0.0  ;;  %v2285_v41 = vmul.f32 %v5623_v28, %v2228_v11  ;;  %v2044_v54 = vrot.slane %v5664_v21, %v5545_v34  ;;  %v2136_v50 = vsel %vm1736_vm1, %v2094_v24, 0.0  ;;  %v4725_v24 = vld [vmem:[#allocation5 + $0x8] sm:$0xff]  }
 0x24b   : > { %4800 = vmatprep.subr.bf16.mxu1 %v7631_v59  ;;  %v1284_v9 = vcombine.low %v5956_v53, %v5940_v13  ;;  %v1453_v22 = vpack.i.b16 %v1452_v2, %v1451_v37  ;;  %v2286_v19 = vmul.f32 %v5625_v32, %v2228_v11  ;;  %v710_v56 = vcombine.low %v5592_v58, %v5600_v6 }
 0x24c   : > { %v694_v28 = vcombine.low %v5552_v42, %v5594_v61  ;;  %v2325_v15 = vsel %vm1736_vm1, %v2285_v41, 0.0  ;;  %v2097_v46 = vmul.f32 %v5629_v39, %v2044_v54  ;;  %v2236_v51 = vrot.slane %v5664_v21, %v5656_v12 }
 0x24d   : > { %2134 = vadd.xlane.f32.xlu0 %v2133_v8  ;;  %v1338_v0 = vpack.i.b16 %v1334_v36, %v1284_v9  ;;  %v3047_v4 = vsel %vm1736_vm1, %v1453_v22, 0  ;;  %v2328_v32 = vsel %vm1736_vm1, %v2286_v19, 0.0  ;;  %v2098_v5 = vmul.f32 %v5634_v43, %v2044_v54 }
 0x24e   : > { %2137 = vadd.xlane.f32.xlu1 %v2136_v50  ;;  %v1447_v62 = vcombine.high %v1437_v52, %v1445_v7  ;;  %v5982_v25 = vrot.slane %v710_v56, %v5597_v3  ;;  %v1340_v55 = vshrl.u32 %v1334_v36, 16  ;;  %v1397_v63 = vcombine.high %v1387_v57, %v5917_v45 }
 0x24f   : > { %v5989_v38 = vrot.slane %v694_v28, %v5597_v3  ;;  %v2145_v27 = vsel %vm1736_vm1, %v2097_v46, 0.0  ;;  %v2289_v52 = vmul.f32 %v5629_v39, %v2236_v51  ;;  %v2052_v7 = vrot.slane %v5669_v23, %v5545_v34 }
 0x250   : > { %v1339_v1 = vshrl.u32 %v1284_v9, 16  ;;  %v2148_v11 = vsel %vm1736_vm1, %v2098_v5, 0.0  ;;  %v1456_v26 = vpack.i.b16 %v1447_v62, %v1397_v63  ;;  %v2290_v49 = vmul.f32 %v5634_v43, %v2236_v51 }
 0x251   : > { %4797 = vmatmul.mubr.msk.bf16.vlgmr.msra.gmra.mrb[4].mxu1 %vm1736_vm1, %v1338_v0  ;;  %2326 = vadd.xlane.f32.xlu0 %v2325_v15  ;;  %v726_v45 = vcombine.low %v5989_v38, %v5982_v25  ;;  %v2337_v2 = vsel %vm1736_vm1, %v2289_v52, 0.0  ;;  %v2101_v39 = vmul.f32 %v5636_v44, %v2052_v7  ;;  %v2244_v36 = vrot.slane %v5669_v23, %v5656_v12 }
 0x252   : > { %4801 = vmatpush3.bf16.xpose.msra.mxu1 %v3047_v4  ;;  %2329 = vadd.xlane.f32.xlu1 %v2328_v32  ;;  %v1341_v57 = vpack.i.b16 %v1340_v55, %v1339_v1  ;;  %v6005_v37 = vcombine.high %v5632_v40, %v7631_v59  ;;  %v3382_v43 = vsel %vm1736_vm1, %v1456_v26, 0  ;;  %v2340_v8 = vsel %vm1736_vm1, %v2290_v49, 0.0  ;;  %v4727_v55 = vld [vmem:[#allocation5 + $0x18] sm:$0xff]  }
 0x253   : > { %4802 = vmatprep.mubr.msk.bf16.mxu1 %vm5246_vm0, %v7631_v59  ;;  %4806 = vmatprep.subr.bf16.mxu1 %v7631_v59  ;;  %v2102_v41 = vmul.f32 %v5653_v10, %v2052_v7  ;;  %v1458_v54 = vshrl.u32 %v1447_v62, 16  ;;  %v695_v9 = vcombine.high %v5552_v42, %v5594_v61  ;;  %v6013_v50 = vunpack.c.l.bf16 %v4725_v24  ;;  %v4732_v42 = vld [vmem:[#allocation5 + $0x40] sm:$0xff]   ;;  %v4734_v61 = vld [vmem:[#allocation5 + $0x50] sm:$0xff]  }
 0x254   : > { %v711_v40 = vcombine.high %v5592_v58, %v5600_v6  ;;  %v6018_v22 = vrot.slane %v726_v45, %v5612_v17  ;;  %v1335_v19 = vcombine.high %v5947_v14, %v5943_v60  ;;  %v1457_v56 = vshrl.u32 %v1397_v63, 16  ;;  %v4736_v7 = vld [vmem:[#allocation5 + $0x60] sm:$0xff]  }
 0x255   : > { %2146 = vadd.xlane.f32.xlu0 %v2145_v27  ;;  %v2157_v0 = vsel %vm1736_vm1, %v2101_v39, 0.0  ;;  %v2293_v28 = vmul.f32 %v5636_v44, %v2244_v36  ;;  %v1647_v58 = vrot.slane %v6005_v37, %v5536_v31  ;;  %v4668_v6 = vunpack.c.h.bf16 %v4725_v24 }
 0x256   : > { %2149 = vadd.xlane.f32.xlu1 %v2148_v11  ;;  %v1285_v15 = vcombine.high %v5956_v53, %v5940_v13  ;;  %v2160_v46 = vsel %vm1736_vm1, %v2102_v41, 0.0  ;;  %v1459_v60 = vpack.i.b16 %v1458_v54, %v1457_v56  ;;  %v2294_v14 = vmul.f32 %v5653_v10, %v2244_v36 }
 0x257   : > { %v6033_v51 = vunpack.c.l.bf16 %v4732_v42  ;;  %v6035_v4 = vunpack.c.h.bf16 %v4732_v42  ;;  %v6037_v32 = vunpack.c.l.bf16 %v4734_v61  ;;  %v6039_v44 = vunpack.c.h.bf16 %v4734_v61 }
 0x258   : > { %v709_v5 = vrot.slane %v695_v9, %v5597_v3  ;;  %v725_v62 = vrot.slane %v711_v40, %v5597_v3  ;;  %v1344_v13 = vpack.i.b16 %v1335_v19, %v1285_v15  ;;  %v1675_v53 = vrot.slane %v6018_v22, %v5536_v31 }
 0x259   : > { %4803 = vmatmul.mubr.msk.bf16.vlgmr.msra.gmra.mrb[8].mxu1 %vm1736_vm1, %v1341_v57  ;;  %2338 = vadd.xlane.f32.xlu0 %v2337_v2  ;;  %v727_v10 = vcombine.high %v5989_v38, %v5982_v25  ;;  %v2349_v63 = vsel %vm1736_vm1, %v2293_v28, 0.0  ;;  %v1346_v27 = vshrl.u32 %v1335_v19, 16  ;;  %v1706_v52 = vmul.f32 %v6013_v50, %v1647_v58 }
 0x25a   : > { %4807 = vmatpush3.bf16.xpose.msra.mxu1 %v3382_v43  ;;  %2341 = vadd.xlane.f32.xlu1 %v2340_v8  ;;  %v3717_v1 = vsel %vm1736_vm1, %v1459_v60, 0  ;;  %v2352_v11 = vsel %vm1736_vm1, %v2294_v14, 0.0  ;;  %v1707_v26 = vmul.f32 %v4668_v6, %v1647_v58  ;;  %v1565_v49 = vshrl.u32 %v5875_v29, 16  ;;  %v4729_v58 = vld [vmem:[#allocation5 + $0x28] sm:$0xff]  }
 0x25b   : > { %4808 = vmatprep.mubr.msk.bf16.mxu1 %vm5246_vm0, %v7631_v59  ;;  %4812 = vmatprep.subr.bf16.mxu1 %v7631_v59  ;;  %v1345_v45 = vshrl.u32 %v1285_v15, 16  ;;  %v1840_v25 = vrot.slane %v6005_v37, %v5542_v33  ;;  %v6055_v38 = vunpack.c.l.bf16 %v4727_v55  ;;  %v6057_v57 = vunpack.c.h.bf16 %v4727_v55 }
 0x25c   : > { %v742_v24 = vcombine.low %v709_v5, %v725_v62  ;;  %v1564_v2 = vshrl.u32 %v5870_v48, 16  ;;  %v1720_v29 = vmul.f32 %v6033_v51, %v1675_v53  ;;  %v6064_v39 = vunpack.c.l.bf16 %v4736_v7 }
 0x25d   : > { %2158 = vadd.xlane.f32.xlu0 %v2157_v0  ;;  %v6067_v36 = vrot.slane %v727_v10, %v5612_v17  ;;  %v743_v43 = vcombine.high %v709_v5, %v725_v62  ;;  %v1347_v8 = vpack.i.b16 %v1346_v27, %v1345_v45  ;;  %v1743_v41 = vsel %vm1736_vm1, %v1706_v52, 0.0  ;;  %v4738_v45 = vld [vmem:[#allocation5 + $0x70] sm:$0xff]  }
 0x25e   : > { %2161 = vadd.xlane.f32.xlu1 %v2160_v46  ;;  %v1746_v54 = vsel %vm1736_vm1, %v1707_v26, 0.0  ;;  %v1566_v9 = vpack.i.b16 %v1565_v49, %v1564_v2  ;;  %v1721_v40 = vmul.f32 %v6035_v4, %v1675_v53  ;;  %v2032_v48 = vrot.slane %v6005_v37, %v5545_v34 }
 0x25f   : > { %v1899_v19 = vmul.f32 %v6013_v50, %v1840_v25  ;;  %v1868_v56 = vrot.slane %v6018_v22, %v5542_v33  ;;  %v2060_v42 = vrot.slane %v6018_v22, %v5545_v34  ;;  %v2224_v61 = vrot.slane %v6005_v37, %v5656_v12 }
 0x260   : > { %v1785_v0 = vsel %vm1736_vm1, %v1720_v29, 0.0  ;;  %v1900_v28 = vmul.f32 %v4668_v6, %v1840_v25  ;;  %v6083_v15 = vmul.f32 %v6013_v50, %v2032_v48  ;;  %v6085_v46 = vmul.f32 %v4668_v6, %v2032_v48 }
 0x261   : > { %4809 = vmatmul.mubr.msk.bf16.vlgmr.msra.gmra.mrb[12].mxu1 %vm1736_vm1, %v1344_v13  ;;  %2350 = vadd.xlane.f32.xlu0 %v2349_v63  ;;  %v6088_v60 = vmul.f32 %v6033_v51, %v2060_v42  ;;  %v6091_v14 = vmul.f32 %v6035_v4, %v2060_v42  ;;  %v6094_v5 = vmul.f32 %v6013_v50, %v2224_v61  ;;  %v1788_v13 = vsel %vm1736_vm1, %v1721_v40, 0.0 }
 0x262   : > { %4813 = vmatpush3.bf16.xpose.msra.mxu1 %v3717_v1  ;;  %2353 = vadd.xlane.f32.xlu1 %v2352_v11  ;;  %v6096_v62 = vmul.f32 %v4668_v6, %v2224_v61  ;;  %v6099_v37 = vrot.slane %v742_v24, %v5612_v17  ;;  %v6105_v53 = vcombine.high %v5661_v20, %v7631_v59  ;;  %v6107_v55 = vunpack.c.h.bf16 %v4736_v7 }
 0x263   : > { %4814 = vmatprep.mubr.msk.bf16.mxu1 %vm5246_vm0, %v7631_v59  ;;  %4824 = vmatprep.subr.bf16.mxu1 %v7631_v59  ;;  %v6110_v10 = vrot.slane %v743_v43, %v5612_v17  ;;  %v1913_v50 = vmul.f32 %v6033_v51, %v1868_v56  ;;  %v6113_v6 = vunpack.c.l.bf16 %v4729_v58  ;;  %v6115_v63 = vunpack.c.h.bf16 %v4729_v58 }
 0x264   : > { %v1935_v27 = vsel %vm1736_vm1, %v1899_v19, 0.0  ;;  %v1938_v52 = vsel %vm1736_vm1, %v1900_v28, 0.0  ;;  %v1914_v20 = vmul.f32 %v6035_v4, %v1868_v56  ;;  %v1683_v7 = vrot.slane %v6067_v36, %v5536_v31 }
 0x265   : > { %1744 = vadd.xlane.f32.xlu0 %v1743_v41  ;;  %v1876_v1 = vrot.slane %v6067_v36, %v5542_v33  ;;  %v6129_v11 = vcombine.high %v5664_v21, %v7631_v59  ;;  %v2252_v26 = vrot.slane %v6018_v22, %v5656_v12  ;;  %v2068_v49 = vrot.slane %v6067_v36, %v5545_v34 }
 0x266   : > { %1747 = vadd.xlane.f32.xlu1 %v1746_v54  ;;  %v2260_v25 = vrot.slane %v6067_v36, %v5656_v12  ;;  %v2040_v24 = vrot.slane %v6105_v53, %v5545_v34  ;;  %v2232_v2 = vrot.slane %v6105_v53, %v5656_v12  ;;  %v2076_v21 = vrot.slane %v6099_v37, %v5545_v34 }
 0x267   : > { %v6144_v29 = vmul.f32 %v6033_v51, %v2252_v26  ;;  %v6147_v43 = vmul.f32 %v6035_v4, %v2252_v26  ;;  %v6153_v41 = vmul.f32 %v6039_v44, %v2068_v49  ;;  %v1977_v4 = vsel %vm1736_vm1, %v1913_v50, 0.0 }
 0x268   : > { %v6156_v54 = vmul.f32 %v6037_v32, %v2260_v25  ;;  %v6162_v40 = vmul.f32 %v6055_v38, %v2040_v24  ;;  %v6165_v51 = vmul.f32 %v6057_v57, %v2040_v24  ;;  %v1724_v48 = vmul.f32 %v6037_v32, %v1683_v7 }
 0x269   : > { %4815 = vmatmul.mubr.msk.bf16.vlgmr.msra.gmra.mrb[16].mxu1 %vm1736_vm1, %v1347_v8  ;;  %1786 = vadd.xlane.f32.xlu0 %v1785_v0  ;;  %v6150_v8 = vmul.f32 %v6037_v32, %v2068_v49  ;;  %v1725_v19 = vmul.f32 %v6039_v44, %v1683_v7  ;;  %v6170_v56 = vunpack.c.l.bf16 %v4738_v45  ;;  %v1980_v42 = vsel %vm1736_vm1, %v1914_v20, 0.0 }
 0x26a   : > { %4825 = vmatpush3.bf16.msra.mxu1 %v1566_v9  ;;  %1789 = vadd.xlane.f32.xlu1 %v1788_v13  ;;  %v6159_v9 = vmul.f32 %v6039_v44, %v2260_v25  ;;  %v1917_v61 = vmul.f32 %v6037_v32, %v1876_v1  ;;  %v1918_v0 = vmul.f32 %v6039_v44, %v1876_v1  ;;  %v6175_v28 = vunpack.c.h.bf16 %v4738_v45  ;;  %v4731_v45 = vld [vmem:[#allocation5 + $0x38] sm:$0xff]  }
 0x26b   : > { %4826 = vmatprep.mubr.msk.bf16.mxu1 %vm5246_vm0, %v7631_v59  ;;  %4836 = vmatprep.subr.bf16.mxu1 %v7631_v59  ;;  %v6178_v58 = vmul.f32 %v6055_v38, %v2232_v2  ;;  %v6181_v13 = vmul.f32 %v6057_v57, %v2232_v2  ;;  %v6184_v50 = vmul.f32 %v6064_v39, %v2076_v21  ;;  %v1797_v7 = vsel %vm1736_vm1, %v1724_v48, 0.0 }
 0x26c   : > { %v2268_v32 = vrot.slane %v6099_v37, %v5656_v12  ;;  %v2048_v44 = vrot.slane %v6129_v11, %v5545_v34  ;;  %v2084_v20 = vrot.slane %v6110_v10, %v5545_v34  ;;  %v1800_v1 = vsel %vm1736_vm1, %v1725_v19, 0.0 }
 0x26d   : > { %1936 = vadd.xlane.f32.xlu0 %v1935_v27  ;;  %v6187_v27 = vmul.f32 %v6107_v55, %v2076_v21  ;;  %v1655_v26 = vrot.slane %v6105_v53, %v5536_v31  ;;  %v6203_v49 = vcombine.high %v5669_v23, %v7631_v59 }
 0x26e   : > { %1939 = vadd.xlane.f32.xlu1 %v1938_v52  ;;  %v2240_v52 = vrot.slane %v6129_v11, %v5656_v12  ;;  %v6206_v25 = vmul.f32 %v6064_v39, %v2268_v32  ;;  %v6209_v24 = vmul.f32 %v6107_v55, %v2268_v32  ;;  %v6212_v2 = vmul.f32 %v6113_v6, %v2048_v44 }
 0x26f   : > { %v6215_v21 = vmul.f32 %v6115_v63, %v2048_v44  ;;  %v6224_v48 = vmul.f32 %v6170_v56, %v2084_v20  ;;  %v6227_v19 = vmul.f32 %v6175_v28, %v2084_v20  ;;  %v6231_v32 = vunpack.c.h.bf16 %v4731_v45 }
 0x270   : > { %v6221_v23 = vmul.f32 %v6115_v63, %v2240_v52  ;;  %v1989_v44 = vsel %vm1736_vm1, %v1917_v61, 0.0  ;;  %v1711_v17 = vmul.f32 %v6057_v57, %v1655_v26  ;;  %v2276_v20 = vrot.slane %v6110_v10, %v5656_v12 }
 0x271   : > { %1978 = vadd.xlane.f32.xlu0 %v1977_v4  ;;  %v6218_v4 = vmul.f32 %v6113_v6, %v2240_v52  ;;  %v1848_v52 = vrot.slane %v6105_v53, %v5542_v33  ;;  %v2056_v3 = vrot.slane %v6203_v49, %v5545_v34  ;;  %v1691_v61 = vrot.slane %v6099_v37, %v5536_v31 }
 0x272   : > { %1981 = vadd.xlane.f32.xlu1 %v1980_v42  ;;  %v6229_v42 = vunpack.c.l.bf16 %v4731_v45  ;;  %v2248_v45 = vrot.slane %v6203_v49, %v5656_v12  ;;  %v6251_v53 = vmul.f32 %v6175_v28, %v2276_v20 }
 0x273   : > { %v1903_v18 = vmul.f32 %v6055_v38, %v1848_v52  ;;  %v1904_v35 = vmul.f32 %v6057_v57, %v1848_v52  ;;  %v1729_v12 = vmul.f32 %v6107_v55, %v1691_v61  ;;  %v1663_v57 = vrot.slane %v6129_v11, %v5536_v31 }
 0x274   : > { %v6265_v47 = vmul.f32 %v6231_v32, %v2248_v45 }
 0x275   : > { %1798 = vadd.xlane.f32.xlu0 %v1797_v7  ;;  %v1992_v7 = vsel %vm1736_vm1, %v1918_v0, 0.0  ;;  %v6248_v0 = vmul.f32 %v6170_v56, %v2276_v20  ;;  %v1758_v20 = vsel %vm1736_vm1, %v1711_v17, 0.0  ;;  %v1947_v30 = vsel %vm1736_vm1, %v1903_v18, 0.0 }
 0x276   : > { %1801 = vadd.xlane.f32.xlu1 %v1800_v1  ;;  %v1710_v1 = vmul.f32 %v6055_v38, %v1655_v26  ;;  %v6254_v26 = vmul.f32 %v6229_v42, %v2056_v3  ;;  %v1950_v38 = vsel %vm1736_vm1, %v1904_v35, 0.0  ;;  %v1812_v18 = vsel %vm1736_vm1, %v1729_v12, 0.0 }
 0x277   : > { %v1714_v35 = vmul.f32 %v6113_v6, %v1663_v57 }
 0x278   : > { %v1755_v16 = vsel %vm1736_vm1, %v1710_v1, 0.0  ;;  %v1884_v1 = vrot.slane %v6099_v37, %v5542_v33 }
 0x279   : > { %1990 = vadd.xlane.f32.xlu0 %v1989_v44  ;;  %v6257_v44 = vmul.f32 %v6231_v32, %v2056_v3  ;;  %v1728_v3 = vmul.f32 %v6064_v39, %v1691_v61 }
 0x27a   : > { %1993 = vadd.xlane.f32.xlu1 %v1992_v7  ;;  %v6262_v7 = vmul.f32 %v6229_v42, %v2248_v45  ;;  %v1921_v17 = vmul.f32 %v6064_v39, %v1884_v1  ;;  %v1922_v52 = vmul.f32 %v6107_v55, %v1884_v1  ;;  %v1856_v45 = vrot.slane %v6129_v11, %v5542_v33 }
 0x27b   : > { %v1715_v39 = vmul.f32 %v6115_v63, %v1663_v57  ;;  %v1699_v55 = vrot.slane %v6110_v10, %v5536_v31 }
 0x27c   : > { %v2004_v61 = vsel %vm1736_vm1, %v1922_v52, 0.0  ;;  %v1907_v12 = vmul.f32 %v6113_v6, %v1856_v45  ;;  %v1908_v1 = vmul.f32 %v6115_v63, %v1856_v45  ;;  %v1671_v63 = vrot.slane %v6203_v49, %v5536_v31 }
 0x27d   : > { %1756 = vadd.xlane.f32.xlu0 %v1755_v16  ;;  %v1809_v16 = vsel %vm1736_vm1, %v1728_v3, 0.0  ;;  %v1770_v3 = vsel %vm1736_vm1, %v1715_v39, 0.0  ;;  %v1733_v6 = vmul.f32 %v6175_v28, %v1699_v55 }
 0x27e   : > { %1759 = vadd.xlane.f32.xlu1 %v1758_v20  ;;  %v1767_v20 = vsel %vm1736_vm1, %v1714_v35, 0.0  ;;  %v1959_v11 = vsel %vm1736_vm1, %v1907_v12, 0.0  ;;  %v1718_v45 = vmul.f32 %v6229_v42, %v1671_v63 }
 0x27f   : > { %v1824_v52 = vsel %vm1736_vm1, %v1733_v6, 0.0 }
 0x281   : > { %1948 = vadd.xlane.f32.xlu0 %v1947_v30  ;;  %v2001_v30 = vsel %vm1736_vm1, %v1921_v17, 0.0  ;;  %v1962_v17 = vsel %vm1736_vm1, %v1908_v1, 0.0  ;;  %v2127_v1 = vsel %vm1736_vm1, %v6083_v15, 0.0  ;;  %v2322_v15 = vsel %vm1736_vm1, %v6096_v62, 0.0 }
 0x282   : > { %1951 = vadd.xlane.f32.xlu1 %v1950_v38  ;;  %v1732_v38 = vmul.f32 %v6170_v56, %v1699_v55  ;;  %v2184_v62 = vsel %vm1736_vm1, %v6153_v41, 0.0  ;;  %v2142_v41 = vsel %vm1736_vm1, %v6165_v51, 0.0  ;;  %v2193_v51 = vsel %vm1736_vm1, %v6184_v50, 0.0 }
 0x284   : > { %v1821_v57 = vsel %vm1736_vm1, %v1732_v38, 0.0  ;;  %v2319_v38 = vsel %vm1736_vm1, %v6094_v5, 0.0  ;;  %v2181_v5 = vsel %vm1736_vm1, %v6150_v8, 0.0 }
 0x285   : > { %1810 = vadd.xlane.f32.xlu0 %v1809_v16  ;;  %v1892_v16 = vrot.slane %v6110_v10, %v5542_v33 }
 0x286   : > { %1813 = vadd.xlane.f32.xlu1 %v1812_v18 }
 0x287   : > { %v1925_v18 = vmul.f32 %v6170_v56, %v1892_v16  ;;  %v1719_v56 = vmul.f32 %v6231_v32, %v1671_v63 }
 0x289   : > { %2002 = vadd.xlane.f32.xlu0 %v2001_v30  ;;  %v1926_v30 = vmul.f32 %v6175_v28, %v1892_v16  ;;  %v2013_v35 = vsel %vm1736_vm1, %v1925_v18, 0.0  ;;  %v1782_v28 = vsel %vm1736_vm1, %v1719_v56, 0.0  ;;  %v2139_v18 = vsel %vm1736_vm1, %v6162_v40, 0.0 }
 0x28a   : > { %2005 = vadd.xlane.f32.xlu1 %v2004_v61  ;;  %v1864_v61 = vrot.slane %v6203_v49, %v5542_v33  ;;  %v2154_v56 = vsel %vm1736_vm1, %v6215_v21, 0.0  ;;  %v2205_v21 = vsel %vm1736_vm1, %v6224_v48, 0.0  ;;  %v2400_v48 = vsel %vm1736_vm1, %v6251_v53, 0.0 }
 0x28b   : > { %v2016_v39 = vsel %vm1736_vm1, %v1926_v30, 0.0 }
 0x28c   : > { %v1911_v12 = vmul.f32 %v6229_v42, %v1864_v61  ;;  %v1912_v55 = vmul.f32 %v6231_v32, %v1864_v61  ;;  %v2169_v42 = vsel %vm1736_vm1, %v6088_v60, 0.0  ;;  %v2172_v32 = vsel %vm1736_vm1, %v6091_v14, 0.0 }
 0x28d   : > { %1768 = vadd.xlane.f32.xlu0 %v1767_v20  ;;  %v1779_v20 = vsel %vm1736_vm1, %v1718_v45, 0.0  ;;  %v2361_v60 = vsel %vm1736_vm1, %v6144_v29, 0.0  ;;  %v2364_v14 = vsel %vm1736_vm1, %v6147_v43, 0.0  ;;  %v2373_v29 = vsel %vm1736_vm1, %v6156_v54, 0.0 }
 0x28e   : > { %1771 = vadd.xlane.f32.xlu1 %v1770_v3  ;;  %v1971_v3 = vsel %vm1736_vm1, %v1911_v12, 0.0  ;;  %v1974_v49 = vsel %vm1736_vm1, %v1912_v55, 0.0  ;;  %v2376_v43 = vsel %vm1736_vm1, %v6159_v9, 0.0  ;;  %v2331_v9 = vsel %vm1736_vm1, %v6178_v58, 0.0 }
 0x28f   : > { %v2388_v61 = vsel %vm1736_vm1, %v6209_v24, 0.0  ;;  %v2343_v24 = vsel %vm1736_vm1, %v6218_v4, 0.0  ;;  %v2346_v12 = vsel %vm1736_vm1, %v6221_v23, 0.0  ;;  %v2208_v55 = vsel %vm1736_vm1, %v6227_v19, 0.0 }
 0x290   : > { %v2397_v23 = vsel %vm1736_vm1, %v6248_v0, 0.0 }
 0x291   : > { %1960 = vadd.xlane.f32.xlu0 %v1959_v11  ;;  %v2130_v11 = vsel %vm1736_vm1, %v6085_v46, 0.0 }
 0x292   : > { %1963 = vadd.xlane.f32.xlu1 %v1962_v17 }
 0x295   : > { %1822 = vadd.xlane.f32.xlu0 %v1821_v57 }
 0x296   : > { %1825 = vadd.xlane.f32.xlu1 %v1824_v52  ;;  %v2334_v52 = vsel %vm1736_vm1, %v6181_v13, 0.0  ;;  %v2385_v13 = vsel %vm1736_vm1, %v6206_v25, 0.0 }
 0x299   : > { %2014 = vadd.xlane.f32.xlu0 %v2013_v35  ;;  %v2196_v35 = vsel %vm1736_vm1, %v6187_v27, 0.0  ;;  %v2151_v27 = vsel %vm1736_vm1, %v6212_v2, 0.0 }
 0x29a   : > { %2017 = vadd.xlane.f32.xlu1 %v2016_v39 }
 0x29d   : > { %1780 = vadd.xlane.f32.xlu0 %v1779_v20 }
 0x29e   : > { %1783 = vadd.xlane.f32.xlu1 %v1782_v28 }
 0x2a1   : > { %1972 = vadd.xlane.f32.xlu0 %v1971_v3 }
 0x2a2   : > { %1975 = vadd.xlane.f32.xlu1 %v1974_v49  ;;  %v6413_v49 = vcombine.high %v6018_v22, %v7631_v59  ;;  %v2166_v22 = vsel %vm1736_vm1, %v6257_v44, 0.0  ;;  %v2358_v44 = vsel %vm1736_vm1, %v6265_v47, 0.0 }
 0x2a4   : > { %v1679_v0 = vrot.slane %v6413_v49, %v5536_v31 }
 0x2a5   : > { %2128 = vadd.xlane.f32.xlu0 %v2127_v1  ;;  %v6329_v16 = vpop.xlane.xlu0 %1741  ;;  %v4733_v1 = vld [vmem:[#allocation5 + $0x48] sm:$0xff]  }
 0x2a6   : > { %2131 = vadd.xlane.f32.xlu1 %v2130_v11 }
 0x2a7   : > { %v6331_v46 = vpop.xlane.xlu1 %1738 }
 0x2a9   : > { %2170 = vadd.xlane.f32.xlu0 %v2169_v42  ;;  %v2163_v42 = vsel %vm1736_vm1, %v6254_v26, 0.0 }
 0x2aa   : > { %2173 = vadd.xlane.f32.xlu1 %v2172_v32  ;;  %v6423_v32 = vunpack.c.l.bf16 %v4733_v1 }
 0x2ac   : > { %v1722_v26 = vmul.f32 %v6423_v32, %v1679_v0 }
 0x2ad   : > { %2320 = vadd.xlane.f32.xlu0 %v2319_v38  ;;  %v6429_v38 = vunpack.c.h.bf16 %v4733_v1 }
 0x2ae   : > { %2323 = vadd.xlane.f32.xlu1 %v2322_v15 }
 0x2b1   : > { %2362 = vadd.xlane.f32.xlu0 %v2361_v60  ;;  %v2355_v60 = vsel %vm1736_vm1, %v6262_v7, 0.0 }
 0x2b2   : > { %2365 = vadd.xlane.f32.xlu1 %v2364_v14  ;;  %v6339_v17 = vpop.xlane.xlu0 %1930  ;;  %v1872_v14 = vrot.slane %v6413_v49, %v5542_v33 }
 0x2b4   : > { %v6343_v6 = vpop.xlane.xlu1 %1933 }
 0x2b5   : > { %2182 = vadd.xlane.f32.xlu0 %v2181_v5  ;;  %v6442_v5 = vcombine.high %v6067_v36, %v7631_v59 }
 0x2b6   : > { %2185 = vadd.xlane.f32.xlu1 %v2184_v62  ;;  %v1723_v62 = vmul.f32 %v6429_v38, %v1679_v0 }
 0x2b7   : > { %v1687_v36 = vrot.slane %v6442_v5, %v5536_v31 }
 0x2b8   : > { %v6349_v57 = vpop.xlane.xlu0 %1750  ;;  %v1794_v47 = vsel %vm1736_vm1, %v1723_v62, 0.0 }
 0x2b9   : > { %2374 = vadd.xlane.f32.xlu0 %v2373_v29  ;;  %v6351_v8 = vpop.xlane.xlu1 %1753  ;;  %v4735_v29 = vld [vmem:[#allocation5 + $0x58] sm:$0xff]  }
 0x2ba   : > { %2377 = vadd.xlane.f32.xlu1 %v2376_v43 }
 0x2bc   : > { %v6357_v63 = vpop.xlane.xlu0 %1942 }
 0x2bd   : > { %2140 = vadd.xlane.f32.xlu0 %v2139_v18  ;;  %v6359_v54 = vpop.xlane.xlu1 %1945  ;;  %v1791_v18 = vsel %vm1736_vm1, %v1722_v26, 0.0 }
 0x2be   : > { %2143 = vadd.xlane.f32.xlu1 %v2142_v41  ;;  %v1915_v41 = vmul.f32 %v6423_v32, %v1872_v14 }
 0x2c0   : > { %v6365_v30 = vpop.xlane.xlu0 %1762 }
 0x2c1   : > { %2332 = vadd.xlane.f32.xlu0 %v2331_v9  ;;  %v6367_v40 = vpop.xlane.xlu1 %1765  ;;  %v6453_v9 = vunpack.c.l.bf16 %v4735_v29 }
 0x2c2   : > { %2335 = vadd.xlane.f32.xlu1 %v2334_v52  ;;  %v1916_v52 = vmul.f32 %v6429_v38, %v1872_v14 }
 0x2c5   : > { %2194 = vadd.xlane.f32.xlu0 %v2193_v51  ;;  %v6373_v45 = vpop.xlane.xlu0 %1954  ;;  %v6459_v51 = vunpack.c.h.bf16 %v4735_v29 }
 0x2c6   : > { %2197 = vadd.xlane.f32.xlu1 %v2196_v35  ;;  %v6375_v58 = vpop.xlane.xlu1 %1957 }
 0x2c9   : > { %2386 = vadd.xlane.f32.xlu0 %v2385_v13  ;;  %v6381_v39 = vpop.xlane.xlu0 %1774 }
 0x2ca   : > { %2389 = vadd.xlane.f32.xlu1 %v2388_v61  ;;  %v6383_v50 = vpop.xlane.xlu1 %1777  ;;  %v1983_v61 = vsel %vm1736_vm1, %v1915_v41, 0.0  ;;  %v6499_v41 = vcombine.high %v6110_v10, %v7631_v59 }
 0x2cc   : > { %v1703_v10 = vrot.slane %v6499_v41, %v5536_v31 }
 0x2cd   : > { %2152 = vadd.xlane.f32.xlu0 %v2151_v27  ;;  %v1726_v27 = vmul.f32 %v6453_v9, %v1687_v36 }
 0x2ce   : > { %2155 = vadd.xlane.f32.xlu1 %v2154_v56  ;;  %v6389_v20 = vpop.xlane.xlu0 %1966  ;;  %v1880_v56 = vrot.slane %v6442_v5, %v5542_v33 }
 0x2cf   : > { %v6391_v25 = vpop.xlane.xlu1 %1969  ;;  %v1803_v1 = vsel %vm1736_vm1, %v1726_v27, 0.0 }
 0x2d1   : > { %2344 = vadd.xlane.f32.xlu0 %v2343_v24  ;;  %v6471_v24 = vcombine.high %v6099_v37, %v7631_v59 }
 0x2d2   : > { %2347 = vadd.xlane.f32.xlu1 %v2346_v12  ;;  %v6397_v28 = vpop.xlane.xlu0 %2122  ;;  %v1986_v12 = vsel %vm1736_vm1, %v1916_v52, 0.0  ;;  %v4739_v52 = vld [vmem:[#allocation5 + $0x78] sm:$0xff]  }
 0x2d3   : > { %v6399_v2 = vpop.xlane.xlu1 %2125  ;;  %v1695_v37 = vrot.slane %v6471_v24, %v5536_v31 }
 0x2d5   : > { %2206 = vadd.xlane.f32.xlu0 %v2205_v21  ;;  %v1727_v21 = vmul.f32 %v6459_v51, %v1687_v36 }
 0x2d6   : > { %2209 = vadd.xlane.f32.xlu1 %v2208_v55  ;;  %v6405_v3 = vpop.xlane.xlu0 %2314  ;;  %v4737_v55 = vld [vmem:[#allocation5 + $0x68] sm:$0xff]  }
 0x2d7   : > { %v6407_v4 = vpop.xlane.xlu1 %2317  ;;  %v6481_v0 = vunpack.c.l.bf16 %v4737_v55  ;;  %v6487_v26 = vunpack.c.h.bf16 %v4737_v55 }
 0x2d9   : > { %2398 = vadd.xlane.f32.xlu0 %v2397_v23  ;;  %v1730_v29 = vmul.f32 %v6481_v0, %v1695_v37 }
 0x2da   : > { %2401 = vadd.xlane.f32.xlu1 %v2400_v48  ;;  %v6417_v11 = vpop.xlane.xlu0 %2134 }
 0x2db   : > { %v6419_v19 = vpop.xlane.xlu1 %2137 }
 0x2dd   : > { %2164 = vadd.xlane.f32.xlu0 %v2163_v42  ;;  %v1919_v42 = vmul.f32 %v6453_v9, %v1880_v56 }
 0x2de   : > { %2167 = vadd.xlane.f32.xlu1 %v2166_v22  ;;  %v6431_v53 = vpop.xlane.xlu0 %2326  ;;  %v1806_v22 = vsel %vm1736_vm1, %v1727_v21, 0.0  ;;  %v6509_v21 = vunpack.c.l.bf16 %v4739_v52 }
 0x2df   : > { %v6433_v15 = vpop.xlane.xlu1 %2329  ;;  %v1995_v62 = vsel %vm1736_vm1, %v1919_v42, 0.0  ;;  %v6515_v42 = vunpack.c.h.bf16 %v4739_v52 }
 0x2e1   : > { %2356 = vadd.xlane.f32.xlu0 %v2355_v60  ;;  %v1920_v60 = vmul.f32 %v6459_v51, %v1880_v56  ;;  %v1815_v56 = vsel %vm1736_vm1, %v1730_v29, 0.0  ;;  %v1896_v29 = vrot.slane %v6499_v41, %v5542_v33 }
 0x2e2   : > { %2359 = vadd.xlane.f32.xlu1 %v2358_v44  ;;  %v6447_v43 = vpop.xlane.xlu0 %2146 }
 0x2e3   : > { %7635 = vst [vmem:[#allocation24_spill] sm:$0xff] %v6447_v43  ;;  %v6449_v7 = vpop.xlane.xlu1 %2149  ;;  %v1998_v36 = vsel %vm1736_vm1, %v1920_v60, 0.0 }
 0x2e4   : > { %7636 = vst [vmem:[#allocation25_spill] sm:$0xff] %v6449_v7 }
 0x2e5   : > { %1792 = vadd.xlane.f32.xlu0 %v1791_v18  ;;  %v1888_v18 = vrot.slane %v6471_v24, %v5542_v33 }
 0x2e6   : > { %1795 = vadd.xlane.f32.xlu1 %v1794_v47  ;;  %v6461_v35 = vpop.xlane.xlu0 %2338  ;;  %v1731_v47 = vmul.f32 %v6487_v26, %v1695_v37 }
 0x2e7   : > { %7637 = vst [vmem:[#allocation26_spill] sm:$0xff] %v6461_v35  ;;  %v6463_v13 = vpop.xlane.xlu1 %2341 }
 0x2e8   : > { %7638 = vst [vmem:[#allocation27_spill] sm:$0xff] %v6463_v13  ;;  %v1818_v55 = vsel %vm1736_vm1, %v1731_v47, 0.0 }
 0x2e9   : > { %1984 = vadd.xlane.f32.xlu0 %v1983_v61 }
 0x2ea   : > { %1987 = vadd.xlane.f32.xlu1 %v1986_v12  ;;  %v6475_v23 = vpop.xlane.xlu0 %2158  ;;  %v1923_v12 = vmul.f32 %v6481_v0, %v1888_v18 }
 0x2eb   : > { %7639 = vst [vmem:[#allocation28_spill] sm:$0xff] %v6475_v23  ;;  %v6477_v48 = vpop.xlane.xlu1 %2161 }
 0x2ec   : > { %7640 = vst [vmem:[#allocation29_spill] sm:$0xff] %v6477_v48  ;;  %v2007_v60 = vsel %vm1736_vm1, %v1923_v12, 0.0  ;;  %v2064_v12 = vrot.slane %v6413_v49, %v5545_v34 }
 0x2ed   : > { %1804 = vadd.xlane.f32.xlu0 %v1803_v1  ;;  %v1924_v1 = vmul.f32 %v6487_v26, %v1888_v18 }
 0x2ee   : > { %1807 = vadd.xlane.f32.xlu1 %v1806_v22  ;;  %v6489_v14 = vpop.xlane.xlu0 %2350 }
 0x2ef   : > { %7641 = vst [vmem:[#allocation30_spill] sm:$0xff] %v6489_v14  ;;  %v6491_v44 = vpop.xlane.xlu1 %2353  ;;  %v2010_v31 = vsel %vm1736_vm1, %v1924_v1, 0.0 }
 0x2f0   : > { %7642 = vst [vmem:[#allocation31_spill] sm:$0xff] %v6491_v44 }
 0x2f1   : > { %1996 = vadd.xlane.f32.xlu0 %v1995_v62  ;;  %v1734_v62 = vmul.f32 %v6509_v21, %v1703_v10 }
 0x2f2   : > { %1999 = vadd.xlane.f32.xlu1 %v1998_v36  ;;  %v6503_v61 = vpop.xlane.xlu0 %1744  ;;  %v1735_v36 = vmul.f32 %v6515_v42, %v1703_v10 }
 0x2f3   : > { %v6505_v27 = vpop.xlane.xlu1 %1747  ;;  %v1827_v52 = vsel %vm1736_vm1, %v1734_v62, 0.0  ;;  %v7643_v62 = vld [vmem:[#allocation19_spill] sm:$0xff] }
 0x2f4   : > { %v1830_v33 = vsel %vm1736_vm1, %v1735_v36, 0.0  ;;  %v2256_v59 = vrot.slane %v6413_v49, %v7643_v62 }
 0x2f5   : > { %1816 = vadd.xlane.f32.xlu0 %v1815_v56  ;;  %v1927_v56 = vmul.f32 %v6509_v21, %v1896_v29 }
 0x2f6   : > { %1819 = vadd.xlane.f32.xlu1 %v1818_v55  ;;  %v6517_v37 = vpop.xlane.xlu0 %1786  ;;  %v1928_v55 = vmul.f32 %v6515_v42, %v1896_v29  ;;  %v2299_v23 = vmul.f32 %v6423_v32, %v2256_v59 }
 0x2f7   : > { %v6519_v22 = vpop.xlane.xlu1 %1789 }
 0x2f8   : > { %v2022_v14 = vsel %vm1736_vm1, %v1928_v55, 0.0 }
 0x2f9   : > { %2008 = vadd.xlane.f32.xlu0 %v2007_v60  ;;  %v2019_v60 = vsel %vm1736_vm1, %v1927_v56, 0.0  ;;  %v2072_v56 = vrot.slane %v6442_v5, %v5545_v34 }
 0x2fa   : > { %2011 = vadd.xlane.f32.xlu1 %v2010_v31  ;;  %v6527_v18 = vpop.xlane.xlu0 %1936  ;;  %v2107_v31 = vmul.f32 %v6423_v32, %v2064_v12  ;;  %v2264_v32 = vrot.slane %v6442_v5, %v7643_v62 }
 0x2fb   : > { %v6529_v47 = vpop.xlane.xlu1 %1939  ;;  %v2111_v44 = vmul.f32 %v6453_v9, %v2072_v56 }
 0x2fd   : > { %1828 = vadd.xlane.f32.xlu0 %v1827_v52  ;;  %v2108_v52 = vmul.f32 %v6429_v38, %v2064_v12  ;;  %v2367_v12 = vsel %vm1736_vm1, %v2299_v23, 0.0  ;;  %v2080_v23 = vrot.slane %v6471_v24, %v5545_v34 }
 0x2fe   : > { %1831 = vadd.xlane.f32.xlu1 %v1830_v33  ;;  %v6537_v1 = vpop.xlane.xlu0 %1978  ;;  %v2175_v33 = vsel %vm1736_vm1, %v2107_v31, 0.0 }
 0x2ff   : > { %v6539_v10 = vpop.xlane.xlu1 %1981  ;;  %v2178_v49 = vsel %vm1736_vm1, %v2108_v52, 0.0  ;;  %v2115_v48 = vmul.f32 %v6481_v0, %v2080_v23 }
 0x301   : > { %2020 = vadd.xlane.f32.xlu0 %v2019_v60  ;;  %v2300_v60 = vmul.f32 %v6429_v38, %v2256_v59  ;;  %v2187_v38 = vsel %vm1736_vm1, %v2111_v44, 0.0 }
 0x302   : > { %2023 = vadd.xlane.f32.xlu1 %v2022_v14  ;;  %v6547_v36 = vpop.xlane.xlu0 %1798 }
 0x303   : > { %v6549_v29 = vpop.xlane.xlu1 %1801  ;;  %v2370_v31 = vsel %vm1736_vm1, %v2300_v60, 0.0 }
 0x305   : > { %2176 = vadd.xlane.f32.xlu0 %v2175_v33  ;;  %v2112_v33 = vmul.f32 %v6459_v51, %v2072_v56 }
 0x306   : > { %2179 = vadd.xlane.f32.xlu1 %v2178_v49  ;;  %v6557_v55 = vpop.xlane.xlu0 %1990  ;;  %v2303_v49 = vmul.f32 %v6453_v9, %v2264_v32  ;;  %v2272_v9 = vrot.slane %v6471_v24, %v7643_v62 }
 0x307   : > { %v6559_v14 = vpop.xlane.xlu1 %1993  ;;  %v2190_v5 = vsel %vm1736_vm1, %v2112_v33, 0.0 }
 0x309   : > { %2368 = vadd.xlane.f32.xlu0 %v2367_v12  ;;  %v2304_v12 = vmul.f32 %v6459_v51, %v2264_v32  ;;  %v2199_v32 = vsel %vm1736_vm1, %v2115_v48, 0.0  ;;  %v2280_v48 = vrot.slane %v6499_v41, %v7643_v62 }
 0x30a   : > { %2371 = vadd.xlane.f32.xlu1 %v2370_v31  ;;  %v6567_v52 = vpop.xlane.xlu0 %1756  ;;  %v2379_v31 = vsel %vm1736_vm1, %v2303_v49, 0.0  ;;  %v2088_v49 = vrot.slane %v6499_v41, %v5545_v34 }
 0x30b   : > { %v6569_v59 = vpop.xlane.xlu1 %1759  ;;  %v2382_v44 = vsel %vm1736_vm1, %v2304_v12, 0.0 }
 0x30c   : > { %v2119_v35 = vmul.f32 %v6509_v21, %v2088_v49 }
 0x30d   : > { %2188 = vadd.xlane.f32.xlu0 %v2187_v38  ;;  %v2116_v38 = vmul.f32 %v6487_v26, %v2080_v23 }
 0x30e   : > { %2191 = vadd.xlane.f32.xlu1 %v2190_v5  ;;  %v6577_v60 = vpop.xlane.xlu0 %1948  ;;  %v2307_v5 = vmul.f32 %v6481_v0, %v2272_v9  ;;  %v2120_v0 = vmul.f32 %v6515_v42, %v2088_v49 }
 0x30f   : > { %v6579_v56 = vpop.xlane.xlu1 %1951  ;;  %v2202_v24 = vsel %vm1736_vm1, %v2116_v38, 0.0 }
 0x311   : > { %2380 = vadd.xlane.f32.xlu0 %v2379_v31  ;;  %v2308_v31 = vmul.f32 %v6487_v26, %v2272_v9  ;;  %v2211_v9 = vsel %vm1736_vm1, %v2119_v35, 0.0 }
 0x312   : > { %2383 = vadd.xlane.f32.xlu1 %v2382_v44  ;;  %v6587_v33 = vpop.xlane.xlu0 %1810  ;;  %v2391_v44 = vsel %vm1736_vm1, %v2307_v5, 0.0  ;;  %v2214_v5 = vsel %vm1736_vm1, %v2120_v0, 0.0 }
 0x313   : > { %v6589_v51 = vpop.xlane.xlu1 %1813  ;;  %v2394_v34 = vsel %vm1736_vm1, %v2308_v31, 0.0 }
 0x315   : > { %2200 = vadd.xlane.f32.xlu0 %v2199_v32  ;;  %v2311_v32 = vmul.f32 %v6509_v21, %v2280_v48 }
 0x316   : > { %2203 = vadd.xlane.f32.xlu1 %v2202_v24  ;;  %v6597_v12 = vpop.xlane.xlu0 %2002  ;;  %v2312_v24 = vmul.f32 %v6515_v42, %v2280_v48 }
 0x317   : > { %v6599_v23 = vpop.xlane.xlu1 %2005  ;;  %v2403_v49 = vsel %vm1736_vm1, %v2311_v32, 0.0 }
 0x318   : > { %v2406_v31 = vsel %vm1736_vm1, %v2312_v24, 0.0 }
 0x319   : > { %2392 = vadd.xlane.f32.xlu0 %v2391_v44 }
 0x31a   : > { %2395 = vadd.xlane.f32.xlu1 %v2394_v34  ;;  %v6607_v38 = vpop.xlane.xlu0 %1768 }
 0x31b   : > { %v6609_v26 = vpop.xlane.xlu1 %1771 }
 0x31d   : > { %2212 = vadd.xlane.f32.xlu0 %v2211_v9 }
 0x31e   : > { %2215 = vadd.xlane.f32.xlu1 %v2214_v5  ;;  %v6615_v41 = vpop.xlane.xlu0 %1960 }
 0x31f   : > { %v6617_v62 = vpop.xlane.xlu1 %1963 }
 0x321   : > { %2404 = vadd.xlane.f32.xlu0 %v2403_v49 }
 0x322   : > { %2407 = vadd.xlane.f32.xlu1 %v2406_v31  ;;  %v6621_v44 = vpop.xlane.xlu0 %1822 }
 0x323   : > { %v6623_v35 = vpop.xlane.xlu1 %1825 }
 0x324   : > { %v6625_v21 = vpop.f32.mrb[4].mxu1 }
 0x325   : > { %7644 = vst [vmem:[#allocation19_spill] sm:$0xff] %v6625_v21  ;;  %v4798_v34 = vpop.f32.mrb[5].mxu1 }
 0x326   : > { %v6627_v0 = vpop.f32.mrb[6].mxu1  ;;  %v6629_v42 = vpop.xlane.xlu0 %2014 }
 0x327   : > { %7645 = vst [vmem:[#allocation32_spill] sm:$0xff] %v6627_v0  ;;  %v4799_v48 = vpop.f32.mrb[7].mxu1  ;;  %v6631_v9 = vpop.xlane.xlu1 %2017 }
 0x32a   : > { %v6633_v5 = vpop.xlane.xlu0 %1780 }
 0x32b   : > { %7646 = vst [vmem:[#allocation33_spill] sm:$0xff] %v6633_v5  ;;  %v6635_v32 = vpop.xlane.xlu1 %1783 }
 0x32c   : > { %v6637_v24 = vpop.f32.mrb[8].mxu1 }
 0x32d   : > { %7647 = vst [vmem:[#allocation34_spill] sm:$0xff] %v6637_v24  ;;  %v4804_v49 = vpop.f32.mrb[9].mxu1 }
 0x32e   : > { %v6639_v31 = vpop.f32.mrb[10].mxu1  ;;  %v6641_v43 = vpop.xlane.xlu0 %1972 }
 0x32f   : > { %7648 = vst [vmem:[#allocation35_spill] sm:$0xff] %v6639_v31  ;;  %v4805_v21 = vpop.f32.mrb[11].mxu1  ;;  %v6643_v34 = vpop.xlane.xlu1 %1975 }
 0x332   : > { %v6645_v0 = vpop.xlane.xlu0 %2128 }
 0x333   : > { %2445 = vperm.xlu1 %4956, %v6329_v16   ;;  %v6648_v48 = vpop.xlane.xlu1 %2131 }
 0x334   : > { %v6650_v13 = vpop.f32.mrb[12].mxu1 }
 0x335   : > { %7649 = vst [vmem:[#allocation36_spill] sm:$0xff] %v6650_v13  ;;  %v4810_v7 = vpop.f32.mrb[13].mxu1 }
 0x336   : > { %v6652_v5 = vpop.f32.mrb[14].mxu1  ;;  %v6654_v24 = vpop.xlane.xlu0 %2170 }
 0x337   : > { %7650 = vst [vmem:[#allocation37_spill] sm:$0xff] %v6652_v5  ;;  %7651 = vst [vmem:[#allocation38_spill] sm:$0xff] %v6654_v24  ;;  %v4811_v49 = vpop.f32.mrb[15].mxu1  ;;  %2788 = vperm.xlu1 %4956, %v6339_v17   ;;  %v6657_v31 = vpop.xlane.xlu1 %2173  ;;  %2442 = vperm.xlu0 %4955, %v6331_v46  }
 0x33a   : > { %v6660_v21 = vpop.xlane.xlu0 %2320 }
 0x33b   : > { %2454 = vperm.xlu1 %4956, %v6349_v57   ;;  %v6663_v16 = vpop.xlane.xlu1 %2323  ;;  %2791 = vperm.xlu0 %4955, %v6343_v6  }
 0x33c   : > { %v6666_v7 = vpop.f32.mrb[16].mxu1 }
 0x33d   : > { %7652 = vst [vmem:[#allocation39_spill] sm:$0xff] %v6666_v7  ;;  %v4816_v5 = vpop.f32.mrb[17].mxu1  ;;  %v7660_v7 = vld [vmem:[#allocation27_spill] sm:$0xff] }
 0x33e   : > { %v6668_v13 = vpop.f32.mrb[18].mxu1  ;;  %v6670_v49 = vpop.xlane.xlu0 %2362 }
 0x33f   : > { %7653 = vst [vmem:[#allocation40_spill] sm:$0xff] %v6668_v13  ;;  %v4817_v17 = vpop.f32.mrb[19].mxu1  ;;  %2800 = vperm.xlu1 %4956, %v6357_v63   ;;  %v6673_v24 = vpop.xlane.xlu1 %2365  ;;  %2457 = vperm.xlu0 %4955, %v6351_v8  }
 0x340   : > { %v7654_v17 = vld [vmem:[#allocation33_spill] sm:$0xff] }
 0x342   : > { %v6676_v46 = vpop.xlane.xlu0 %2182 }
 0x343   : > { %2466 = vperm.xlu1 %4956, %v6365_v30   ;;  %v6679_v57 = vpop.xlane.xlu1 %2185  ;;  %2803 = vperm.xlu0 %4955, %v6359_v54  }
 0x346   : > { %v6682_v6 = vpop.xlane.xlu0 %2374 }
 0x347   : > { %2812 = vperm.xlu1 %4956, %v6373_v45   ;;  %v6685_v5 = vpop.xlane.xlu1 %2377  ;;  %2469 = vperm.xlu0 %4955, %v6367_v40  }
 0x34a   : > { %v6688_v63 = vpop.xlane.xlu0 %2140 }
 0x34b   : > { %2478 = vperm.xlu1 %4956, %v6381_v39   ;;  %v6691_v8 = vpop.xlane.xlu1 %2143  ;;  %2815 = vperm.xlu0 %4955, %v6375_v58  }
 0x34e   : > { %v6694_v30 = vpop.xlane.xlu0 %2332 }
 0x34f   : > { %2824 = vperm.xlu1 %4956, %v6389_v20   ;;  %v6697_v54 = vpop.xlane.xlu1 %2335  ;;  %2481 = vperm.xlu0 %4955, %v6383_v50  }
 0x352   : > { %v6700_v45 = vpop.xlane.xlu0 %2194 }
 0x353   : > { %3123 = vperm.xlu1 %4956, %v6397_v28   ;;  %v6703_v40 = vpop.xlane.xlu1 %2197  ;;  %2827 = vperm.xlu0 %4955, %v6391_v25  }
 0x356   : > { %v6706_v39 = vpop.xlane.xlu0 %2386 }
 0x357   : > { %3458 = vperm.xlu1 %4956, %v6405_v3   ;;  %v6709_v58 = vpop.xlane.xlu1 %2389  ;;  %3126 = vperm.xlu0 %4955, %v6399_v2  }
 0x35a   : > { %v6712_v20 = vpop.xlane.xlu0 %2152 }
 0x35b   : > { %3135 = vperm.xlu1 %4956, %v6417_v11   ;;  %v6715_v50 = vpop.xlane.xlu1 %2155  ;;  %3461 = vperm.xlu0 %4955, %v6407_v4  }
 0x35e   : > { %v6718_v28 = vpop.xlane.xlu0 %2344 }
 0x35f   : > { %3470 = vperm.xlu1 %4956, %v6431_v53   ;;  %v6721_v25 = vpop.xlane.xlu1 %2347  ;;  %3138 = vperm.xlu0 %4955, %v6419_v19  }
 0x362   : > { %v6724_v3 = vpop.xlane.xlu0 %2206 }
 0x363   : > { %2448 = vperm.xlu1 %4956, %v6503_v61   ;;  %v6727_v2 = vpop.xlane.xlu1 %2209  ;;  %3473 = vperm.xlu0 %4955, %v6433_v15  }
 0x366   : > { %v6730_v11 = vpop.xlane.xlu0 %2398 }
 0x367   : > { %2451 = vperm.xlu1 %4956, %v6505_v27   ;;  %v6733_v4 = vpop.xlane.xlu1 %2401  ;;  %2797 = vperm.xlu0 %4955, %v6529_v47  }
 0x36a   : > { %v6736_v53 = vpop.xlane.xlu0 %2164 }
 0x36b   : > { %2490 = vperm.xlu1 %4956, %v6517_v37   ;;  %v6739_v19 = vpop.xlane.xlu1 %2167  ;;  %2839 = vperm.xlu0 %4955, %v6539_v10  }
 0x36e   : > { %v6742_v61 = vpop.xlane.xlu0 %2356 }
 0x36f   : > { %2493 = vperm.xlu1 %4956, %v6519_v22   ;;  %v6745_v15 = vpop.xlane.xlu1 %2359  ;;  %2505 = vperm.xlu0 %4955, %v6549_v29  }
 0x372   : > { %v6748_v27 = vpop.xlane.xlu0 %1792 }
 0x373   : > { %2794 = vperm.xlu1 %4956, %v6527_v18   ;;  %v6751_v47 = vpop.xlane.xlu1 %1795  ;;  %2851 = vperm.xlu0 %4955, %v6559_v14  }
 0x376   : > { %v6754_v37 = vpop.xlane.xlu0 %1984 }
 0x377   : > { %2836 = vperm.xlu1 %4956, %v6537_v1   ;;  %v6757_v10 = vpop.xlane.xlu1 %1987  ;;  %2463 = vperm.xlu0 %4955, %v6569_v59  }
 0x37a   : > { %v6760_v22 = vpop.xlane.xlu0 %1804 }
 0x37b   : > { %2502 = vperm.xlu1 %4956, %v6547_v36   ;;  %v6763_v29 = vpop.xlane.xlu1 %1807  ;;  %2809 = vperm.xlu0 %4955, %v6579_v56  }
 0x37e   : > { %v6766_v18 = vpop.xlane.xlu0 %1996 }
 0x37f   : > { %2848 = vperm.xlu1 %4956, %v6557_v55   ;;  %v6769_v14 = vpop.xlane.xlu1 %1999  ;;  %2517 = vperm.xlu0 %4955, %v6589_v51  }
 0x382   : > { %v6772_v1 = vpop.xlane.xlu0 %1816 }
 0x383   : > { %2460 = vperm.xlu1 %4956, %v6567_v52   ;;  %v6775_v59 = vpop.xlane.xlu1 %1819  ;;  %2863 = vperm.xlu0 %4955, %v6599_v23  }
 0x386   : > { %v6778_v36 = vpop.xlane.xlu0 %2008 }
 0x387   : > { %2806 = vperm.xlu1 %4956, %v6577_v60   ;;  %v6781_v56 = vpop.xlane.xlu1 %2011  ;;  %2475 = vperm.xlu0 %4955, %v6609_v26  }
 0x38a   : > { %v6784_v55 = vpop.xlane.xlu0 %1828 }
 0x38b   : > { %2514 = vperm.xlu1 %4956, %v6587_v33   ;;  %v6787_v51 = vpop.xlane.xlu1 %1831  ;;  %2821 = vperm.xlu0 %4955, %v6617_v62  }
 0x38e   : > { %v6790_v52 = vpop.xlane.xlu0 %2020 }
 0x38f   : > { %2860 = vperm.xlu1 %4956, %v6597_v12   ;;  %v6793_v23 = vpop.xlane.xlu1 %2023  ;;  %2529 = vperm.xlu0 %4955, %v6623_v35  }
 0x392   : > { %v6796_v60 = vpop.xlane.xlu0 %2176 }
 0x393   : > { %2472 = vperm.xlu1 %4956, %v6607_v38   ;;  %v6799_v26 = vpop.xlane.xlu1 %2179  ;;  %2875 = vperm.xlu0 %4955, %v6631_v9  }
 0x396   : > { %v6802_v33 = vpop.xlane.xlu0 %2368 }
 0x397   : > { %2818 = vperm.xlu1 %4956, %v6615_v41   ;;  %v6805_v62 = vpop.xlane.xlu1 %2371  ;;  %2487 = vperm.xlu0 %4955, %v6635_v32  }
 0x39a   : > { %v6808_v12 = vpop.xlane.xlu0 %2188 }
 0x39b   : > { %2526 = vperm.xlu1 %4956, %v6621_v44   ;;  %v6811_v35 = vpop.xlane.xlu1 %2191  ;;  %2833 = vperm.xlu0 %4955, %v6643_v34  }
 0x39e   : > { %v6814_v38 = vpop.xlane.xlu0 %2380 }
 0x39f   : > { %2872 = vperm.xlu1 %4956, %v6629_v42   ;;  %v6817_v9 = vpop.xlane.xlu1 %2383  ;;  %3132 = vperm.xlu0 %4955, %v6648_v48  }
 0x3a2   : > { %v6820_v41 = vpop.xlane.xlu0 %2200 }
 0x3a3   : > { %2484 = vperm.xlu1 %4956, %v7654_v17   ;;  %v6823_v32 = vpop.xlane.xlu1 %2203  ;;  %3174 = vperm.xlu0 %4955, %v6657_v31   ;;  %v7655_v17 = vld [vmem:[#allocation38_spill] sm:$0xff] }
 0x3a6   : > { %v6826_v44 = vpop.xlane.xlu0 %2392 }
 0x3a7   : > { %2830 = vperm.xlu1 %4956, %v6641_v43   ;;  %v6829_v34 = vpop.xlane.xlu1 %2395  ;;  %3467 = vperm.xlu0 %4955, %v6663_v16  }
 0x3aa   : > { %v6836_v48 = vpop.xlane.xlu0 %2212 }
 0x3ab   : > { %3129 = vperm.xlu1 %4956, %v6645_v0   ;;  %v6833_v42 = vpop.xlane.xlu1 %2215  ;;  %3509 = vperm.xlu0 %4955, %v6673_v24  }
 0x3ae   : > { %v6842_v31 = vpop.xlane.xlu0 %2404 }
 0x3af   : > { %3171 = vperm.xlu1 %4956, %v7655_v17   ;;  %v6839_v13 = vpop.xlane.xlu1 %2407  ;;  %3186 = vperm.xlu0 %4955, %v6679_v57   ;;  %v7657_v17 = vld [vmem:[#allocation25_spill] sm:$0xff] }
 0x3b3   : > { %3464 = vperm.xlu1 %4956, %v6660_v21   ;;  %v6845_v43 = vpop.permute.xlu1 %2445  ;;  %3521 = vperm.xlu0 %4955, %v6685_v5  }
 0x3b6   : > { %v6848_v0 = vpop.permute.xlu0 %2442 }
 0x3b7   : > { %3506 = vperm.xlu1 %4956, %v6670_v49   ;;  %v6851_v24 = vpop.permute.xlu1 %2788  ;;  %3144 = vperm.xlu0 %4955, %v6691_v8  }
 0x3ba   : > { %v6854_v16 = vpop.permute.xlu0 %2791 }
 0x3bb   : > { %3183 = vperm.xlu1 %4956, %v6676_v46   ;;  %v6857_v57 = vpop.permute.xlu1 %2454  ;;  %3479 = vperm.xlu0 %4955, %v6697_v54  }
 0x3be   : > { %v6860_v21 = vpop.permute.xlu0 %2457 }
 0x3bf   : > { %3518 = vperm.xlu1 %4956, %v6682_v6   ;;  %v6863_v5 = vpop.permute.xlu1 %2800  ;;  %2845 = vperm.xlu0 %4955, %v6757_v10  }
 0x3c2   : > { %v6866_v49 = vpop.permute.xlu0 %2803 }
 0x3c3   : > { %3141 = vperm.xlu1 %4956, %v6688_v63   ;;  %v6869_v8 = vpop.permute.xlu1 %2466  ;;  %2511 = vperm.xlu0 %4955, %v6763_v29  }
 0x3c6   : > { %v6872_v46 = vpop.permute.xlu0 %2469 }
 0x3c7   : > { %3476 = vperm.xlu1 %4956, %v6694_v30   ;;  %v6875_v54 = vpop.permute.xlu1 %2812  ;;  %2857 = vperm.xlu0 %4955, %v6769_v14  }
 0x3ca   : > { %v6878_v6 = vpop.permute.xlu0 %2815 }
 0x3cb   : > { %2496 = vperm.xlu1 %4956, %v6748_v27   ;;  %v6881_v10 = vpop.permute.xlu1 %2478  ;;  %2523 = vperm.xlu0 %4955, %v6775_v59  }
 0x3ce   : > { %v6884_v63 = vpop.permute.xlu0 %2481 }
 0x3cf   : > { %2499 = vperm.xlu1 %4956, %v6751_v47   ;;  %v6887_v29 = vpop.permute.xlu1 %2824  ;;  %2869 = vperm.xlu0 %4955, %v6781_v56  }
 0x3d2   : > { %v6890_v30 = vpop.permute.xlu0 %2827 }
 0x3d3   : > { %2842 = vperm.xlu1 %4956, %v6754_v37   ;;  %v6893_v14 = vpop.permute.xlu1 %3123  ;;  %2535 = vperm.xlu0 %4955, %v6787_v51  }
 0x3d6   : > { %v6896_v27 = vpop.permute.xlu0 %3126 }
 0x3d7   : > { %2508 = vperm.xlu1 %4956, %v6760_v22   ;;  %v6899_v59 = vpop.permute.xlu1 %3458  ;;  %2881 = vperm.xlu0 %4955, %v6793_v23  }
 0x3da   : > { %v6902_v47 = vpop.permute.xlu0 %3461 }
 0x3db   : > { %2854 = vperm.xlu1 %4956, %v6766_v18   ;;  %v6905_v56 = vpop.permute.xlu1 %3135  ;;  %3180 = vperm.xlu0 %4955, %v6799_v26  }
 0x3de   : > { %v6908_v37 = vpop.permute.xlu0 %3138 }
 0x3df   : > { %2520 = vperm.xlu1 %4956, %v6772_v1   ;;  %v6911_v51 = vpop.permute.xlu1 %3470  ;;  %3515 = vperm.xlu0 %4955, %v6805_v62  }
 0x3e2   : > { %v6914_v22 = vpop.permute.xlu0 %3473 }
 0x3e3   : > { %2866 = vperm.xlu1 %4956, %v6778_v36   ;;  %v6917_v23 = vpop.permute.xlu1 %2448  ;;  %3192 = vperm.xlu0 %4955, %v6811_v35  }
 0x3e6   : > { %v6920_v18 = vpop.permute.xlu0 %2797 }
 0x3e7   : > { %2532 = vperm.xlu1 %4956, %v6784_v55   ;;  %v6923_v26 = vpop.permute.xlu1 %2451  ;;  %3527 = vperm.xlu0 %4955, %v6817_v9  }
 0x3ea   : > { %v6926_v1 = vpop.permute.xlu0 %2839 }
 0x3eb   : > { %7656 = vst [vmem:[#allocation33_spill] sm:$0xff] %v6926_v1  ;;  %2878 = vperm.xlu1 %4956, %v6790_v52   ;;  %v6929_v62 = vpop.permute.xlu1 %2490  ;;  %3150 = vperm.xlu0 %4955, %v7657_v17  }
 0x3ee   : > { %v6932_v36 = vpop.permute.xlu0 %2505 }
 0x3ef   : > { %7658 = vst [vmem:[#allocation38_spill] sm:$0xff] %v6932_v36  ;;  %3177 = vperm.xlu1 %4956, %v6796_v60   ;;  %v6935_v35 = vpop.permute.xlu1 %2493  ;;  %3198 = vperm.xlu0 %4955, %v6703_v40  }
 0x3f2   : > { %v6938_v55 = vpop.permute.xlu0 %2851 }
 0x3f3   : > { %7659 = vst [vmem:[#allocation25_spill] sm:$0xff] %v6938_v55  ;;  %3512 = vperm.xlu1 %4956, %v6802_v33   ;;  %v2795_v9 = vpop.permute.xlu1 %2794  ;;  %3485 = vperm.xlu0 %4955, %v7660_v7   ;;  %v7662_v33 = vld [vmem:[#allocation24_spill] sm:$0xff]  ;;  %v7665_v55 = vld [vmem:[#allocation26_spill] sm:$0xff] }
 0x3f6   : > { %v6942_v52 = vpop.permute.xlu0 %2463 }
 0x3f7   : > { %3189 = vperm.xlu1 %4956, %v6808_v12   ;;  %v6945_v17 = vpop.permute.xlu1 %2836  ;;  %3533 = vperm.xlu0 %4955, %v6709_v58  }
 0x3fa   : > { %v2810_v60 = vpop.permute.xlu0 %2809 }
 0x3fb   : > { %3524 = vperm.xlu1 %4956, %v6814_v38   ;;  %v6949_v36 = vpop.permute.xlu1 %2502  ;;  %3156 = vperm.xlu0 %4955, %v6715_v50  }
 0x3fe   : > { %v6952_v40 = vpop.permute.xlu0 %2517 }
 0x3ff   : > { %7661 = vst [vmem:[#allocation27_spill] sm:$0xff] %v6952_v40  ;;  %3147 = vperm.xlu1 %4956, %v7662_v33   ;;  %v6955_v7 = vpop.permute.xlu1 %2848  ;;  %3204 = vperm.xlu0 %4955, %v6823_v32   ;;  %v7667_v32 = vld [vmem:[#allocation29_spill] sm:$0xff] }
 0x400   : > { %7663 = vst [vmem:[#allocation24_spill] sm:$0xff] %v6955_v7 }
 0x402   : > { %v6958_v12 = vpop.permute.xlu0 %2863 }
 0x403   : > { %7664 = vst [vmem:[#allocation41_spill] sm:$0xff] %v6958_v12  ;;  %3195 = vperm.xlu1 %4956, %v6700_v45   ;;  %v6961_v58 = vpop.permute.xlu1 %2460  ;;  %3491 = vperm.xlu0 %4955, %v6721_v25   ;;  %v7669_v25 = vlaneseq }
 0x406   : > { %v6964_v38 = vpop.permute.xlu0 %2475 }
 0x407   : > { %3482 = vperm.xlu1 %4956, %v7665_v55   ;;  %v2807_v50 = vpop.permute.xlu1 %2806  ;;  %3539 = vperm.xlu0 %4955, %v6829_v34   ;;  %v2538_v55 = vand.u32 127, %v7669_v25 }
 0x40a   : > { %v2822_v33 = vpop.permute.xlu0 %2821 }
 0x40b   : > { %3530 = vperm.xlu1 %4956, %v6706_v39   ;;  %v6969_v40 = vpop.permute.xlu1 %2514  ;;  %3162 = vperm.xlu0 %4955, %v7667_v32   ;;  %v7671_v39 = vld [vmem:[#allocation31_spill] sm:$0xff]  ;;  %v7672_v32 = vld [vmem:[#allocation16_spill] sm:$0xff] }
 0x40c   : > { %7666 = vst [vmem:[#allocation26_spill] sm:$0xff] %v6969_v40  ;;  %v2543_v40 = vadd.s32 4294967288, %v2538_v55  ;;  %v6986_v1 = vsub.s32 %v2538_v55, %v7672_v32 }
 0x40e   : > { %v6972_v12 = vpop.permute.xlu0 %2529 }
 0x40f   : > { %7668 = vst [vmem:[#allocation29_spill] sm:$0xff] %v6972_v12  ;;  %3153 = vperm.xlu1 %4956, %v6712_v20   ;;  %v6975_v45 = vpop.permute.xlu1 %2860  ;;  %3210 = vperm.xlu0 %4955, %v6727_v2   ;;  %v6993_v2 = vsub.s32 %v2543_v40, %v7672_v32  ;;  %v2904_v32 = vrot.slane %v6863_v5, %v6986_v1 }
 0x411   : > { %v2890_v25 = vrot.slane %v6854_v16, %v6993_v2  ;;  %v2908_v16 = vrot.slane %v6866_v49, %v6993_v2  ;;  %v2917_v40 = vrot.slane %v2810_v60, %v6993_v2  ;;  %v2926_v60 = vrot.slane %v6878_v6, %v6993_v2 }
 0x412   : > { %v6979_v7 = vpop.permute.xlu0 %2875 }
 0x413   : > { %7670 = vst [vmem:[#allocation42_spill] sm:$0xff] %v6979_v7  ;;  %3201 = vperm.xlu1 %4956, %v6820_v41   ;;  %v6982_v34 = vpop.permute.xlu1 %2472  ;;  %3497 = vperm.xlu0 %4955, %v7671_v39   ;;  %v2895_v41 = vrot.slane %v2795_v9, %v6986_v1  ;;  %v2899_v39 = vrot.slane %v6920_v18, %v6993_v2 }
 0x414   : > { %v2913_v9 = vrot.slane %v2807_v50, %v6986_v1 }
 0x416   : > { %v6988_v12 = vpop.permute.xlu0 %2487  ;;  %v2918_v50 = vsel %vm2548_vm2, %v2917_v40, %v2913_v9  ;;  %v2940_v9 = vrot.slane %v6887_v29, %v6986_v1 }
 0x417   : > { %3488 = vperm.xlu1 %4956, %v6718_v28   ;;  %v2819_v20 = vpop.permute.xlu1 %2818  ;;  %3545 = vperm.xlu0 %4955, %v6733_v4   ;;  %v2886_v28 = vrot.slane %v6851_v24, %v6986_v1  ;;  %v2900_v4 = vsel %vm2548_vm2, %v2899_v39, %v2895_v41  ;;  %v2909_v41 = vsel %vm2548_vm2, %v2908_v16, %v2904_v32  ;;  %v7675_v16 = vld [vmem:[#allocation30_spill] sm:$0xff] }
 0x418   : > { %v2931_v49 = vrot.slane %v2819_v20, %v6986_v1  ;;  %v2922_v39 = vrot.slane %v6875_v54, %v6986_v1 }
 0x419   : > { %v2891_v18 = vsel %vm2548_vm2, %v2890_v25, %v2886_v28  ;;  %v2935_v25 = vrot.slane %v2822_v33, %v6993_v2 }
 0x41a   : > { %v2834_v55 = vpop.permute.xlu0 %2833  ;;  %v2927_v28 = vsel %vm2548_vm2, %v2926_v60, %v2922_v39 }
 0x41b   : > { %3536 = vperm.xlu1 %4956, %v6826_v44   ;;  %v7001_v7 = vpop.permute.xlu1 %2526  ;;  %3168 = vperm.xlu0 %4955, %v6739_v19   ;;  %v3027_v19 = vsel %vm2685_vm3, %v2900_v4, %v2891_v18  ;;  %v2936_v6 = vsel %vm2548_vm2, %v2935_v25, %v2931_v49  ;;  %v2944_v4 = vrot.slane %v6890_v30, %v6993_v2 }
 0x41c   : > { %7673 = vst [vmem:[#allocation31_spill] sm:$0xff] %v7001_v7  ;;  %v7674_v7 = vld [vmem:[#allocation28_spill] sm:$0xff]  ;;  %v3028_v5 = vsel %vm2687_vm4, %v2909_v41, %v3027_v19  ;;  %v2953_v18 = vrot.slane %v2834_v55, %v6993_v2  ;;  %v7676_v41 = vld [vmem:[#allocation34_spill] sm:$0xff] }
 0x41d   : > { %v2945_v30 = vsel %vm2548_vm2, %v2944_v4, %v2940_v9 }
 0x41e   : > { %v3133_v44 = vpop.permute.xlu0 %3132 }
 0x41f   : > { %3159 = vperm.xlu1 %4956, %v7674_v7   ;;  %v7016_v24 = vpop.permute.xlu1 %2872  ;;  %3216 = vperm.xlu0 %4955, %v6833_v42   ;;  %v3029_v42 = vsel %vm2689_vm5, %v2918_v50, %v3028_v5 }
 0x420   : > { %v3030_v33 = vsel %vm2691_vm6, %v2927_v28, %v3029_v42 }
 0x422   : > { %v3175_v7 = vpop.permute.xlu0 %3174 }
 0x423   : > { %3207 = vperm.xlu1 %4956, %v6724_v3   ;;  %v7030_v20 = vpop.permute.xlu1 %2484  ;;  %3503 = vperm.xlu0 %4955, %v6745_v15   ;;  %v3031_v3 = vsel %vm2693_vm7, %v2936_v6, %v3030_v33  ;;  %v3297_v42 = vrot.slane %v3175_v7, %v6993_v2 }
 0x424   : > { %v3032_v29 = vsel %vm2695_vm8, %v2945_v30, %v3031_v3  ;;  %v2542_v30 = vrot.slane %v6848_v0, %v6986_v1 }
 0x426   : > { %v3468_v54 = vpop.permute.xlu0 %3467 }
 0x427   : > { %3494 = vperm.xlu1 %4956, %v7675_v16   ;;  %v2831_v15 = vpop.permute.xlu1 %2830  ;;  %3551 = vperm.xlu0 %4955, %v6839_v13   ;;  %v3234_v13 = vrot.slane %v3133_v44, %v6993_v2  ;;  %v3569_v4 = vrot.slane %v3468_v54, %v6993_v2 }
 0x428   : > { %v2949_v40 = vrot.slane %v2831_v15, %v6986_v1 }
 0x42a   : > { %v2954_v32 = vsel %vm2548_vm2, %v2953_v18, %v2949_v40  ;;  %v3510_v19 = vpop.permute.xlu0 %3509 }
 0x42b   : > { %3542 = vperm.xlu1 %4956, %v6730_v11   ;;  %v3130_v50 = vpop.permute.xlu1 %3129  ;;  %v3033_v49 = vsel %vm2697_vm9, %v2954_v32, %v3032_v29  ;;  %v3632_v7 = vrot.slane %v3510_v19, %v6993_v2  ;;  %v2547_v29 = vrot.slane %v6845_v43, %v6993_v2 }
 0x42c   : > { %v3230_v55 = vrot.slane %v3130_v50, %v6986_v1  ;;  %v3084_v60 = vadd.f32 %v7676_v41, %v3033_v49  ;;  %v3221_v50 = vrot.slane %v6893_v14, %v6986_v1  ;;  %v2557_v49 = vrot.slane %v6923_v26, %v6993_v2 }
 0x42d   : > { %v3243_v41 = vrot.slane %v6908_v37, %v6993_v2  ;;  %v3560_v14 = vrot.slane %v6902_v47, %v6993_v2  ;;  %v2553_v26 = vrot.slane %v6917_v23, %v6986_v1  ;;  %v3239_v37 = vrot.slane %v6905_v56, %v6986_v1 }
 0x42e   : > { %v3235_v5 = vsel %vm2548_vm2, %v3234_v13, %v3230_v55  ;;  %v3187_v25 = vpop.permute.xlu0 %3186  ;;  %v2562_v55 = vrot.slane %v6857_v57, %v6986_v1  ;;  %v7095_v43 = vmul.f32 0.17677669, %v3084_v60  ;;  %v3556_v57 = vrot.slane %v6899_v59, %v6986_v1 }
 0x42f   : > { %3165 = vperm.xlu1 %4956, %v6736_v53   ;;  %v3172_v39 = vpop.permute.xlu1 %3171  ;;  %v3315_v54 = vrot.slane %v3187_v25, %v6993_v2  ;;  %v2558_v47 = vsel %vm2548_vm2, %v2557_v49, %v2553_v26  ;;  %v2571_v23 = vrot.slane %v6961_v58, %v6986_v1  ;;  %v3244_v59 = vsel %vm2548_vm2, %v3243_v41, %v3239_v37 }
 0x430   : > { %v3293_v6 = vrot.slane %v3172_v39, %v6986_v1  ;;  %v3578_v56 = vrot.slane %v6914_v22, %v6993_v2  ;;  %v2575_v58 = vrot.slane %v6942_v52, %v6993_v2 }
 0x432   : > { %v7058_v11 = vsel %vm2548_vm2, %v3297_v42, %v3293_v6  ;;  %v3522_v28 = vpop.permute.xlu0 %3521  ;;  %v2576_v52 = vsel %vm2548_vm2, %v2575_v58, %v2571_v23 }
 0x433   : > { %3213 = vperm.xlu1 %4956, %v6836_v48   ;;  %v3465_v44 = vpop.permute.xlu1 %3464  ;;  %v3650_v0 = vrot.slane %v3522_v28, %v6993_v2 }
 0x434   : > { %v3565_v33 = vrot.slane %v3465_v44, %v6986_v1 }
 0x436   : > { %v3570_v9 = vsel %vm2548_vm2, %v3569_v4, %v3565_v33  ;;  %v3145_v3 = vpop.permute.xlu0 %3144  ;;  %v2566_v4 = vrot.slane %v6860_v21, %v6993_v2  ;;  %v3561_v33 = vsel %vm2548_vm2, %v3560_v14, %v3556_v57  ;;  %v3574_v21 = vrot.slane %v6911_v51, %v6986_v1 }
 0x437   : > { %3500 = vperm.xlu1 %4956, %v6742_v61   ;;  %v3507_v53 = vpop.permute.xlu1 %3506  ;;  %v3225_v61 = vrot.slane %v6896_v27, %v6993_v2  ;;  %v2549_v27 = vsel %vm2548_vm2, %v2547_v29, %v2542_v30  ;;  %v3252_v28 = vrot.slane %v3145_v3, %v6993_v2  ;;  %v2584_v51 = vrot.slane %v6872_v46, %v6993_v2 }
 0x438   : > { %v3628_v16 = vrot.slane %v3507_v53, %v6986_v1  ;;  %v2686_v22 = vsel %vm2685_vm3, %v2558_v47, %v2549_v27  ;;  %v2567_v29 = vsel %vm2548_vm2, %v2566_v4, %v2562_v55  ;;  %v2598_v57 = vrot.slane %v6881_v10, %v6986_v1 }
 0x439   : > { %v3226_v25 = vsel %vm2548_vm2, %v3225_v61, %v3221_v50  ;;  %v2593_v50 = vrot.slane %v6964_v38, %v6993_v2  ;;  %v2607_v38 = vrot.slane %v7030_v20, %v6986_v1 }
 0x43a   : > { %v7068_v15 = vsel %vm2548_vm2, %v3632_v7, %v3628_v16  ;;  %v3480_v18 = vpop.permute.xlu0 %3479  ;;  %v3362_v60 = vsel %vm2685_vm3, %v3235_v5, %v3226_v25  ;;  %v3775_v5 = vsel %vm3768_vm10, %v7095_v43, -inf  ;;  %v3697_v16 = vsel %vm2685_vm3, %v3570_v9, %v3561_v33 }
 0x43b   : > { %3548 = vperm.xlu1 %4956, %v6842_v31   ;;  %v3184_v48 = vpop.permute.xlu1 %3183  ;;  %v3363_v3 = vsel %vm2687_vm4, %v3244_v59, %v3362_v60  ;;  %v3587_v30 = vrot.slane %v3480_v18, %v6993_v2  ;;  %v3579_v9 = vsel %vm2548_vm2, %v3578_v56, %v3574_v21  ;;  %v2580_v18 = vrot.slane %v6869_v8, %v6986_v1 }
 0x43c   : > { %v3311_v40 = vrot.slane %v3184_v48, %v6986_v1  ;;  %v3698_v49 = vsel %vm2687_vm4, %v3579_v9, %v3697_v16  ;;  %v2602_v25 = vrot.slane %v6884_v63, %v6993_v2  ;;  %v2611_v8 = vrot.slane %v6988_v12, %v6993_v2  ;;  %v7679_v9 = vld [vmem:[#allocation38_spill] sm:$0xff] }
 0x43d   : > { %v2585_v41 = vsel %vm2548_vm2, %v2584_v51, %v2580_v18  ;;  %v2620_v56 = vrot.slane %v6935_v35, %v6993_v2  ;;  %v2634_v35 = vrot.slane %v6949_v36, %v6986_v1  ;;  %v2638_v36 = vrot.slane %v7679_v9, %v6993_v2  ;;  %v7680_v18 = vld [vmem:[#allocation24_spill] sm:$0xff] }
 0x43e   : > { %v7078_v32 = vsel %vm2548_vm2, %v3315_v54, %v3311_v40  ;;  %v7080_v19 = vpop.permute.xlu0 %2845  ;;  %v2589_v40 = vrot.slane %v6982_v34, %v6986_v1  ;;  %v2612_v20 = vsel %vm2548_vm2, %v2611_v8, %v2607_v38  ;;  %v3012_v9 = vrot.slane %v7016_v24, %v6986_v1 }
 0x43f   : > { %v3519_v31 = vpop.permute.xlu1 %3518 }
 0x440   : > { %v3646_v13 = vrot.slane %v3519_v31, %v6986_v1  ;;  %v2688_v31 = vsel %vm2687_vm4, %v2567_v29, %v2686_v22  ;;  %v2594_v55 = vsel %vm2548_vm2, %v2593_v50, %v2589_v40  ;;  %v2971_v40 = vrot.slane %v7080_v19, %v6993_v2  ;;  %v7678_v29 = vld [vmem:[#allocation33_spill] sm:$0xff] }
 0x441   : > { %v2962_v51 = vrot.slane %v7678_v29, %v6993_v2 }
 0x442   : > { %v7103_v39 = vsel %vm2548_vm2, %v3650_v0, %v3646_v13  ;;  %v7105_v42 = vpop.permute.xlu0 %2511  ;;  %v2690_v13 = vsel %vm2689_vm5, %v2576_v52, %v2688_v31  ;;  %v2958_v52 = vrot.slane %v6945_v17, %v6986_v1 }
 0x443   : > { %v3142_v6 = vpop.permute.xlu1 %3141  ;;  %v2692_v14 = vsel %vm2691_vm6, %v2585_v41, %v2690_v13  ;;  %v2976_v13 = vrot.slane %v7680_v18, %v6986_v1 }
 0x444   : > { %v3248_v44 = vrot.slane %v3142_v6, %v6986_v1  ;;  %v2694_v37 = vsel %vm2693_vm7, %v2594_v55, %v2692_v14  ;;  %v2603_v6 = vsel %vm2548_vm2, %v2602_v25, %v2598_v57  ;;  %v2963_v38 = vsel %vm2548_vm2, %v2962_v51, %v2958_v52  ;;  %v7682_v57 = vld [vmem:[#allocation25_spill] sm:$0xff] }
 0x445   : > { %v2696_v63 = vsel %vm2695_vm8, %v2603_v6, %v2694_v37  ;;  %v2980_v37 = vrot.slane %v7682_v57, %v6993_v2 }
 0x446   : > { %v3253_v53 = vsel %vm2548_vm2, %v3252_v28, %v3248_v44  ;;  %v7129_v7 = vpop.permute.xlu0 %2857  ;;  %3776 = vmax.xlane.f32.xlu0 %v3775_v5  ;;  %v2698_v28 = vsel %vm2697_vm9, %v2612_v20, %v2696_v63  ;;  %v7677_v44 = vld [vmem:[#allocation19_spill] sm:$0xff] }
 0x447   : > { %v7136_v48 = vsel %vm2689_vm5, %v3253_v53, %v3363_v3  ;;  %v3477_v54 = vpop.permute.xlu1 %3476  ;;  %v2749_v4 = vadd.f32 %v7677_v44, %v2698_v28  ;;  %v2616_v3 = vrot.slane %v6929_v62, %v6986_v1  ;;  %v2647_v62 = vrot.slane %v7105_v42, %v6993_v2 }
 0x448   : > { %v3583_v61 = vrot.slane %v3477_v54, %v6986_v1  ;;  %v2989_v41 = vrot.slane %v7129_v7, %v6993_v2  ;;  %v2981_v44 = vsel %vm2548_vm2, %v2980_v37, %v2976_v13  ;;  %v7688_v13 = vld [vmem:[#allocation32_spill] sm:$0xff] }
 0x449   : > { %v7189_v58 = vmul.f32 0.17677669, %v2749_v4  ;;  %v2621_v54 = vsel %vm2548_vm2, %v2620_v56, %v2616_v3 }
 0x44a   : > { %v3588_v34 = vsel %vm2548_vm2, %v3587_v30, %v3583_v61  ;;  %v7152_v0 = vpop.permute.xlu0 %2523 }
 0x44b   : > { %v7158_v46 = vsel %vm2689_vm5, %v3588_v34, %v3698_v49  ;;  %v2497_v27 = vpop.permute.xlu1 %2496  ;;  %v3769_v61 = vsel %vm3768_vm10, %v7189_v58, -inf  ;;  %v2639_v34 = vsel %vm2548_vm2, %v2638_v36, %v2634_v35  ;;  %v2665_v25 = vrot.slane %v7152_v0, %v6993_v2 }
 0x44c   : > { %v2625_v5 = vrot.slane %v2497_v27, %v6986_v1  ;;  %v7681_v27 = vld [vmem:[#allocation26_spill] sm:$0xff] }
 0x44d   : > { %v2652_v55 = vrot.slane %v7681_v27, %v6986_v1 }
 0x44e   : > { %v7169_v26 = vpop.permute.xlu0 %2869 }
 0x44f   : > { %v2500_v60 = vpop.permute.xlu1 %2499 }
 0x450   : > { %v2629_v10 = vrot.slane %v2500_v60, %v6993_v2  ;;  %v7683_v60 = vld [vmem:[#allocation27_spill] sm:$0xff] }
 0x451   : > { %v2656_v20 = vrot.slane %v7683_v60, %v6993_v2 }
 0x452   : > { %v7176_v47 = vpop.permute.xlu0 %2535  ;;  %v2630_v21 = vsel %vm2548_vm2, %v2629_v10, %v2625_v5  ;;  %v7684_v10 = vld [vmem:[#allocation31_spill] sm:$0xff]  ;;  %v3007_v5 = vrot.slane %v7169_v26, %v6993_v2 }
 0x453   : > { %v2843_v23 = vpop.permute.xlu1 %2842  ;;  %v2699_v31 = vsel %vm2685_vm3, %v2630_v21, %v2621_v54  ;;  %v2657_v4 = vsel %vm2548_vm2, %v2656_v20, %v2652_v55  ;;  %v2670_v56 = vrot.slane %v7684_v10, %v6986_v1  ;;  %v7686_v54 = vld [vmem:[#allocation29_spill] sm:$0xff]  ;;  %v2683_v26 = vrot.slane %v7176_v47, %v6993_v2  ;;  %v7687_v47 = vld [vmem:[#allocation42_spill] sm:$0xff] }
 0x454   : > { %v2967_v22 = vrot.slane %v2843_v23, %v6986_v1  ;;  %v2700_v14 = vsel %vm2687_vm4, %v2639_v34, %v2699_v31  ;;  %v2674_v35 = vrot.slane %v7686_v54, %v6993_v2 }
 0x456   : > { %v7180_v12 = vpop.permute.xlu0 %2881  ;;  %v2972_v19 = vsel %vm2548_vm2, %v2971_v40, %v2967_v22  ;;  %v7685_v22 = vld [vmem:[#allocation41_spill] sm:$0xff]  ;;  %v2675_v51 = vsel %vm2548_vm2, %v2674_v35, %v2670_v56 }
 0x457   : > { %v2509_v59 = vpop.permute.xlu1 %2508  ;;  %v3034_v6 = vsel %vm2685_vm3, %v2972_v19, %v2963_v38  ;;  %v3025_v18 = vrot.slane %v7180_v12, %v6993_v2 }
 0x458   : > { %v2643_v16 = vrot.slane %v2509_v59, %v6986_v1  ;;  %v2994_v59 = vrot.slane %v6975_v45, %v6986_v1  ;;  %v3035_v3 = vsel %vm2687_vm4, %v2981_v44, %v3034_v6  ;;  %v7689_v6 = vld [vmem:[#allocation35_spill] sm:$0xff] }
 0x45a   : > { %v7187_v33 = vpop.permute.xlu0 %3180  ;;  %v2648_v50 = vsel %vm2548_vm2, %v2647_v62, %v2643_v16  ;;  %v2998_v16 = vrot.slane %v7685_v22, %v6993_v2 }
 0x45b   : > { %v2855_v53 = vpop.permute.xlu1 %2854  ;;  %v2701_v63 = vsel %vm2689_vm5, %v2648_v50, %v2700_v14  ;;  %v3016_v50 = vrot.slane %v7687_v47, %v6993_v2  ;;  %v3306_v12 = vrot.slane %v7187_v33, %v6993_v2 }
 0x45c   : > { %v2985_v42 = vrot.slane %v2855_v53, %v6986_v1  ;;  %v2702_v53 = vsel %vm2691_vm6, %v2657_v4, %v2701_v63  ;;  %v2999_v29 = vsel %vm2548_vm2, %v2998_v16, %v2994_v59 }
 0x45d   : > { %v3017_v55 = vsel %vm2548_vm2, %v3016_v50, %v3012_v9 }
 0x45e   : > { %v7205_v30 = vpop.permute.xlu0 %3515  ;;  %v2990_v7 = vsel %vm2548_vm2, %v2989_v41, %v2985_v42 }
 0x45f   : > { %v2521_v17 = vpop.permute.xlu1 %2520  ;;  %3770 = vmax.xlane.f32.xlu1 %v3769_v61  ;;  %v3036_v45 = vsel %vm2689_vm5, %v2990_v7, %v3035_v3  ;;  %v3641_v33 = vrot.slane %v7205_v30, %v6993_v2 }
 0x460   : > { %v2661_v49 = vrot.slane %v2521_v17, %v6986_v1  ;;  %v3037_v36 = vsel %vm2691_vm6, %v2999_v29, %v3036_v45 }
 0x462   : > { %v7229_v8 = vpop.permute.xlu0 %3192  ;;  %v2666_v28 = vsel %vm2548_vm2, %v2665_v25, %v2661_v49 }
 0x463   : > { %v2867_v23 = vpop.permute.xlu1 %2866  ;;  %v2703_v52 = vsel %vm2693_vm7, %v2666_v28, %v2702_v53 }
 0x464   : > { %v3003_v0 = vrot.slane %v2867_v23, %v6986_v1  ;;  %v2704_v19 = vsel %vm2695_vm8, %v2675_v51, %v2703_v52 }
 0x466   : > { %v7250_v21 = vpop.permute.xlu0 %3527  ;;  %v3008_v62 = vsel %vm2548_vm2, %v3007_v5, %v3003_v0 }
 0x467   : > { %v2533_v40 = vpop.permute.xlu1 %2532  ;;  %v3038_v42 = vsel %vm2693_vm7, %v3008_v62, %v3037_v36 }
 0x468   : > { %v2679_v61 = vrot.slane %v2533_v40, %v6986_v1  ;;  %v3039_v14 = vsel %vm2695_vm8, %v3017_v55, %v3038_v42  ;;  %v3324_v42 = vrot.slane %v7229_v8, %v6993_v2  ;;  %v3659_v8 = vrot.slane %v7250_v21, %v6993_v2 }
 0x46a   : > { %v2684_v31 = vsel %vm2548_vm2, %v2683_v26, %v2679_v61  ;;  %v7268_v17 = vpop.permute.xlu0 %3150 }
 0x46b   : > { %v2879_v49 = vpop.permute.xlu1 %2878  ;;  %v2705_v34 = vsel %vm2697_vm9, %v2684_v31, %v2704_v19 }
 0x46c   : > { %v3021_v24 = vrot.slane %v2879_v49, %v6986_v1  ;;  %v2752_v27 = vadd.f32 %v7688_v13, %v2705_v34  ;;  %v3261_v13 = vrot.slane %v7268_v17, %v6993_v2 }
 0x46e   : > { %v3026_v38 = vsel %vm2548_vm2, %v3025_v18, %v3021_v24  ;;  %v7281_v41 = vpop.permute.xlu0 %3198  ;;  %v7283_v25 = vmul.f32 0.17677669, %v2752_v27 }
 0x46f   : > { %v3178_v57 = vpop.permute.xlu1 %3177  ;;  %v3040_v37 = vsel %vm2697_vm9, %v3026_v38, %v3039_v14  ;;  %v3333_v14 = vrot.slane %v7281_v41, %v6993_v2 }
 0x470   : > { %v3302_v60 = vrot.slane %v3178_v57, %v6986_v1  ;;  %v3772_v20 = vsel %vm3768_vm10, %v7283_v25, -inf  ;;  %v3087_v63 = vadd.f32 %v7689_v6, %v3040_v37 }
 0x471   : > { %3773 = vmax.xlane.f32.xlu0 %v3772_v20 }
 0x472   : > { %v3307_v23 = vsel %vm2548_vm2, %v3306_v12, %v3302_v60  ;;  %v7294_v7 = vpop.permute.xlu0 %3485  ;;  %v7296_v28 = vmul.f32 0.17677669, %v3087_v63 }
 0x473   : > { %v3369_v0 = vsel %vm2685_vm3, %v3307_v23, %v7058_v11  ;;  %v3513_v44 = vpop.permute.xlu1 %3512  ;;  %v3596_v57 = vrot.slane %v7294_v7, %v6993_v2 }
 0x474   : > { %v3637_v4 = vrot.slane %v3513_v44, %v6986_v1  ;;  %v3778_v59 = vsel %vm3768_vm10, %v7296_v28, -inf  ;;  %v3370_v10 = vsel %vm2687_vm4, %v7078_v32, %v3369_v0 }
 0x475   : > { %3779 = vmax.xlane.f32.xlu1 %v3778_v59 }
 0x476   : > { %v3642_v56 = vsel %vm2548_vm2, %v3641_v33, %v3637_v4  ;;  %v7308_v5 = vpop.permute.xlu0 %3533 }
 0x477   : > { %v3704_v11 = vsel %vm2685_vm3, %v3642_v56, %v7068_v15  ;;  %v3190_v3 = vpop.permute.xlu1 %3189  ;;  %v3668_v17 = vrot.slane %v7308_v5, %v6993_v2 }
 0x478   : > { %v7314_v30 = vsel %vm2687_vm4, %v7103_v39, %v3704_v11  ;;  %v3320_v19 = vrot.slane %v3190_v3, %v6986_v1 }
 0x47a   : > { %v3157_v53 = vpop.permute.xlu0 %3156  ;;  %v3325_v34 = vsel %vm2548_vm2, %v3324_v42, %v3320_v19  ;;  %v7690_v19 = vld [vmem:[#allocation36_spill] sm:$0xff] }
 0x47b   : > { %v3525_v22 = vpop.permute.xlu1 %3524  ;;  %v3270_v37 = vrot.slane %v3157_v53, %v6993_v2  ;;  %v3371_v12 = vsel %vm2689_vm5, %v3325_v34, %v3370_v10 }
 0x47c   : > { %v3655_v27 = vrot.slane %v3525_v22, %v6986_v1 }
 0x47e   : > { %v3205_v16 = vpop.permute.xlu0 %3204  ;;  %v3660_v7 = vsel %vm2548_vm2, %v3659_v8, %v3655_v27 }
 0x47f   : > { %v3148_v54 = vpop.permute.xlu1 %3147  ;;  %v3342_v0 = vrot.slane %v3205_v16, %v6993_v2 }
 0x480   : > { %v3257_v49 = vrot.slane %v3148_v54, %v6986_v1 }
 0x482   : > { %v7316_v35 = vpop.permute.xlu0 %3491  ;;  %v3262_v60 = vsel %vm2548_vm2, %v3261_v13, %v3257_v49 }
 0x483   : > { %v3196_v32 = vpop.permute.xlu1 %3195  ;;  %v3365_v59 = vsel %vm2691_vm6, %v3262_v60, %v7136_v48  ;;  %v3605_v10 = vrot.slane %v7316_v35, %v6993_v2 }
 0x484   : > { %v3329_v18 = vrot.slane %v3196_v32, %v6986_v1 }
 0x486   : > { %v7318_v52 = vpop.permute.xlu0 %3539  ;;  %v3334_v21 = vsel %vm2548_vm2, %v3333_v14, %v3329_v18 }
 0x487   : > { %v3483_v45 = vpop.permute.xlu1 %3482  ;;  %v3372_v11 = vsel %vm2691_vm6, %v3334_v21, %v3371_v12 }
 0x488   : > { %v3592_v63 = vrot.slane %v3483_v45, %v6986_v1 }
 0x48a   : > { %v3163_v26 = vpop.permute.xlu0 %3162  ;;  %v3597_v16 = vsel %vm2548_vm2, %v3596_v57, %v3592_v63  ;;  %v7691_v57 = vld [vmem:[#allocation37_spill] sm:$0xff] }
 0x48b   : > { %v7320_v40 = vpop.permute.xlu1 %3530  ;;  %v3279_v20 = vrot.slane %v3163_v26, %v6993_v2 }
 0x48c   : > { %v3664_v32 = vrot.slane %v7320_v40, %v6986_v1  ;;  %v3700_v40 = vsel %vm2691_vm6, %v3597_v16, %v7158_v46 }
 0x48e   : > { %v3211_v61 = vpop.permute.xlu0 %3210  ;;  %v3669_v13 = vsel %vm2548_vm2, %v3668_v17, %v3664_v32  ;;  %v3706_v17 = vsel %vm2689_vm5, %v3660_v7, %v7314_v30 }
 0x48f   : > { %v3154_v62 = vpop.permute.xlu1 %3153  ;;  %v3351_v3 = vrot.slane %v3211_v61, %v6993_v2 }
 0x490   : > { %v3266_v24 = vrot.slane %v3154_v62, %v6986_v1 }
 0x492   : > { %v7324_v39 = vpop.permute.xlu0 %3497  ;;  %v3271_v41 = vsel %vm2548_vm2, %v3270_v37, %v3266_v24 }
 0x493   : > { %v3202_v15 = vpop.permute.xlu1 %3201  ;;  %v3366_v53 = vsel %vm2693_vm7, %v3271_v41, %v3365_v59  ;;  %v3614_v42 = vrot.slane %v7324_v39, %v6993_v2  ;;  %v3707_v41 = vsel %vm2691_vm6, %v3669_v13, %v3706_v17 }
 0x494   : > { %v3338_v23 = vrot.slane %v3202_v15, %v6986_v1 }
 0x496   : > { %v7328_v36 = vpop.permute.xlu0 %3545  ;;  %v3343_v48 = vsel %vm2548_vm2, %v3342_v0, %v3338_v23 }
 0x497   : > { %v7322_v29 = vpop.permute.xlu1 %3488  ;;  %v3686_v12 = vrot.slane %v7328_v36, %v6993_v2 }
 0x498   : > { %v3601_v22 = vrot.slane %v7322_v29, %v6986_v1  ;;  %v3677_v29 = vrot.slane %v7318_v52, %v6993_v2 }
 0x49a   : > { %v3169_v47 = vpop.permute.xlu0 %3168  ;;  %v3606_v49 = vsel %vm2548_vm2, %v3605_v10, %v3601_v22 }
 0x49b   : > { %v7326_v51 = vpop.permute.xlu1 %3536  ;;  %v3288_v56 = vrot.slane %v3169_v47, %v6993_v2 }
 0x49c   : > { %v3673_v34 = vrot.slane %v7326_v51, %v6986_v1 }
 0x49e   : > { %v3217_v6 = vpop.permute.xlu0 %3216 }
 0x49f   : > { %v3160_v9 = vpop.permute.xlu1 %3159 }
 0x4a0   : > { %v3275_v55 = vrot.slane %v3160_v9, %v6986_v1  ;;  %v3360_v9 = vrot.slane %v3217_v6, %v6993_v2 }
 0x4a2   : > { %v3280_v44 = vsel %vm2548_vm2, %v3279_v20, %v3275_v55  ;;  %v3504_v45 = vpop.permute.xlu0 %3503  ;;  %v3678_v20 = vsel %vm2548_vm2, %v3677_v29, %v3673_v34 }
 0x4a3   : > { %v3208_v31 = vpop.permute.xlu1 %3207  ;;  %v3367_v54 = vsel %vm2695_vm8, %v3280_v44, %v3366_v53  ;;  %v3623_v8 = vrot.slane %v3504_v45, %v6993_v2  ;;  %v3708_v59 = vsel %vm2693_vm7, %v3678_v20, %v3707_v41  ;;  %v7693_v53 = vld [vmem:[#allocation40_spill] sm:$0xff] }
 0x4a4   : > { %v3347_v33 = vrot.slane %v3208_v31, %v6986_v1 }
 0x4a6   : > { %v3352_v26 = vsel %vm2548_vm2, %v3351_v3, %v3347_v33  ;;  %v3552_v60 = vpop.permute.xlu0 %3551  ;;  %v7692_v33 = vld [vmem:[#allocation39_spill] sm:$0xff] }
 0x4a7   : > { %v3495_v50 = vpop.permute.xlu1 %3494  ;;  %v3695_v36 = vrot.slane %v3552_v60, %v6993_v2 }
 0x4a8   : > { %v3610_v62 = vrot.slane %v3495_v50, %v6986_v1  ;;  %v3373_v50 = vsel %vm2693_vm7, %v3343_v48, %v3372_v11 }
 0x4a9   : > { %v3374_v52 = vsel %vm2695_vm8, %v3352_v26, %v3373_v50 }
 0x4aa   : > { %v3615_v46 = vsel %vm2548_vm2, %v3614_v42, %v3610_v62 }
 0x4ab   : > { %v7341_v38 = vpop.permute.xlu1 %3542 }
 0x4ac   : > { %v3682_v39 = vrot.slane %v7341_v38, %v6986_v1  ;;  %v3701_v38 = vsel %vm2693_vm7, %v3606_v49, %v3700_v40 }
 0x4ad   : > { %v3702_v6 = vsel %vm2695_vm8, %v3615_v46, %v3701_v38 }
 0x4ae   : > { %v3687_v23 = vsel %vm2548_vm2, %v3686_v12, %v3682_v39 }
 0x4af   : > { %v3166_v4 = vpop.permute.xlu1 %3165  ;;  %v3709_v10 = vsel %vm2695_vm8, %v3687_v23, %v3708_v59  ;;  %v7694_v23 = vld [vmem:[#allocation23_spill] sm:$0xff] }
 0x4b0   : > { %v3284_v5 = vrot.slane %v3166_v4, %v6986_v1 }
 0x4b2   : > { %v3289_v35 = vsel %vm2548_vm2, %v3288_v56, %v3284_v5 }
 0x4b3   : > { %v3214_v15 = vpop.permute.xlu1 %3213  ;;  %v3368_v61 = vsel %vm2697_vm9, %v3289_v35, %v3367_v54 }
 0x4b4   : > { %v3356_v31 = vrot.slane %v3214_v15, %v6986_v1  ;;  %v3419_v47 = vadd.f32 %v7690_v19, %v3368_v61 }
 0x4b6   : > { %v3361_v18 = vsel %vm2548_vm2, %v3360_v9, %v3356_v31  ;;  %v7398_v24 = vmul.f32 0.17677669, %v3419_v47 }
 0x4b7   : > { %v3501_v27 = vpop.permute.xlu1 %3500  ;;  %v3375_v55 = vsel %vm2697_vm9, %v3361_v18, %v3374_v52 }
 0x4b8   : > { %v3619_v51 = vrot.slane %v3501_v27, %v6986_v1  ;;  %v3781_v14 = vsel %vm3768_vm10, %v7398_v24, -inf  ;;  %v3422_v37 = vadd.f32 %v7691_v57, %v3375_v55 }
 0x4b9   : > { %3782 = vmax.xlane.f32.xlu0 %v3781_v14 }
 0x4ba   : > { %v3624_v21 = vsel %vm2548_vm2, %v3623_v8, %v3619_v51  ;;  %v3765_v63 = vmul.f32 0.17677669, %v3422_v37 }
 0x4bb   : > { %v3549_v0 = vpop.permute.xlu1 %3548  ;;  %v3703_v30 = vsel %vm2697_vm9, %v3624_v21, %v3702_v6 }
 0x4bc   : > { %v3691_v7 = vrot.slane %v3549_v0, %v6986_v1  ;;  %v3784_v44 = vsel %vm3768_vm10, %v3765_v63, -inf  ;;  %v3754_v4 = vadd.f32 %v7692_v33, %v3703_v30  ;;  %v7695_v0 = vld [vmem:[#allocation22_spill] sm:$0xff]  ;;  %v7696_v33 = vld [vmem:[#allocation20_spill] sm:$0xff] }
 0x4bd   : > { %3785 = vmax.xlane.f32.xlu1 %v3784_v44  ;;  %v1559_v30 = vcombine.high %v7695_v0, %v7694_v23 }
 0x4be   : > { %v3696_v56 = vsel %vm2548_vm2, %v3695_v36, %v3691_v7  ;;  %v3766_v5 = vmul.f32 0.17677669, %v3754_v4  ;;  %v7697_v4 = vld [vmem:[#allocation21_spill] sm:$0xff] }
 0x4bf   : > { %v3710_v11 = vsel %vm2697_vm9, %v3696_v56, %v3709_v10  ;;  %v1509_v59 = vcombine.high %v7697_v4, %v7696_v33 }
 0x4c0   : > { %v3787_v3 = vsel %vm3768_vm10, %v3766_v5, -inf  ;;  %v3757_v2 = vadd.f32 %v7693_v53, %v3710_v11  ;;  %v1573_v11 = vshrl.u32 %v1559_v30, 16 }
 0x4c1   : > { %3788 = vmax.xlane.f32.xlu0 %v3787_v3 }
 0x4c2   : > { %v3767_v1 = vmul.f32 0.17677669, %v3757_v2  ;;  %v1572_v2 = vshrl.u32 %v1509_v59, 16 }
 0x4c4   : > { %v3790_v22 = vsel %vm3768_vm10, %v3767_v1, -inf }
 0x4c5   : > { %3791 = vmax.xlane.f32.xlu1 %v3790_v22 }
 0x4d3   : > { %v3777_v16 = vpop.xlane.xlu0 %3776 }
 0x4d4   : > { %v3795_v48 = vsub.f32 %v7095_v43, %v3777_v16  ;;  %v1574_v16 = vpack.i.b16 %v1573_v11, %v1572_v2  ;;  %v7700_v11 = vld [vmem:[#allocation18_spill] sm:$0xff] }
 0x4d6   : > { %v3805_v32 = vmul.f32 1.442695, %v3795_v48 }
 0x4ec   : > { %v3771_v54 = vpop.xlane.xlu1 %3770 }
 0x4ed   : > { %v3793_v35 = vsub.f32 %v7189_v58, %v3771_v54 }
 0x4ef   : > { %v3801_v45 = vmul.f32 1.442695, %v3793_v35 }
 0x4f1   : > { %5012 = vpow2.f32 %v3801_v45 }
 0x4f2   : > { %5014 = vpow2.f32 %v3805_v32 }
 0x4fb   : > { %v5013_v26 = vpop.eup %5012 }
 0x4fc   : > { %v3817_v62 = vsel %vm3768_vm10, %v5013_v26, 0.0  ;;  %v7435_v15 = vpop.eup %5014 }
 0x4fd   : > { %3818 = vadd.xlane.f32.xlu0 %v3817_v62  ;;  %v3823_v9 = vsel %vm3768_vm10, %v7435_v15, 0.0 }
 0x4fe   : > { %v3774_v61 = vpop.xlane.xlu0 %3773 }
 0x4ff   : > { %v3794_v29 = vsub.f32 %v7283_v25, %v3774_v61 }
 0x501   : > { %v3803_v43 = vmul.f32 1.442695, %v3794_v29  ;;  %3824 = vadd.xlane.f32.xlu0 %v3823_v9 }
 0x502   : > { %v3780_v31 = vpop.xlane.xlu1 %3779 }
 0x503   : > { %5016 = vpow2.f32 %v3803_v43  ;;  %v3796_v58 = vsub.f32 %v7296_v28, %v3780_v31 }
 0x505   : > { %v3807_v19 = vmul.f32 1.442695, %v3796_v58 }
 0x507   : > { %5018 = vpow2.f32 %v3807_v19  ;;  %v5004_v19 = vld [vmem:[#allocation8] sm:$0xff]  }
 0x50d   : > { %v5017_v47 = vpop.eup %5016 }
 0x50e   : > { %v3820_v40 = vsel %vm3768_vm10, %v5017_v47, 0.0 }
 0x50f   : > { %3821 = vadd.xlane.f32.xlu1 %v3820_v40  ;;  %v5006_v40 = vld [vmem:[#allocation8 + $0x10] sm:$0xff]  }
 0x511   : > { %v5019_v42 = vpop.eup %5018 }
 0x512   : > { %v3826_v50 = vsel %vm3768_vm10, %v5019_v42, 0.0 }
 0x513   : > { %3827 = vadd.xlane.f32.xlu1 %v3826_v50  ;;  %v5008_v50 = vld [vmem:[#allocation8 + $0x20] sm:$0xff]  }
 0x546   : > { %v3783_v25 = vpop.xlane.xlu0 %3782 }
 0x547   : > { %v3797_v49 = vsub.f32 %v7398_v24, %v3783_v25 }
 0x549   : > { %v3809_v34 = vmul.f32 1.442695, %v3797_v49 }
 0x54a   : > { %v3786_v52 = vpop.xlane.xlu1 %3785 }
 0x54b   : > { %5020 = vpow2.f32 %v3809_v34  ;;  %v3798_v18 = vsub.f32 %v3765_v63, %v3786_v52  ;;  %v5009_v52 = vld [vmem:[#allocation8 + $0x28] sm:$0xff]  }
 0x54d   : > { %v3811_v13 = vmul.f32 1.442695, %v3798_v18 }
 0x54e   : > { %v3789_v46 = vpop.xlane.xlu0 %3788 }
 0x54f   : > { %5022 = vpow2.f32 %v3811_v13  ;;  %v3799_v28 = vsub.f32 %v3766_v5, %v3789_v46  ;;  %v1570_v5 = vpack.i.b16 %v1559_v30, %v1509_v59 }
 0x551   : > { %v3813_v39 = vmul.f32 1.442695, %v3799_v28 }
 0x552   : > { %v3792_v27 = vpop.xlane.xlu1 %3791 }
 0x553   : > { %5024 = vpow2.f32 %v3813_v39  ;;  %v3800_v55 = vsub.f32 %v3767_v1, %v3792_v27  ;;  %v7698_v1 = vmov 0.0  }
 0x555   : > { %v5021_v8 = vpop.eup %5020  ;;  %v3815_v51 = vmul.f32 1.442695, %v3800_v55 }
 0x556   : > { %v3829_v14 = vsel %vm3768_vm10, %v5021_v8, 0.0 }
 0x557   : > { %5026 = vpow2.f32 %v3815_v51  ;;  %3830 = vadd.xlane.f32.xlu0 %v3829_v14 }
 0x559   : > { %v5023_v57 = vpop.eup %5022 }
 0x55a   : > { %v3832_v24 = vsel %vm3768_vm10, %v5023_v57, 0.0 }
 0x55b   : > { %3833 = vadd.xlane.f32.xlu1 %v3832_v24 }
 0x55d   : > { %v5025_v37 = vpop.eup %5024 }
 0x55e   : > { %v3835_v17 = vsel %vm3768_vm10, %v5025_v37, 0.0 }
 0x55f   : > { %3836 = vadd.xlane.f32.xlu0 %v3835_v17 }
 0x561   : > { %v5027_v12 = vpop.eup %5026 }
 0x562   : > { %v3838_v38 = vsel %vm3768_vm10, %v5027_v12, 0.0 }
 0x563   : > { %3839 = vadd.xlane.f32.xlu1 %v3838_v38 }
 0x58a   : > { %v3819_v60 = vpop.xlane.xlu0 %3818 }
 0x58b   : > { %5028 = vrcp.f32 %v3819_v60 }
 0x58e   : > { %v3825_v20 = vpop.xlane.xlu0 %3824 }
 0x595   : > { %v5029_v63 = vpop.eup %5028 }
 0x596   : > { %v3849_v36 = vmul.f32 %v5029_v63, %v5013_v26 }
 0x59c   : > { %v3822_v6 = vpop.xlane.xlu1 %3821 }
 0x59d   : > { %5030 = vrcp.f32 %v3822_v6 }
 0x59e   : > { %5032 = vrcp.f32 %v3825_v20  ;;  %v7699_v20 = vld [vmem:[#allocation17_spill] sm:$0xff] }
 0x5a0   : > { %v3828_v21 = vpop.xlane.xlu1 %3827 }
 0x5a1   : > { %5034 = vrcp.f32 %v3828_v21 }
 0x5a7   : > { %v5031_v41 = vpop.eup %5030 }
 0x5a8   : > { %v3850_v7 = vmul.f32 %v5031_v41, %v5017_v47  ;;  %v5033_v44 = vpop.eup %5032  ;;  %v5005_v47 = vld [vmem:[#allocation8 + $0x8] sm:$0xff]  }
 0x5a9   : > { %v3851_v3 = vmul.f32 %v5033_v44, %v7435_v15 }
 0x5aa   : > { %v3857_v10 = vpack.c.bf16 %v3850_v7, %v3849_v36 }
 0x5ab   : > { %v5035_v56 = vpop.eup %5034 }
 0x5ac   : > { %v3852_v53 = vmul.f32 %v5035_v56, %v5019_v42  ;;  %4821 = vmatmul.mubr.msk.bf16.vlgmr.msra.gmra.mrb[4].mxu0 %vm3768_vm10, %v3857_v10  ;;  %v5007_v42 = vld [vmem:[#allocation8 + $0x18] sm:$0xff]  }
 0x5ad   : > { %4831 = vmatpush3.bf16.msra.mxu0 %v1570_v5  ;;  %4832 = vmatprep.mubr.msk.bf16.mxu0 %vm5246_vm0, %v7698_v1 }
 0x5ae   : > { %v3858_v22 = vpack.c.bf16 %v3852_v53, %v3851_v3  ;;  %4842 = vmatprep.subr.bf16.mxu0 %v7698_v1 }
 0x5b0   : > { %4827 = vmatmul.mubr.msk.bf16.vlgmr.msra.gmra.mrb[20].mxu1 %vm3768_vm10, %v3858_v22 }
 0x5b1   : > { %4837 = vmatpush3.bf16.msra.mxu1 %v1574_v16  ;;  %4838 = vmatprep.mubr.msk.bf16.mxu1 %vm5246_vm0, %v7698_v1 }
 0x5e4   : > { %v3831_v48 = vpop.xlane.xlu0 %3830 }
 0x5e5   : > { %5036 = vrcp.f32 %v3831_v48 }
 0x5e8   : > { %v3834_v54 = vpop.xlane.xlu1 %3833 }
 0x5e9   : > { %5038 = vrcp.f32 %v3834_v54 }
 0x5ec   : > { %v3837_v35 = vpop.xlane.xlu0 %3836 }
 0x5ed   : > { %5040 = vrcp.f32 %v3837_v35 }
 0x5ef   : > { %v5037_v45 = vpop.eup %5036 }
 0x5f0   : > { %v3840_v32 = vpop.xlane.xlu1 %3839  ;;  %v3853_v62 = vmul.f32 %v5037_v45, %v5021_v8 }
 0x5f1   : > { %5042 = vrcp.f32 %v3840_v32 }
 0x5f3   : > { %v5039_v26 = vpop.eup %5038 }
 0x5f4   : > { %v3854_v15 = vmul.f32 %v5039_v26, %v5023_v57 }
 0x5f6   : > { %v3859_v61 = vpack.c.bf16 %v3854_v15, %v3853_v62 }
 0x5f7   : > { %v5041_v29 = vpop.eup %5040 }
 0x5f8   : > { %4833 = vmatmul.mubr.msk.bf16.vlgmr.msra.gmra.mrb[8].mxu0 %vm3768_vm10, %v3859_v61  ;;  %v3855_v43 = vmul.f32 %v5041_v29, %v5025_v37 }
 0x5f9   : > { %4858 = vmatprep.mubr.msk.bf16.mxu0 %vm5246_vm0, %v7698_v1  ;;  %4843 = vmatpush3.bf16.msra.mxu0 %v5004_v19 }
 0x5fa   : > { %4844 = vmatprep.subr.bf16.mxu0 %v7698_v1 }
 0x5fb   : > { %v5043_v9 = vpop.eup %5042 }
 0x5fc   : > { %v3856_v31 = vmul.f32 %v5043_v9, %v5027_v12 }
 0x5fd   : > { %4845 = vmatpush3.bf16.msra.mxu0 %v5005_v47 }
 0x5fe   : > { %v3860_v58 = vpack.c.bf16 %v3856_v31, %v3855_v43  ;;  %4846 = vmatprep.subr.bf16.mxu0 %v7698_v1 }
 0x600   : > { %4839 = vmatmul.mubr.msk.bf16.vlgmr.msra.gmra.mrb[24].mxu1 %vm3768_vm10, %v3860_v58 }
 0x601   : > { %4847 = vmatpush3.bf16.msra.mxu0 %v5006_v40 }
 0x602   : > { %4848 = vmatprep.subr.bf16.mxu0 %v7698_v1 }
 0x605   : > { %4849 = vmatpush3.bf16.msra.mxu0 %v5007_v42 }
 0x606   : > { %4850 = vmatprep.subr.bf16.mxu0 %v7698_v1 }
 0x609   : > { %4851 = vmatpush3.bf16.msra.mxu0 %v5008_v50 }
 0x60a   : > { %4852 = vmatprep.subr.bf16.mxu0 %v7698_v1 }
 0x60d   : > { %4853 = vmatpush3.bf16.msra.mxu0 %v5009_v52 }
 0x60e   : > { %4854 = vmatprep.subr.bf16.mxu0 %v7698_v1 }
 0x67f   : > { %v3898_v25 = vpop.f32.mrb[4].mxu0 }
 0x680   : > { %v4822_v49 = vpop.f32.mrb[5].mxu0 }
 0x681   : > { %v3901_v34 = vpop.f32.mrb[6].mxu0 }
 0x682   : > { %v4823_v18 = vpop.f32.mrb[7].mxu0 }
 0x683   : > { %v3942_v13 = vpop.f32.mrb[20].mxu1  ;;  %v5010_v18 = vld [vmem:[#allocation8 + $0x30] sm:$0xff]  }
 0x684   : > { %v4828_v46 = vpop.f32.mrb[21].mxu1  ;;  %4855 = vmatpush3.bf16.msra.mxu0 %v5010_v18 }
 0x685   : > { %v3945_v28 = vpop.f32.mrb[22].mxu1  ;;  %4856 = vmatprep.subr.bf16.mxu0 %v7698_v1 }
 0x686   : > { %v4829_v39 = vpop.f32.mrb[23].mxu1 }
 0x6cb   : > { %v3986_v27 = vpop.f32.mrb[8].mxu0 }
 0x6cc   : > { %v4037_v55 = vcombine.low %v3898_v25, %v3986_v27  ;;  %v4038_v8 = vcombine.high %v3898_v25, %v3986_v27  ;;  %v4834_v51 = vpop.f32.mrb[9].mxu0 }
 0x6cd   : > { %v3989_v14 = vpop.f32.mrb[10].mxu0 }
 0x6ce   : > { %v4105_v57 = vcombine.low %v3901_v34, %v3989_v14  ;;  %v4106_v24 = vcombine.high %v3901_v34, %v3989_v14  ;;  %v4835_v37 = vpop.f32.mrb[11].mxu0  ;;  %v4045_v6 = vrot.slane %v4037_v55, %v7699_v20  ;;  %v4052_v21 = vrot.slane %v4038_v8, %v7699_v20 }
 0x6d0   : > { %v4113_v59 = vrot.slane %v4105_v57, %v7699_v20  ;;  %v4120_v10 = vrot.slane %v4106_v24, %v7699_v20 }
 0x6d3   : > { %v4030_v17 = vpop.f32.mrb[24].mxu1 }
 0x6d4   : > { %v4053_v12 = vcombine.low %v3942_v13, %v4030_v17  ;;  %v4054_v38 = vcombine.high %v3942_v13, %v4030_v17  ;;  %v4840_v60 = vpop.f32.mrb[25].mxu1 }
 0x6d5   : > { %v4033_v63 = vpop.f32.mrb[26].mxu1 }
 0x6d6   : > { %v4061_v41 = vrot.slane %v4053_v12, %v7699_v20  ;;  %v4068_v23 = vrot.slane %v4054_v38, %v7699_v20  ;;  %v4121_v0 = vcombine.low %v3945_v28, %v4033_v63  ;;  %v4122_v30 = vcombine.high %v3945_v28, %v4033_v63  ;;  %v4841_v36 = vpop.f32.mrb[27].mxu1 }
 0x6d8   : > { %v4069_v7 = vcombine.low %v4045_v6, %v4061_v41  ;;  %v4070_v44 = vcombine.high %v4045_v6, %v4061_v41  ;;  %v4085_v33 = vcombine.low %v4052_v21, %v4068_v23  ;;  %v4086_v4 = vcombine.high %v4052_v21, %v4068_v23  ;;  %v5011_v41 = vld [vmem:[#allocation8 + $0x38] sm:$0xff]  }
 0x6d9   : > { %v4129_v56 = vrot.slane %v4121_v0, %v7699_v20  ;;  %v4136_v5 = vrot.slane %v4122_v30, %v7699_v20  ;;  %4857 = vmatpush3.bf16.msra.mxu0 %v5011_v41 }
 0x6da   : > { %v4077_v3 = vrot.slane %v4069_v7, %v7700_v11  ;;  %v4084_v53 = vrot.slane %v4070_v44, %v7700_v11  ;;  %v4093_v2 = vrot.slane %v4085_v33, %v7700_v11  ;;  %v4100_v22 = vrot.slane %v4086_v4, %v7700_v11 }
 0x6db   : > { %v4137_v16 = vcombine.low %v4113_v59, %v4129_v56  ;;  %v4138_v48 = vcombine.high %v4113_v59, %v4129_v56  ;;  %v4153_v54 = vcombine.low %v4120_v10, %v4136_v5  ;;  %v4154_v35 = vcombine.high %v4120_v10, %v4136_v5 }
 0x6dc   : > { %v4173_v32 = vcombine.low %v4077_v3, %v4084_v53  ;;  %v4640_v45 = vcombine.high %v4077_v3, %v4084_v53  ;;  %v4189_v26 = vcombine.low %v4093_v2, %v4100_v22  ;;  %v4641_v62 = vcombine.high %v4093_v2, %v4100_v22 }
 0x6dd   : > { %v4145_v15 = vrot.slane %v4137_v16, %v7700_v11  ;;  %v4152_v61 = vrot.slane %v4138_v48, %v7700_v11  ;;  %v4161_v29 = vrot.slane %v4153_v54, %v7700_v11  ;;  %v4168_v9 = vrot.slane %v4154_v35, %v7700_v11 }
 0x6de   : > { %v4180_v43 = vrot.slane %v4173_v32, %v7699_v20  ;;  %v4188_v31 = vrot.slane %v4640_v45, %v7699_v20  ;;  %v4196_v58 = vrot.slane %v4189_v26, %v7699_v20  ;;  %v4204_v19 = vrot.slane %v4641_v62, %v7699_v20  ;;  %v4644_v45 = vld [vmem:[%s7571_s5] ss:$0 sm:$0xff] }
 0x6df   : > { %v4241_v47 = vcombine.low %v4145_v15, %v4152_v61  ;;  %v4642_v40 = vcombine.high %v4145_v15, %v4152_v61  ;;  %v4257_v42 = vcombine.low %v4161_v29, %v4168_v9  ;;  %v4643_v50 = vcombine.high %v4161_v29, %v4168_v9  ;;  %v4653_v62 = vld [vmem:[%s7572_s6] ss:$0 sm:$0xff] }
 0x6e0   : > { %v4206_v25 = vcombine.high %v4180_v43, %v4188_v31  ;;  %v4222_v49 = vcombine.high %v4196_v58, %v4204_v19  ;;  %v4205_v34 = vcombine.low %v4180_v43, %v4188_v31  ;;  %v4221_v52 = vcombine.low %v4196_v58, %v4204_v19 }
 0x6e1   : > { %v4248_v13 = vrot.slane %v4241_v47, %v7699_v20  ;;  %v4256_v46 = vrot.slane %v4642_v40, %v7699_v20  ;;  %v4264_v28 = vrot.slane %v4257_v42, %v7699_v20  ;;  %v4272_v39 = vrot.slane %v4643_v50, %v7699_v20 }
 0x6e2   : > { %v4220_v27 = vrot.slane %v4206_v25, %v7700_v11  ;;  %v4236_v55 = vrot.slane %v4222_v49, %v7700_v11  ;;  %v4213_v8 = vrot.slane %v4205_v34, %v7700_v11  ;;  %v4229_v51 = vrot.slane %v4221_v52, %v7700_v11 }
 0x6e3   : > { %v4274_v14 = vcombine.high %v4248_v13, %v4256_v46  ;;  %v4290_v57 = vcombine.high %v4264_v28, %v4272_v39  ;;  %v4273_v24 = vcombine.low %v4248_v13, %v4256_v46  ;;  %v4289_v37 = vcombine.low %v4264_v28, %v4272_v39 }
 0x6e4   : > { %v4239_v17 = vcombine.low %v4220_v27, %v4236_v55  ;;  %v4238_v12 = vcombine.high %v4213_v8, %v4229_v51  ;;  %v4240_v38 = vcombine.high %v4220_v27, %v4236_v55  ;;  %v4237_v60 = vcombine.low %v4213_v8, %v4229_v51 }
 0x6e5   : > { %v4288_v20 = vrot.slane %v4274_v14, %v7700_v11  ;;  %v4304_v6 = vrot.slane %v4290_v57, %v7700_v11  ;;  %v4281_v21 = vrot.slane %v4273_v24, %v7700_v11  ;;  %v4297_v63 = vrot.slane %v4289_v37, %v7700_v11 }
 0x6e7   : > { %v4307_v23 = vcombine.low %v4288_v20, %v4304_v6  ;;  %v4306_v0 = vcombine.high %v4281_v21, %v4297_v63  ;;  %v4308_v30 = vcombine.high %v4288_v20, %v4304_v6  ;;  %v4305_v36 = vcombine.low %v4281_v21, %v4297_v63 }
 0x6e9   : > { %v4962_v7 = vpack.i.bf16 %v4307_v23, %v4239_v17  ;;  %v4957_v1 = vpack.i.bf16 %v4306_v0, %v4238_v12  ;;  %v4967_v44 = vpack.i.bf16 %v4308_v30, %v4240_v38 }
 0x6eb   : > { %4963 = vrot.lane.b32.xlu1 %v4962_v7, %s5248_s14  ;;  %4958 = vrot.lane.b32.xlu0 %v4957_v1, %s5249_s29 }
 0x6ef   : > { %4968 = vrot.lane.b32.xlu1 %v4967_v44, %s5247_s19  ;;  %s5162_s19 = sshll.u32 %s5252_s28, 4  ;;  %s5163_s19 = int_to_ptr.vmem [resolvable:$false] %s5162_s19 }
 0x6f0   : > { %s5164_s14 = scalar_lea.vmem %s5163_s19, 512  ;;  %p5165_p12 = scmp.lt.s32.totalorder %s7517_s1, %s5163_s19 }
 0x6f1   : > { %p5166_p1 = scmp.lt.s32.totalorder %s5164_s14, %s5158_s9 }
 0x6f3   : > { %p5167_p2 = por %p5166_p1, %p5165_p12 }
 0x6f5   : > { %p5168_p4 = pnand %p5167_p2, %p5161_p7 }
 0x75d   : > { %v4964_v33 = vpop.permute.xlu1 %4963  ;;  %v4959_v4 = vpop.permute.xlu0 %4958 }
 0x75e   : > { %v4961_v59 = vunpack.i.h.bf16 %v4959_v4  ;;  %v4960_v10 = vunpack.i.l.bf16 %v4959_v4  ;;  %v4966_v56 = vunpack.i.h.bf16 %v4964_v33  ;;  %v4965_v5 = vunpack.i.l.bf16 %v4964_v33 }
 0x760   : > { %v4333_v11 = vsel %vm1736_vm1, %v4237_v60, %v4960_v10  ;;  %v4334_v3 = vsel %vm1736_vm1, %v4305_v36, %v4961_v59 }
 0x761   : > { %v4969_v53 = vpop.permute.xlu1 %4968  ;;  %v4336_v16 = vsel %vm4335_vm11, %v4333_v11, %v4965_v5  ;;  %v4337_v48 = vsel %vm4335_vm11, %v4334_v3, %v4966_v56 }
 0x762   : > { %v4971_v2 = vunpack.i.h.bf16 %v4969_v53  ;;  %v4970_v22 = vunpack.i.l.bf16 %v4969_v53 }
 0x764   : > { %v4339_v54 = vsel %vm4338_vm12, %v4336_v16, %v4970_v22  ;;  %v4340_v35 = vsel %vm4338_vm12, %v4337_v48, %v4971_v2 }
 0x765   : > { %v4341_v32 = vpack.c.bf16 %v4340_v35, %v4339_v54 }
 0x767   : > { %4859 = vmatmul.mubr.bf16.vlgmr.msra.gmra.mrb[12].mxu0 %v4341_v32 }
 0x83a   : > { %v4447_v26 = vpop.f32.mrb[12].mxu0 }
 0x83b   : > { %v4448_v15 = vadd.f32 %v4644_v45, %v4447_v26  ;;  %v4860_v61 = vpop.f32.mrb[13].mxu0 }
 0x83c   : > { %v4450_v29 = vpop.f32.mrb[14].mxu0 }
 0x83d   : > { %v4461_v9 = vmul.f32 %v4653_v62, %v4448_v15  ;;  %v4451_v43 = vadd.f32 %v4644_v45, %v4450_v29  ;;  %v4861_v31 = vpop.f32.mrb[15].mxu0 }
 0x83f   : > { %4463 = vst [vmem:[%s340_s11] sm:$0xff] %v4461_v9  ;;  %v4462_v58 = vmul.f32 %v4653_v62, %v4451_v43 }
 0x841   : > { %4464 = vst [vmem:[%s340_s11 + $0x8] sm:$0xff] %v4462_v58 }
 0x842   : > { %5171 = shalt.err (!%p5168_p4)
}
 0x843   : > { %s5172_s29 = scalar_lea.hbm %s7522_s30, 256  ;;  %s5176_s22 = scalar_lea.hbm %s7573_s7, 512 }
 0x844   : > { %p5173_p9 = scmp.ne.s32.totalorder %s7522_s30, %s5172_s29  ;;  %p5177_p8 = scmp.lt.u32.totalorder %s7522_s30, %s7573_s7 }
 0x845   : > { %p5178_p13 = scmp.lt.u32.totalorder %s5176_s22, %s5172_s29  ;;  %p5180_p10 = scmp.lt.u32.totalorder %s5172_s29, %s7522_s30 }
 0x846   : > { %p5174_p0 = pnand %p5173_p9, %p5443_p5 }
 0x847   : > { %p5179_p6 = por %p5178_p13, %p5177_p8 }
 0x848   : > { %p5175_p11 = pneg %p5174_p0 }
 0x849   : > { %p5181_p3 = por %p5180_p10, %p5179_p6 }
 0x84b   : > { %p5182_p7 = pnand %p5181_p3, %p5175_p11 }
 0x84d   : > { %5185 = shalt.err (!%p5182_p7)
}
 0x84e   : > { %s5253_s8 = smov 128   ;;  %s5254_s17 = smov 8  }
 0x84f   : > { %4876 = dma.vmem_to_hbm [thread:$0]  (%p5443_p5), %s7517_s1, 256, %s7522_s30, %s4466_s12, %s5253_s8, %s5253_s8, %s5254_s17  }
 0x850 PF: > { %s7701_s18 = sld [smem:[#allocation15_spill]]  ;;  %s4494_s9 = sand.u32 1, %s5220_s24  }
 0x851   : > { %p7703_p1 = scmp.ge.s32.totalorder %s5232_s27, 2  ;;  %s4495_s28 = scalar_lea.sflag [#allocation4], %s4494_s9 }
 0x856   : > { %p7702_p12 = scmp.ne.s32.totalorder %s7701_s18, 0 }
 0x858   : > { %p4893_p2 = pnand %p7703_p1, %p7702_p12 }
 0x85a   : > { %5215 = dma.done.wait (!%p4893_p2), %s4495_s28, 256  }
 0x85b   : > { %5217 = vsyncadd (!%p4893_p2), %s4495_s28, 4294967040  ;;  %p22_p4 = scmp.ge.s32.totalorder %s5408_s21, 4   ;;  %s7704_s24 = smov %s5224_s25 }
 0x85c   : > { %s7705_s25 = smov %s5228_s26  ;;  %s7706_s26 = smov %s5439_s13 }
 0x85d   : > { %s7707_s27 = smov %s5408_s21  ;;  %24 = sbr.rel (!%p22_p4) target bundleno = 9 (0x9), region = 105 }
 0x864   :  { %4500 = vsyncpa [#allocation3], 1 }
 0x865   :  { %4502 = vsyncpa [#allocation3 + $0x1], 1 }
 0x866   :  { %4503 = vsyncpa [#allocation6], 1 }
 0x867   :  { %4504 = vsyncpa [#allocation9], 1 }
 0x868   :  { %4505 = vsyncpa [#allocation4], 1 }
 0x869   :  { %4507 = vsyncpa [#allocation4 + $0x1], 1 }

</bundles_post_ra>
